<compile_context>
chip_gen: v6e
topology: v6e:2x2x1
jax: 0.10.0
libtpu: 0.0.40
codegen_flags: <defaults>
</compile_context>

<pallas_src>
import functools

import jax
import jax.numpy as jnp
from jax.experimental import pallas as pl
from jax.experimental.pallas import tpu as pltpu


def convblock_kernel(x_ref, w_ref, b_ref, o_ref, acc_ref, *,
                     ksize, conv_h, conv_w, cin):
    """Fused 3x3 conv + ReLU + 2x2 max-pool for one (image, row-tile).

    x_ref:   (conv_h + 2, conv_w + 2, cin)     bf16  zero-padded input rows (halo)
    w_ref:   (ksize*ksize, cin, cpad)          bf16  taps, Cout zero-padded to 128
    b_ref:   (1, cpad)                         f32
    o_ref:   (conv_h//2 * conv_w//2, cpad)     f32   pooled output rows
    acc_ref: (conv_h * conv_w, cpad)           f32   conv accumulator (VMEM scratch)
    """
    m = conv_h * conv_w
    cpad = o_ref.shape[-1]

    # Conv as ksize*ksize shifted matmuls accumulated in f32 (bf16 inputs on MXU).
    for t in range(ksize * ksize):
        kh, kw = t // ksize, t % ksize
        lhs = x_ref[kh:kh + conv_h, kw:kw + conv_w, :].reshape(m, cin)
        z = jnp.dot(lhs, w_ref[t], preferred_element_type=jnp.float32)
        if t == 0:
            acc_ref[...] = z
        else:
            acc_ref[...] += z

    # 2x2 max-pool. Rows of acc are in (h, w) order.
    ph, pw = conv_h // 2, conv_w // 2
    half = m // 2
    # (a) pool along w: adjacent-row pairs via sublane-strided reads of the scratch.
    yw = jnp.maximum(acc_ref[pl.ds(0, half, 2), :],
                     acc_ref[pl.ds(1, half, 2), :])          # (conv_h*pw, cpad)
    # (b) pool along h: partner rows are `pw` apart -> tile-friendly slices.
    yw = yw.reshape(ph, 2 * pw, cpad)
    y = jnp.maximum(yw[:, :pw, :], yw[:, pw:, :])            # (ph, pw, cpad)

    # Bias + ReLU once, after the pool (equivalent ordering).
    y = jnp.maximum(y + b_ref[...], 0.0)
    o_ref[...] = y.reshape(ph * pw, cpad).astype(o_ref.dtype)


def _round_up(v, m):
    return (v + m - 1) // m * m


@functools.partial(jax.jit, static_argnames=("pool",))
def conv_block(x, weight, bias, *, pool=2):
    """ConvBlock forward. x: (N, Cin, H, W), weight: (Cout, Cin, k, k), bias: (Cout,)."""
    n, cin, h, w = x.shape
    oc, cin_w, kh_, kw_ = weight.shape
    assert cin_w == cin and kh_ == kw_
    ksize = kh_
    pad = ksize // 2                       # matches nn.Conv2d(padding=1) for k=3
    assert h % pool == 0 and w % pool == 0, "even spatial dims expected"
    hh, wh = h // pool, w // pool

    cin_p = _round_up(cin, 8)              # K granule for MXU / DMA rows
    cpad = _round_up(max(oc, 128), 128)    # lane-dense output channels

    # ---- layout glue (cheap; no im2col amplification) ----------------------
    x_nhwc = jnp.transpose(x, (0, 2, 3, 1))
    xp = jnp.pad(x_nhwc, ((0, 0), (pad, pad), (pad, pad), (0, cin_p - cin)))
    xp = xp.astype(jnp.bfloat16)           # (N, H+2p, W+2p, cin_p)

    # Pooled-row tile: largest divisor of hh keeping <=512 conv pixels per tile
    # and a sublane-aligned (multiple-of-8) output tile.
    th = 1
    for cand in range(1, hh + 1):
        if hh % cand == 0 and pool * cand * w <= 512 and (cand * wh) % 8 == 0:
            th = cand
    if (th * wh) % 8 != 0:
        th = hh  # TODO(synk): mask ragged output tiles instead of single-tile fallback
    # TODO(synk): add W tiling for very wide images (W > 256).
    n_h = hh // th
    conv_h = pool * th
    rows_in = conv_h + 2 * pad
    w_pad = w + 2 * pad

    # Overlapping row tiles (only the 2 halo rows are duplicated, only if n_h > 1).
    if n_h == 1:
        x_tiles = xp[:, None]
    else:
        x_tiles = jnp.stack(
            [xp[:, i * conv_h:i * conv_h + rows_in] for i in range(n_h)], axis=1)
    # x_tiles: (N, n_h, rows_in, w_pad, cin_p)

    # Weights -> (k*k, cin_p, cpad), feature order (kh, kw, c) matching the kernel taps.
    w_t = jnp.transpose(weight, (2, 3, 1, 0))                       # (k, k, cin, oc)
    w_t = jnp.pad(w_t, ((0, 0), (0, 0), (0, cin_p - cin), (0, cpad - oc)))
    w_t = w_t.reshape(ksize * ksize, cin_p, cpad).astype(jnp.bfloat16)
    b_t = jnp.pad(bias.astype(jnp.float32), (0, cpad - oc)).reshape(1, cpad)

    m_tile = th * wh
    kernel = functools.partial(convblock_kernel, ksize=ksize,
                               conv_h=conv_h, conv_w=w, cin=cin_p)

    flops = 2 * n * h * w * (ksize * ksize * cin_p) * cpad
    bytes_accessed = int(x_tiles.size * 2 + w_t.size * 2 + b_t.size * 4
                         + n * n_h * m_tile * cpad * 4)

    out_flat = pl.pallas_call(
        kernel,
        out_shape=jax.ShapeDtypeStruct((n * n_h * m_tile, cpad), jnp.float32),
        grid_spec=pltpu.PrefetchScalarGridSpec(
            num_scalar_prefetch=0,
            grid=(n, n_h),
            in_specs=[
                pl.BlockSpec((None, None, rows_in, w_pad, cin_p),
                             lambda i, j: (i, j, 0, 0, 0)),
                pl.BlockSpec((ksize * ksize, cin_p, cpad), lambda i, j: (0, 0, 0)),
                pl.BlockSpec((1, cpad), lambda i, j: (0, 0)),
            ],
            out_specs=pl.BlockSpec((m_tile, cpad), lambda i, j: (i * n_h + j, 0)),
            scratch_shapes=[pltpu.VMEM((conv_h * w, cpad), jnp.float32)],
        ),
        compiler_params=pltpu.CompilerParams(
            dimension_semantics=("parallel", "parallel"),
            vmem_limit_bytes=32 * 1024 * 1024),
        cost_estimate=pl.CostEstimate(flops=flops, transcendentals=0,
                                      bytes_accessed=bytes_accessed),
    )(x_tiles, w_t, b_t)

    out = out_flat[:, :oc].reshape(n, n_h * th, wh, oc)    # (N, Hh, Wh, Cout)
    return jnp.transpose(out, (0, 3, 1, 2))                # NCHW


def _reference(x, weight, bias):
    y = jax.lax.conv_general_dilated(
        x, weight, window_strides=(1, 1), padding=((1, 1), (1, 1)),
        dimension_numbers=("NCHW", "OIHW", "NCHW"))
    y = y + bias.reshape(1, -1, 1, 1)
    y = jnp.maximum(y, 0.0)
    y = jax.lax.reduce_window(y, -jnp.inf, jax.lax.max,
                              (1, 1, 2, 2), (1, 1, 2, 2), "VALID")
    return y


if __name__ == "__main__":
    key = jax.random.PRNGKey(0)
    k_x, k_w, k_b = jax.random.split(key, 3)

    N, C_IN, C_OUT, H, W = 2, 4, 8, 16, 16
    x = jax.random.normal(k_x, (N, C_IN, H, W), dtype=jnp.float32)
    weight = 0.1 * jax.random.normal(k_w, (C_OUT, C_IN, 3, 3), dtype=jnp.float32)
    bias = 0.1 * jax.random.normal(k_b, (C_OUT,), dtype=jnp.float32)

    out = jax.block_until_ready(conv_block(x, weight, bias))
    assert out.shape == (N, C_OUT, H // 2, W // 2), out.shape

    # Tight logic check: reference on bf16-quantized inputs (kernel multiplies in
    # bf16 but accumulates in f32, so the only input-side loss is the bf16 cast).
    xq = x.astype(jnp.bfloat16).astype(jnp.float32)
    wq = weight.astype(jnp.bfloat16).astype(jnp.float32)
    ref_q = _reference(xq, wq, bias)
    assert jnp.allclose(out, ref_q, rtol=1e-4, atol=1e-4), float(
        jnp.max(jnp.abs(out - ref_q)))

    # Loose end-to-end check against the full-f32 reference (bf16 input rounding).
    ref = _reference(x, weight, bias)
    assert jnp.allclose(out, ref, rtol=3e-2, atol=3e-2), float(
        jnp.max(jnp.abs(out - ref)))

    print("KERNEL_OK")
</pallas_src>

<mosaic_0001>
module attributes {stable_mosaic.version = 11 : i64} {
  func.func @convblock_kernel(%arg0: i32, %arg1: i32, %arg2: memref<1x1x18x18x8xbf16, #tpu.memory_space<vmem>>, %arg3: memref<9x8x128xbf16, #tpu.memory_space<vmem>>, %arg4: memref<1x128xf32, #tpu.memory_space<vmem>>, %arg5: memref<64x128xf32, #tpu.memory_space<vmem>>, %arg6: memref<256x128xf32, #tpu.memory_space<vmem>>) attributes {dimension_semantics = [#tpu.dimension_semantics<parallel>, #tpu.dimension_semantics<parallel>], iteration_bounds = array<i64: 2, 1>, scalar_prefetch = 0 : i64, scratch_operands = 1 : i64, tpu.core_type = #tpu.core_type<tc>, window_params = [{transform_indices = @transform_0, window_bounds = array<i64: 1, 1, 18, 18, 8>}, {pipeline_mode = #tpu.pipeline_mode<synchronous>, transform_indices = @transform_1, window_bounds = array<i64: 9, 8, 128>}, {pipeline_mode = #tpu.pipeline_mode<synchronous>, transform_indices = @transform_2, window_bounds = array<i64: 1, 128>}, {transform_indices = @transform_3, window_bounds = array<i64: 64, 128>}]} {
    %c0 = arith.constant 0 : index
    %c0_0 = arith.constant 0 : index
    %c0_1 = arith.constant 0 : index
    %c0_2 = arith.constant 0 : index
    %c0_3 = arith.constant 0 : index
    %0 = vector.load %arg2[%c0, %c0_0, %c0_1, %c0_2, %c0_3] : memref<1x1x18x18x8xbf16, #tpu.memory_space<vmem>>, vector<1x1x16x16x8xbf16>
    %1 = vector.shape_cast %0 : vector<1x1x16x16x8xbf16> to vector<16x16x8xbf16>
    %2 = vector.shape_cast %1 : vector<16x16x8xbf16> to vector<256x8xbf16>
    %c0_4 = arith.constant 0 : index
    %c0_5 = arith.constant 0 : index
    %c0_6 = arith.constant 0 : index
    %3 = vector.load %arg3[%c0_4, %c0_5, %c0_6] : memref<9x8x128xbf16, #tpu.memory_space<vmem>>, vector<1x8x128xbf16>
    %4 = vector.shape_cast %3 : vector<1x8x128xbf16> to vector<8x128xbf16>
    %cst = arith.constant dense<0.000000e+00> : vector<256x128xf32>
    %5 = tpu.matmul %2, %4, %cst {dimension_numbers = #tpu.dot_dimension_numbers<[1], [0], [0], [1], [0, 0, 1, 1], [], []>} : vector<256x8xbf16>, vector<8x128xbf16>, vector<256x128xf32> -> vector<256x128xf32>
    %c0_7 = arith.constant 0 : index
    %c0_8 = arith.constant 0 : index
    %6 = vector.load %arg6[%c0_7, %c0_8] : memref<256x128xf32, #tpu.memory_space<vmem>>, vector<256x128xf32>
    tpu.vector_store %arg6[%c0_7, %c0_8], %5 {strides = array<i32>} : memref<256x128xf32, #tpu.memory_space<vmem>>, vector<256x128xf32>,
    %c0_9 = arith.constant 0 : index
    %c0_10 = arith.constant 0 : index
    %c0_11 = arith.constant 0 : index
    %c1 = arith.constant 1 : index
    %c0_12 = arith.constant 0 : index
    %7 = vector.load %arg2[%c0_9, %c0_10, %c0_11, %c1, %c0_12] : memref<1x1x18x18x8xbf16, #tpu.memory_space<vmem>>, vector<1x1x16x16x8xbf16>
    %8 = vector.shape_cast %7 : vector<1x1x16x16x8xbf16> to vector<16x16x8xbf16>
    %9 = vector.shape_cast %8 : vector<16x16x8xbf16> to vector<256x8xbf16>
    %c1_13 = arith.constant 1 : index
    %c0_14 = arith.constant 0 : index
    %c0_15 = arith.constant 0 : index
    %10 = vector.load %arg3[%c1_13, %c0_14, %c0_15] : memref<9x8x128xbf16, #tpu.memory_space<vmem>>, vector<1x8x128xbf16>
    %11 = vector.shape_cast %10 : vector<1x8x128xbf16> to vector<8x128xbf16>
    %cst_16 = arith.constant dense<0.000000e+00> : vector<256x128xf32>
    %12 = tpu.matmul %9, %11, %cst_16 {dimension_numbers = #tpu.dot_dimension_numbers<[1], [0], [0], [1], [0, 0, 1, 1], [], []>} : vector<256x8xbf16>, vector<8x128xbf16>, vector<256x128xf32> -> vector<256x128xf32>
    %c0_17 = arith.constant 0 : index
    %c0_18 = arith.constant 0 : index
    %13 = vector.load %arg6[%c0_17, %c0_18] : memref<256x128xf32, #tpu.memory_space<vmem>>, vector<256x128xf32>
    %14 = arith.addf %13, %12 : vector<256x128xf32>
    %c0_19 = arith.constant 0 : index
    %c0_20 = arith.constant 0 : index
    %15 = vector.load %arg6[%c0_19, %c0_20] : memref<256x128xf32, #tpu.memory_space<vmem>>, vector<256x128xf32>
    tpu.vector_store %arg6[%c0_19, %c0_20], %14 {strides = array<i32>} : memref<256x128xf32, #tpu.memory_space<vmem>>, vector<256x128xf32>,
    %c0_21 = arith.constant 0 : index
    %c0_22 = arith.constant 0 : index
    %c0_23 = arith.constant 0 : index
    %c2 = arith.constant 2 : index
    %c0_24 = arith.constant 0 : index
    %16 = vector.load %arg2[%c0_21, %c0_22, %c0_23, %c2, %c0_24] : memref<1x1x18x18x8xbf16, #tpu.memory_space<vmem>>, vector<1x1x16x16x8xbf16>
    %17 = vector.shape_cast %16 : vector<1x1x16x16x8xbf16> to vector<16x16x8xbf16>
    %18 = vector.shape_cast %17 : vector<16x16x8xbf16> to vector<256x8xbf16>
    %c2_25 = arith.constant 2 : index
    %c0_26 = arith.constant 0 : index
    %c0_27 = arith.constant 0 : index
    %19 = vector.load %arg3[%c2_25, %c0_26, %c0_27] : memref<9x8x128xbf16, #tpu.memory_space<vmem>>, vector<1x8x128xbf16>
    %20 = vector.shape_cast %19 : vector<1x8x128xbf16> to vector<8x128xbf16>
    %cst_28 = arith.constant dense<0.000000e+00> : vector<256x128xf32>
    %21 = tpu.matmul %18, %20, %cst_28 {dimension_numbers = #tpu.dot_dimension_numbers<[1], [0], [0], [1], [0, 0, 1, 1], [], []>} : vector<256x8xbf16>, vector<8x128xbf16>, vector<256x128xf32> -> vector<256x128xf32>
    %c0_29 = arith.constant 0 : index
    %c0_30 = arith.constant 0 : index
    %22 = vector.load %arg6[%c0_29, %c0_30] : memref<256x128xf32, #tpu.memory_space<vmem>>, vector<256x128xf32>
    %23 = arith.addf %22, %21 : vector<256x128xf32>
    %c0_31 = arith.constant 0 : index
    %c0_32 = arith.constant 0 : index
    %24 = vector.load %arg6[%c0_31, %c0_32] : memref<256x128xf32, #tpu.memory_space<vmem>>, vector<256x128xf32>
    tpu.vector_store %arg6[%c0_31, %c0_32], %23 {strides = array<i32>} : memref<256x128xf32, #tpu.memory_space<vmem>>, vector<256x128xf32>,
    %c0_33 = arith.constant 0 : index
    %c0_34 = arith.constant 0 : index
    %c1_35 = arith.constant 1 : index
    %c0_36 = arith.constant 0 : index
    %c0_37 = arith.constant 0 : index
    %25 = vector.load %arg2[%c0_33, %c0_34, %c1_35, %c0_36, %c0_37] : memref<1x1x18x18x8xbf16, #tpu.memory_space<vmem>>, vector<1x1x16x16x8xbf16>
    %26 = vector.shape_cast %25 : vector<1x1x16x16x8xbf16> to vector<16x16x8xbf16>
    %27 = vector.shape_cast %26 : vector<16x16x8xbf16> to vector<256x8xbf16>
    %c3 = arith.constant 3 : index
    %c0_38 = arith.constant 0 : index
    %c0_39 = arith.constant 0 : index
    %28 = vector.load %arg3[%c3, %c0_38, %c0_39] : memref<9x8x128xbf16, #tpu.memory_space<vmem>>, vector<1x8x128xbf16>
    %29 = vector.shape_cast %28 : vector<1x8x128xbf16> to vector<8x128xbf16>
    %cst_40 = arith.constant dense<0.000000e+00> : vector<256x128xf32>
    %30 = tpu.matmul %27, %29, %cst_40 {dimension_numbers = #tpu.dot_dimension_numbers<[1], [0], [0], [1], [0, 0, 1, 1], [], []>} : vector<256x8xbf16>, vector<8x128xbf16>, vector<256x128xf32> -> vector<256x128xf32>
    %c0_41 = arith.constant 0 : index
    %c0_42 = arith.constant 0 : index
    %31 = vector.load %arg6[%c0_41, %c0_42] : memref<256x128xf32, #tpu.memory_space<vmem>>, vector<256x128xf32>
    %32 = arith.addf %31, %30 : vector<256x128xf32>
    %c0_43 = arith.constant 0 : index
    %c0_44 = arith.constant 0 : index
    %33 = vector.load %arg6[%c0_43, %c0_44] : memref<256x128xf32, #tpu.memory_space<vmem>>, vector<256x128xf32>
    tpu.vector_store %arg6[%c0_43, %c0_44], %32 {strides = array<i32>} : memref<256x128xf32, #tpu.memory_space<vmem>>, vector<256x128xf32>,
    %c0_45 = arith.constant 0 : index
    %c0_46 = arith.constant 0 : index
    %c1_47 = arith.constant 1 : index
    %c1_48 = arith.constant 1 : index
    %c0_49 = arith.constant 0 : index
    %34 = vector.load %arg2[%c0_45, %c0_46, %c1_47, %c1_48, %c0_49] : memref<1x1x18x18x8xbf16, #tpu.memory_space<vmem>>, vector<1x1x16x16x8xbf16>
    %35 = vector.shape_cast %34 : vector<1x1x16x16x8xbf16> to vector<16x16x8xbf16>
    %36 = vector.shape_cast %35 : vector<16x16x8xbf16> to vector<256x8xbf16>
    %c4 = arith.constant 4 : index
    %c0_50 = arith.constant 0 : index
    %c0_51 = arith.constant 0 : index
    %37 = vector.load %arg3[%c4, %c0_50, %c0_51] : memref<9x8x128xbf16, #tpu.memory_space<vmem>>, vector<1x8x128xbf16>
    %38 = vector.shape_cast %37 : vector<1x8x128xbf16> to vector<8x128xbf16>
    %cst_52 = arith.constant dense<0.000000e+00> : vector<256x128xf32>
    %39 = tpu.matmul %36, %38, %cst_52 {dimension_numbers = #tpu.dot_dimension_numbers<[1], [0], [0], [1], [0, 0, 1, 1], [], []>} : vector<256x8xbf16>, vector<8x128xbf16>, vector<256x128xf32> -> vector<256x128xf32>
    %c0_53 = arith.constant 0 : index
    %c0_54 = arith.constant 0 : index
    %40 = vector.load %arg6[%c0_53, %c0_54] : memref<256x128xf32, #tpu.memory_space<vmem>>, vector<256x128xf32>
    %41 = arith.addf %40, %39 : vector<256x128xf32>
    %c0_55 = arith.constant 0 : index
    %c0_56 = arith.constant 0 : index
    %42 = vector.load %arg6[%c0_55, %c0_56] : memref<256x128xf32, #tpu.memory_space<vmem>>, vector<256x128xf32>
    tpu.vector_store %arg6[%c0_55, %c0_56], %41 {strides = array<i32>} : memref<256x128xf32, #tpu.memory_space<vmem>>, vector<256x128xf32>,
    %c0_57 = arith.constant 0 : index
    %c0_58 = arith.constant 0 : index
    %c1_59 = arith.constant 1 : index
    %c2_60 = arith.constant 2 : index
    %c0_61 = arith.constant 0 : index
    %43 = vector.load %arg2[%c0_57, %c0_58, %c1_59, %c2_60, %c0_61] : memref<1x1x18x18x8xbf16, #tpu.memory_space<vmem>>, vector<1x1x16x16x8xbf16>
    %44 = vector.shape_cast %43 : vector<1x1x16x16x8xbf16> to vector<16x16x8xbf16>
    %45 = vector.shape_cast %44 : vector<16x16x8xbf16> to vector<256x8xbf16>
    %c5 = arith.constant 5 : index
    %c0_62 = arith.constant 0 : index
    %c0_63 = arith.constant 0 : index
    %46 = vector.load %arg3[%c5, %c0_62, %c0_63] : memref<9x8x128xbf16, #tpu.memory_space<vmem>>, vector<1x8x128xbf16>
    %47 = vector.shape_cast %46 : vector<1x8x128xbf16> to vector<8x128xbf16>
    %cst_64 = arith.constant dense<0.000000e+00> : vector<256x128xf32>
    %48 = tpu.matmul %45, %47, %cst_64 {dimension_numbers = #tpu.dot_dimension_numbers<[1], [0], [0], [1], [0, 0, 1, 1], [], []>} : vector<256x8xbf16>, vector<8x128xbf16>, vector<256x128xf32> -> vector<256x128xf32>
    %c0_65 = arith.constant 0 : index
    %c0_66 = arith.constant 0 : index
    %49 = vector.load %arg6[%c0_65, %c0_66] : memref<256x128xf32, #tpu.memory_space<vmem>>, vector<256x128xf32>
    %50 = arith.addf %49, %48 : vector<256x128xf32>
    %c0_67 = arith.constant 0 : index
    %c0_68 = arith.constant 0 : index
    %51 = vector.load %arg6[%c0_67, %c0_68] : memref<256x128xf32, #tpu.memory_space<vmem>>, vector<256x128xf32>
    tpu.vector_store %arg6[%c0_67, %c0_68], %50 {strides = array<i32>} : memref<256x128xf32, #tpu.memory_space<vmem>>, vector<256x128xf32>,
    %c0_69 = arith.constant 0 : index
    %c0_70 = arith.constant 0 : index
    %c2_71 = arith.constant 2 : index
    %c0_72 = arith.constant 0 : index
    %c0_73 = arith.constant 0 : index
    %52 = vector.load %arg2[%c0_69, %c0_70, %c2_71, %c0_72, %c0_73] : memref<1x1x18x18x8xbf16, #tpu.memory_space<vmem>>, vector<1x1x16x16x8xbf16>
    %53 = vector.shape_cast %52 : vector<1x1x16x16x8xbf16> to vector<16x16x8xbf16>
    %54 = vector.shape_cast %53 : vector<16x16x8xbf16> to vector<256x8xbf16>
    %c6 = arith.constant 6 : index
    %c0_74 = arith.constant 0 : index
    %c0_75 = arith.constant 0 : index
    %55 = vector.load %arg3[%c6, %c0_74, %c0_75] : memref<9x8x128xbf16, #tpu.memory_space<vmem>>, vector<1x8x128xbf16>
    %56 = vector.shape_cast %55 : vector<1x8x128xbf16> to vector<8x128xbf16>
    %cst_76 = arith.constant dense<0.000000e+00> : vector<256x128xf32>
    %57 = tpu.matmul %54, %56, %cst_76 {dimension_numbers = #tpu.dot_dimension_numbers<[1], [0], [0], [1], [0, 0, 1, 1], [], []>} : vector<256x8xbf16>, vector<8x128xbf16>, vector<256x128xf32> -> vector<256x128xf32>
    %c0_77 = arith.constant 0 : index
    %c0_78 = arith.constant 0 : index
    %58 = vector.load %arg6[%c0_77, %c0_78] : memref<256x128xf32, #tpu.memory_space<vmem>>, vector<256x128xf32>
    %59 = arith.addf %58, %57 : vector<256x128xf32>
    %c0_79 = arith.constant 0 : index
    %c0_80 = arith.constant 0 : index
    %60 = vector.load %arg6[%c0_79, %c0_80] : memref<256x128xf32, #tpu.memory_space<vmem>>, vector<256x128xf32>
    tpu.vector_store %arg6[%c0_79, %c0_80], %59 {strides = array<i32>} : memref<256x128xf32, #tpu.memory_space<vmem>>, vector<256x128xf32>,
    %c0_81 = arith.constant 0 : index
    %c0_82 = arith.constant 0 : index
    %c2_83 = arith.constant 2 : index
    %c1_84 = arith.constant 1 : index
    %c0_85 = arith.constant 0 : index
    %61 = vector.load %arg2[%c0_81, %c0_82, %c2_83, %c1_84, %c0_85] : memref<1x1x18x18x8xbf16, #tpu.memory_space<vmem>>, vector<1x1x16x16x8xbf16>
    %62 = vector.shape_cast %61 : vector<1x1x16x16x8xbf16> to vector<16x16x8xbf16>
    %63 = vector.shape_cast %62 : vector<16x16x8xbf16> to vector<256x8xbf16>
    %c7 = arith.constant 7 : index
    %c0_86 = arith.constant 0 : index
    %c0_87 = arith.constant 0 : index
    %64 = vector.load %arg3[%c7, %c0_86, %c0_87] : memref<9x8x128xbf16, #tpu.memory_space<vmem>>, vector<1x8x128xbf16>
    %65 = vector.shape_cast %64 : vector<1x8x128xbf16> to vector<8x128xbf16>
    %cst_88 = arith.constant dense<0.000000e+00> : vector<256x128xf32>
    %66 = tpu.matmul %63, %65, %cst_88 {dimension_numbers = #tpu.dot_dimension_numbers<[1], [0], [0], [1], [0, 0, 1, 1], [], []>} : vector<256x8xbf16>, vector<8x128xbf16>, vector<256x128xf32> -> vector<256x128xf32>
    %c0_89 = arith.constant 0 : index
    %c0_90 = arith.constant 0 : index
    %67 = vector.load %arg6[%c0_89, %c0_90] : memref<256x128xf32, #tpu.memory_space<vmem>>, vector<256x128xf32>
    %68 = arith.addf %67, %66 : vector<256x128xf32>
    %c0_91 = arith.constant 0 : index
    %c0_92 = arith.constant 0 : index
    %69 = vector.load %arg6[%c0_91, %c0_92] : memref<256x128xf32, #tpu.memory_space<vmem>>, vector<256x128xf32>
    tpu.vector_store %arg6[%c0_91, %c0_92], %68 {strides = array<i32>} : memref<256x128xf32, #tpu.memory_space<vmem>>, vector<256x128xf32>,
    %c0_93 = arith.constant 0 : index
    %c0_94 = arith.constant 0 : index
    %c2_95 = arith.constant 2 : index
    %c2_96 = arith.constant 2 : index
    %c0_97 = arith.constant 0 : index
    %70 = vector.load %arg2[%c0_93, %c0_94, %c2_95, %c2_96, %c0_97] : memref<1x1x18x18x8xbf16, #tpu.memory_space<vmem>>, vector<1x1x16x16x8xbf16>
    %71 = vector.shape_cast %70 : vector<1x1x16x16x8xbf16> to vector<16x16x8xbf16>
    %72 = vector.shape_cast %71 : vector<16x16x8xbf16> to vector<256x8xbf16>
    %c8 = arith.constant 8 : index
    %c0_98 = arith.constant 0 : index
    %c0_99 = arith.constant 0 : index
    %73 = vector.load %arg3[%c8, %c0_98, %c0_99] : memref<9x8x128xbf16, #tpu.memory_space<vmem>>, vector<1x8x128xbf16>
    %74 = vector.shape_cast %73 : vector<1x8x128xbf16> to vector<8x128xbf16>
    %cst_100 = arith.constant dense<0.000000e+00> : vector<256x128xf32>
    %75 = tpu.matmul %72, %74, %cst_100 {dimension_numbers = #tpu.dot_dimension_numbers<[1], [0], [0], [1], [0, 0, 1, 1], [], []>} : vector<256x8xbf16>, vector<8x128xbf16>, vector<256x128xf32> -> vector<256x128xf32>
    %c0_101 = arith.constant 0 : index
    %c0_102 = arith.constant 0 : index
    %76 = vector.load %arg6[%c0_101, %c0_102] : memref<256x128xf32, #tpu.memory_space<vmem>>, vector<256x128xf32>
    %77 = arith.addf %76, %75 : vector<256x128xf32>
    %c0_103 = arith.constant 0 : index
    %c0_104 = arith.constant 0 : index
    %78 = vector.load %arg6[%c0_103, %c0_104] : memref<256x128xf32, #tpu.memory_space<vmem>>, vector<256x128xf32>
    tpu.vector_store %arg6[%c0_103, %c0_104], %77 {strides = array<i32>} : memref<256x128xf32, #tpu.memory_space<vmem>>, vector<256x128xf32>,
    %c0_105 = arith.constant 0 : index
    %c0_106 = arith.constant 0 : index
    %79 = tpu.strided_load %arg6[%c0_105, %c0_106] {strides = array<i32: 2, 1>} : memref<256x128xf32, #tpu.memory_space<vmem>>, vector<128x128xf32>
    %c1_107 = arith.constant 1 : index
    %c0_108 = arith.constant 0 : index
    %80 = tpu.strided_load %arg6[%c1_107, %c0_108] {strides = array<i32: 2, 1>} : memref<256x128xf32, #tpu.memory_space<vmem>>, vector<128x128xf32>
    %81 = arith.maximumf %79, %80 : vector<128x128xf32>
    %82 = vector.shape_cast %81 : vector<128x128xf32> to vector<8x16x128xf32>
    %83 = vector.extract_strided_slice %82 {offsets = [0, 0, 0], sizes = [8, 8, 128], strides = [1, 1, 1]} : vector<8x16x128xf32> to vector<8x8x128xf32>
    %84 = vector.extract_strided_slice %82 {offsets = [0, 8, 0], sizes = [8, 8, 128], strides = [1, 1, 1]} : vector<8x16x128xf32> to vector<8x8x128xf32>
    %85 = arith.maximumf %83, %84 : vector<8x8x128xf32>
    %c0_109 = arith.constant 0 : index
    %c0_110 = arith.constant 0 : index
    %86 = vector.load %arg4[%c0_109, %c0_110] : memref<1x128xf32, #tpu.memory_space<vmem>>, vector<1x128xf32>
    %87 = vector.shape_cast %86 : vector<1x128xf32> to vector<1x1x128xf32>
    %88 = vector.broadcast %87 : vector<1x1x128xf32> to vector<8x8x128xf32>
    %89 = arith.addf %85, %88 : vector<8x8x128xf32>
    %cst_111 = arith.constant 0.000000e+00 : f32
    %90 = vector.broadcast %cst_111 : f32 to vector<8x8x128xf32>
    %91 = arith.maximumf %89, %90 : vector<8x8x128xf32>
    %92 = vector.shape_cast %91 : vector<8x8x128xf32> to vector<64x128xf32>
    %c0_112 = arith.constant 0 : index
    %c0_113 = arith.constant 0 : index
    %93 = vector.load %arg5[%c0_112, %c0_113] : memref<64x128xf32, #tpu.memory_space<vmem>>, vector<64x128xf32>
    tpu.vector_store %arg5[%c0_112, %c0_113], %92 {strides = array<i32>} : memref<64x128xf32, #tpu.memory_space<vmem>>, vector<64x128xf32>,
    return
  }
  func.func @transform_0(%arg0: i32, %arg1: i32) -> (i32, i32, i32, i32, i32) {
    %c0_i32 = arith.constant 0 : i32
    %c0_i32_0 = arith.constant 0 : i32
    %c0_i32_1 = arith.constant 0 : i32
    %c0_i32_2 = arith.constant 0 : i32
    return %arg0, %arg1, %c0_i32, %c0_i32_0, %c0_i32_1 : i32, i32, i32, i32, i32
  }
  func.func @transform_1(%arg0: i32, %arg1: i32) -> (i32, i32, i32) {
    %c0_i32 = arith.constant 0 : i32
    %c0_i32_0 = arith.constant 0 : i32
    %c0_i32_1 = arith.constant 0 : i32
    %c0_i32_2 = arith.constant 0 : i32
    return %c0_i32, %c0_i32_0, %c0_i32_1 : i32, i32, i32
  }
  func.func @transform_2(%arg0: i32, %arg1: i32) -> (i32, i32) {
    %c0_i32 = arith.constant 0 : i32
    %c0_i32_0 = arith.constant 0 : i32
    %c0_i32_1 = arith.constant 0 : i32
    return %c0_i32, %c0_i32_0 : i32, i32
  }
  func.func @transform_3(%arg0: i32, %arg1: i32) -> (i32, i32) {
    %c1_i32 = arith.constant 1 : i32
    %0 = arith.muli %arg0, %c1_i32 : i32
    %1 = arith.addi %0, %arg1 : i32
    %c0_i32 = arith.constant 0 : i32
    %c0_i32_0 = arith.constant 0 : i32
    return %1, %c0_i32 : i32, i32
  }
}

</mosaic_0001>

<bundles_post_ra>
// kernel: conv_block.1
= control target key start
LH: loop header
LB: loop body
LE: loop exit
PB: predicated region body
PF: predicated region fallthrough
CT: control target
= control target key end

     0   :  { %s6877_s12 = smov 0   ;;  %s6879_s13 = smov 0   ;;  %s8490_s0 = inlined_call_operand.vmem [shape: bf16[2,1,18,18,8], index: 0, kind: input, shape index: {}]   ;;  %s8491_s1 = inlined_call_operand.vmem [shape: bf16[9,8,128], index: 1, kind: input, shape index: {}]   ;;  %s8492_s2 = inlined_call_operand.vmem [shape: f32[1,128], index: 2, kind: input, shape index: {}]   ;;  %s8493_s3 = inlined_call_operand.vmem [shape: f32[128,128], index: 3, kind: output, shape index: {}]  }
   0x1   :  { %s6881_s14 = smov 0  }
   0x2 LB: > { %s25_s15 = sadd.s32 1, %s6851_s13  ;;  %p5682_p0 = scmp.ge.s32.totalorder %s6855_s14, 1  ;;  %s6855_s14 = sphi %s6881_s14, %s13_s14   ;;  %s6851_s13 = sphi %s6879_s13, %s8577_s13   ;;  %s6847_s12 = sphi %s6877_s12, %s8576_s12  }
   0x3   : > { %p27_p1 = scmp.ge.s32.totalorder %s25_s15, 2  ;;  %p157_p2 = scmp.lt.s32.totalorder %s6855_s14, 3 }
   0x5   : > { %s8579_s15 = smov (%p27_p1, %s25_s15), 0  ;;  %p158_p3 = pnand %p5682_p0, %p157_p2 }
   0x7   : > { %161 = sbr.rel (%p158_p3) target bundleno = 560 (0x230), region = 32 }
   0xc   : > { %v236_v0 = vld [vmem:[%s8491_s1] sm:$0xf]  ;;  %vm366_vm0 = vcmask 1043456   ;;  %p186_p4 = scmp.lt.s32.totalorder %s6847_s12, 1  ;;  %v5718_v2 = vld [vmem:[%s8491_s1 + $0x4] sm:$0xf] }
   0xd   : > { %6751 = vmatprep.subr.msk.bf16.mxu1 %vm366_vm0, %v236_v0  ;;  %v368_v1 = vsel %vm366_vm0, %v236_v0, 0  ;;  %6750 = vmatprep.subr.msk.bf16.mxu0 %vm366_vm0, %v236_v0  ;;  %v5767_v3 = vld [vmem:[%s8491_s1 + $0x8] sm:$0xf]  ;;  %vm317_vm1 = vcmask 64512   ;;  %v5832_v5 = vld [vmem:[%s8491_s1 + $0xc] sm:$0xf] }
   0xe   : > { %6749 = vmatpush3.bf16.msra.mxu1 %v368_v1  ;;  %s187_s22 = scalar_select %p186_p4, %s6847_s12, 1  ;;  %6443 = vmatpush3.bf16.msra.mxu0 %v368_v1  ;;  %v1097_v7 = vsel %vm366_vm0, %v5718_v2, 0  ;;  %v5913_v9 = vld [vmem:[%s8491_s1 + $0x10] sm:$0xf]  ;;  %v1666_v11 = vsel %vm366_vm0, %v5767_v3, 0  ;;  %vm1452_vm2 = vcmask 1042432  }
   0xf   : > { %6752 = vmatprep.subr.msk.bf16.mxu1 %vm366_vm0, %v5718_v2  ;;  %6753 = vmatprep.subr.msk.bf16.mxu0 %vm366_vm0, %v5767_v3  ;;  %vm611_vm3 = vsmask.f32 3328  ;;  %vm612_vm4 = vsmask.f32 7440  ;;  %v6949_v18 = vld [vmem:[%s8491_s1 + $0x14] sm:$0xf] }
  0x10   : > { %s6760_s23 = smul.u32 216, %s187_s22  ;;  %v6953_v19 = vsel %vm366_vm0, %v5832_v5, 0  ;;  %vm1453_vm5 = vcmask 1046532   ;;  %v6958_v21 = vsel %vm366_vm0, %v5913_v9, 0  ;;  %v6964_v24 = vsel %vm366_vm0, %v6949_v18, 0  ;;  %vm6989_vm7 = vmor %vm611_vm3, %vm612_vm4  ;;  %s5684_s16 = sshll.u32 %s6847_s12, 3 }
  0x11   : > { %vm6982_vm6 = vmor %vm1452_vm2, %vm1453_vm5  ;;  %p8389_p5 = scmp.lt.s32.totalorder %s5684_s16, 15 }
  0x12   : > { %s6916_s26 = scalar_lea.vmem %s8490_s0, %s6760_s23 }
  0x13   : > { %v6785_v4 = vld [vmem:[%s6916_s26 + $0x60] sm:$0xff]   ;;  %v6786_v6 = vld [vmem:[%s6916_s26 + $0x6c] sm:$0xff]   ;;  %v6789_v12 = vld [vmem:[%s6916_s26 + $0x78] sm:$0xff]   ;;  %s8581_s16 = smov (!%p8389_p5, %s5684_s16), 15 }
  0x14   : > { %6460 = vmatprep.mubr.msk.bf16.mxu1 %vm317_vm1, %v6785_v4  ;;  %v6787_v8 = vld [vmem:[%s6916_s26] sm:$0xff]   ;;  %v6788_v10 = vld [vmem:[%s6916_s26 + $0xc] sm:$0xff]   ;;  %v6791_v13 = vld [vmem:[%s6916_s26 + $0x18] sm:$0xff]   ;;  %s5685_s19 = sshll.u32 %s8581_s16, 3 }
  0x15   : > { %6461 = vmatmul.mubr.msk.bf16.vlgmr.msra.gmra.mxu1 %vm317_vm1, %v6786_v6  ;;  %6444 = vmatprep.mubr.msk.bf16.mxu0 %vm317_vm1, %v6787_v8  ;;  %v6790_v14 = vld [vmem:[%s6916_s26 + $0x84] sm:$0xff]   ;;  %v6793_v15 = vld [vmem:[%s6916_s26 + $0x90] sm:$0xff]   ;;  %v6794_v20 = vld [vmem:[%s6916_s26 + $0x9c] sm:$0xff]   ;;  %s8424_s22 = scalar_lea.vmem %s8493_s3, %s5685_s19 }
  0x16   : > { %6477 = vmatpush3.bf16.msra.mxu1 %v1097_v7  ;;  %6445 = vmatmul.mubr.msk.bf16.vlgmr.msra.gmra.mxu0 %vm317_vm1, %v6788_v10  ;;  %v6792_v16 = vld [vmem:[%s6916_s26 + $0x24] sm:$0xff]   ;;  %v6795_v17 = vld [vmem:[%s6916_s26 + $0x30] sm:$0xff]   ;;  %v6796_v22 = vld [vmem:[%s6916_s26 + $0x3c] sm:$0xff]  }
  0x17   : > { %6754 = vmatprep.subr.msk.bf16.mxu1 %vm366_vm0, %v5832_v5  ;;  %6464 = vmatprep.mubr.msk.bf16.mxu1 %vm317_vm1, %v6789_v12  ;;  %v6797_v23 = vld [vmem:[%s6916_s26 + $0xa8] sm:$0xff]   ;;  %v563_v26 = vld [vmem:[%s6916_s26] sm:$0xf]  ;;  %v564_v27 = vld [vmem:[%s6916_s26 + $0x4] sm:$0xf] }
  0x18   : > { %6511 = vmatpush3.bf16.msra.mxu0 %v1666_v11  ;;  %6448 = vmatprep.mubr.msk.bf16.mxu0 %vm317_vm1, %v6791_v13  ;;  %v6799_v25 = vld [vmem:[%s6916_s26 + $0x48] sm:$0xff]   ;;  %v615_v29 = vshrl.u32 %v563_v26, 16  ;;  %v618_v30 = vshll.u32 %v563_v26, 16  ;;  %v624_v31 = vshll.u32 %v564_v27, 16  ;;  %v628_v32 = vshrl.u32 %v564_v27, 16  ;;  %v6798_v48 = vld [vmem:[%s6916_s26 + $0xb4] sm:$0xff]  }
  0x19   : > { %6755 = vmatprep.subr.msk.bf16.mxu0 %vm366_vm0, %v5913_v9  ;;  %v565_v28 = vld [vmem:[%s6916_s26 + $0x8] sm:$0x1]  ;;  %v566_v33 = vld [vmem:[%s6916_s26 + $0xc] sm:$0xf]  ;;  %v567_v35 = vld [vmem:[%s6916_s26 + $0x10] sm:$0xf] }
  0x1a   : > { %v634_v34 = vshll.u32 %v565_v28, 16  ;;  %v568_v36 = vld [vmem:[%s6916_s26 + $0x14] sm:$0x1]  ;;  %v639_v37 = vshrl.u32 %v566_v33, 16  ;;  %v617_v38 = vrot.slane %v615_v29, 4  ;;  %v620_v39 = vrot.slane %v618_v30, 5 }
  0x1b   : > { %v626_v40 = vrot.slane %v624_v31, 5  ;;  %v630_v41 = vrot.slane %v628_v32, 4  ;;  %v1356_v42 = vld [vmem:[%s6916_s26] sm:$0xe]  ;;  %v642_v45 = vshll.u32 %v566_v33, 16  ;;  %v648_v46 = vshll.u32 %v567_v35, 16 }
  0x1c   : > { %v636_v43 = vrot.slane %v634_v34, 5  ;;  %v641_v44 = vrot.slane %v639_v37, 4  ;;  %v1357_v47 = vld [vmem:[%s6916_s26 + $0x4] sm:$0xf]  ;;  %v621_v49 = vor.u32 %v620_v39, %v617_v38  ;;  %v652_v51 = vshrl.u32 %v567_v35, 16  ;;  %v6800_v8 = vld [vmem:[%s6916_s26 + $0x54] sm:$0xff]  }
  0x1d   : > { %6465 = vmatmul.mubr.msk.bf16.gmra.mxu1 %vm317_vm1, %v6790_v14  ;;  %v631_v50 = vor.u32 %v630_v41, %v626_v40  ;;  %v658_v52 = vshll.u32 %v568_v36, 16  ;;  %v1358_v53 = vld [vmem:[%s6916_s26 + $0x8] sm:$0x1]  ;;  %v644_v56 = vrot.slane %v642_v45, 5  ;;  %v650_v57 = vrot.slane %v648_v46, 5 }
  0x1e   : > { %6468 = vmatprep.mubr.msk.bf16.mxu1 %vm317_vm1, %v6793_v15  ;;  %6449 = vmatmul.mubr.msk.bf16.gmra.mxu0 %vm317_vm1, %v6792_v16  ;;  %v5751_v58 = vrot.slane %v1356_v42, 9  ;;  %v1457_v59 = vrot.slane %v1357_v47, 5  ;;  %v1359_v60 = vld [vmem:[%s6916_s26 + $0xc] sm:$0xe]  ;;  %v622_v61 = vrot.slane %v621_v49, 4  ;;  %v654_v63 = vrot.slane %v652_v51, 4 }
  0x1f   : > { %6452 = vmatprep.mubr.msk.bf16.mxu0 %vm317_vm1, %v6795_v17  ;;  %v632_v62 = vrot.slane %v631_v50, 4  ;;  %v660_v0 = vrot.slane %v658_v52, 5  ;;  %v1360_v1 = vld [vmem:[%s6916_s26 + $0x10] sm:$0xf]  ;;  %v645_v2 = vor.u32 %v644_v56, %v641_v44  ;;  %v1460_v5 = vrot.slane %v1358_v53, 5 }
  0x20   : > { %v1458_v3 = vsel %vm6982_vm6, %v5751_v58, %v1457_v59  ;;  %v1459_v4 = vrot.slane %v1457_v59, 4  ;;  %v1361_v6 = vld [vmem:[%s6916_s26 + $0x14] sm:$0x1]  ;;  %v569_v7 = vld [vmem:[%s6916_s26 + $0x18] sm:$0xf]  ;;  %v627_v9 = vsel %vm6989_vm7, %v622_v61, %v626_v40  ;;  %v655_v11 = vor.u32 %v654_v63, %v650_v57 }
  0x21   : > { %v637_v10 = vsel %vm6989_vm7, %v632_v62, %v636_v43  ;;  %v5752_v12 = vrot.slane %v1359_v60, 9  ;;  %v646_v14 = vrot.slane %v645_v2, 4  ;;  %v1464_v16 = vrot.slane %v1360_v1, 5  ;;  %v570_v17 = vld [vmem:[%s6916_s26 + $0x1c] sm:$0xf] }
  0x22   : > { %v5719_v13 = vcombine.low %v627_v9, %v637_v10  ;;  %v1461_v15 = vsel %vm6982_vm6, %v1459_v4, %v1460_v5  ;;  %v663_v26 = vshrl.u32 %v569_v7, 16  ;;  %v666_v30 = vshll.u32 %v569_v7, 16  ;;  %v572_v31 = vld [vmem:[%s6916_s26 + $0x24] sm:$0xf]  ;;  %v573_v36 = vld [vmem:[%s6916_s26 + $0x28] sm:$0xf] }
  0x23   : > { %v651_v27 = vsel %vm6989_vm7, %v646_v14, %v650_v57  ;;  %v1465_v28 = vsel %vm6982_vm6, %v5752_v12, %v1464_v16  ;;  %v1466_v29 = vrot.slane %v1464_v16, 4  ;;  %v672_v34 = vshll.u32 %v570_v17, 16  ;;  %v574_v41 = vld [vmem:[%s6916_s26 + $0x2c] sm:$0x1]  ;;  %v1362_v42 = vld [vmem:[%s6916_s26 + $0x18] sm:$0xe] }
  0x24   : > { %v665_v33 = vrot.slane %v663_v26, 4  ;;  %v676_v35 = vshrl.u32 %v570_v17, 16  ;;  %v668_v39 = vrot.slane %v666_v30, 5  ;;  %v687_v46 = vshrl.u32 %v572_v31, 16  ;;  %v1363_v47 = vld [vmem:[%s6916_s26 + $0x1c] sm:$0xf] }
  0x25   : > { %6469 = vmatmul.mubr.msk.bf16.gmra.mxu1 %vm317_vm1, %v6794_v20  ;;  %v656_v20 = vrot.slane %v655_v11, 4  ;;  %v674_v44 = vrot.slane %v672_v34, 5  ;;  %v690_v50 = vshll.u32 %v572_v31, 16  ;;  %v696_v51 = vshll.u32 %v573_v36, 16  ;;  %v1364_v52 = vld [vmem:[%s6916_s26 + $0x20] sm:$0x1] }
  0x26   : > { %6472 = vmatprep.mubr.msk.bf16.mxu1 %vm317_vm1, %v6797_v23  ;;  %6453 = vmatmul.mubr.msk.bf16.gmra.mxu0 %vm317_vm1, %v6796_v22  ;;  %v5768_v22 = vcombine.low %v1458_v3, %v1461_v15  ;;  %v1467_v23 = vrot.slane %v1361_v6, 5  ;;  %v678_v45 = vrot.slane %v676_v35, 4  ;;  %v689_v56 = vrot.slane %v687_v46, 4  ;;  %v1365_v59 = vld [vmem:[%s6916_s26 + $0x24] sm:$0xe] }
  0x27   : > { %6456 = vmatprep.mubr.msk.bf16.mxu0 %vm317_vm1, %v6799_v25  ;;  %v571_v25 = vld [vmem:[%s6916_s26 + $0x20] sm:$0x1]  ;;  %v661_v32 = vsel %vm6989_vm7, %v656_v20, %v660_v0  ;;  %v700_v57 = vshrl.u32 %v573_v36, 16  ;;  %v706_v58 = vshll.u32 %v574_v41, 16  ;;  %v692_v61 = vrot.slane %v690_v50, 5 }
  0x28   : > { %v5720_v37 = vcombine.low %v651_v27, %v661_v32  ;;  %v1468_v38 = vsel %vm6982_vm6, %v1466_v29, %v1467_v23  ;;  %v682_v40 = vshll.u32 %v571_v25, 16  ;;  %v679_v53 = vor.u32 %v678_v45, %v674_v44  ;;  %v1366_v0 = vld [vmem:[%s6916_s26 + $0x28] sm:$0xf]  ;;  %v1367_v5 = vld [vmem:[%s6916_s26 + $0x2c] sm:$0x1] }
  0x29   : > { %v5769_v43 = vcombine.low %v1465_v28, %v1468_v38  ;;  %v698_v62 = vrot.slane %v696_v51, 5  ;;  %v5753_v63 = vrot.slane %v1362_v42, 9  ;;  %v702_v2 = vrot.slane %v700_v57, 4  ;;  %v575_v10 = vld [vmem:[%s6916_s26 + $0x30] sm:$0xf] }
  0x2a   : > { %v684_v49 = vrot.slane %v682_v40, 5  ;;  %v680_v1 = vrot.slane %v679_v53, 4  ;;  %v708_v3 = vrot.slane %v706_v58, 5  ;;  %v1471_v4 = vrot.slane %v1363_v47, 5  ;;  %v576_v20 = vld [vmem:[%s6916_s26 + $0x34] sm:$0xf] }
  0x2b   : > { %v693_v7 = vor.u32 %v692_v61, %v689_v56  ;;  %v5754_v9 = vrot.slane %v1365_v59, 9  ;;  %v703_v12 = vor.u32 %v702_v2, %v698_v62  ;;  %v1478_v16 = vrot.slane %v1366_v0, 5  ;;  %v577_v25 = vld [vmem:[%s6916_s26 + $0x38] sm:$0x1]  ;;  %v578_v30 = vld [vmem:[%s6916_s26 + $0x3c] sm:$0xf] }
  0x2c   : > { %v685_v11 = vsel %vm6989_vm7, %v680_v1, %v684_v49  ;;  %v1473_v14 = vrot.slane %v1471_v4, 4  ;;  %v1481_v17 = vrot.slane %v1367_v5, 5  ;;  %v711_v26 = vshrl.u32 %v575_v10, 16  ;;  %v579_v35 = vld [vmem:[%s6916_s26 + $0x40] sm:$0xf] }
  0x2d   : > { %6473 = vmatmul.mubr.msk.bf16.gmra.mxu1 %vm317_vm1, %v6798_v48  ;;  %v669_v48 = vor.u32 %v668_v39, %v665_v33  ;;  %v694_v15 = vrot.slane %v693_v7, 4  ;;  %v714_v27 = vshll.u32 %v575_v10, 16  ;;  %v1480_v29 = vrot.slane %v1478_v16, 4  ;;  %v580_v40 = vld [vmem:[%s6916_s26 + $0x44] sm:$0x1] }
  0x2e   : > { %6478 = vmatprep.mubr.msk.bf16.mxu1 %vm317_vm1, %v5719_v13  ;;  %6457 = vmatmul.mubr.msk.bf16.gmra.mxu0 %vm317_vm1, %v6800_v8  ;;  %v1474_v8 = vrot.slane %v1364_v52, 5  ;;  %v1472_v13 = vsel %vm6982_vm6, %v5753_v63, %v1471_v4  ;;  %v713_v32 = vrot.slane %v711_v26, 4  ;;  %v720_v34 = vshll.u32 %v576_v20, 16  ;;  %v1368_v41 = vld [vmem:[%s6916_s26 + $0x30] sm:$0xe] }
  0x2f   : > { %6512 = vmatprep.mubr.msk.bf16.mxu0 %vm317_vm1, %v5768_v22  ;;  %v670_v60 = vrot.slane %v669_v48, 4  ;;  %v704_v22 = vrot.slane %v703_v12, 4  ;;  %v716_v33 = vrot.slane %v714_v27, 5  ;;  %v724_v38 = vshrl.u32 %v576_v20, 16  ;;  %v1369_v46 = vld [vmem:[%s6916_s26 + $0x34] sm:$0xf] }
  0x30   : > { %v1475_v23 = vsel %vm6982_vm6, %v1473_v14, %v1474_v8  ;;  %v730_v39 = vshll.u32 %v577_v25, 16  ;;  %v735_v45 = vshrl.u32 %v578_v30, 16  ;;  %v1370_v47 = vld [vmem:[%s6916_s26 + $0x38] sm:$0x1]  ;;  %v738_v50 = vshll.u32 %v578_v30, 16 }
  0x31   : > { %v675_v6 = vsel %vm6989_vm7, %v670_v60, %v674_v44  ;;  %v5770_v28 = vcombine.low %v1472_v13, %v1475_v23  ;;  %v709_v31 = vsel %vm6989_vm7, %v704_v22, %v708_v3  ;;  %v722_v44 = vrot.slane %v720_v34, 5  ;;  %v1371_v52 = vld [vmem:[%s6916_s26 + $0x3c] sm:$0xe]  ;;  %v1372_v59 = vld [vmem:[%s6916_s26 + $0x40] sm:$0xf] }
  0x32   : > { %v726_v48 = vrot.slane %v724_v38, 4  ;;  %v732_v49 = vrot.slane %v730_v39, 5  ;;  %v744_v51 = vshll.u32 %v579_v35, 16  ;;  %v737_v56 = vrot.slane %v735_v45, 4  ;;  %v1373_v0 = vld [vmem:[%s6916_s26 + $0x44] sm:$0x1] }
  0x33   : > { %v748_v57 = vshrl.u32 %v579_v35, 16  ;;  %v754_v58 = vshll.u32 %v580_v40, 16  ;;  %v740_v61 = vrot.slane %v738_v50, 5  ;;  %v5755_v63 = vrot.slane %v1368_v41, 9  ;;  %v581_v5 = vld [vmem:[%s6916_s26 + $0x48] sm:$0xf] }
  0x34   : > { %v727_v60 = vor.u32 %v726_v48, %v722_v44  ;;  %v1485_v4 = vrot.slane %v1369_v46, 5  ;;  %v1488_v8 = vrot.slane %v1370_v47, 5  ;;  %v1492_v13 = vrot.slane %v1372_v59, 5  ;;  %v583_v26 = vld [vmem:[%s6916_s26 + $0x50] sm:$0x1] }
  0x35   : > { %6479 = vmatmul.mubr.msk.bf16.vlgmr.msra.gmra.mxu1 %vm317_vm1, %v5720_v37  ;;  %v1482_v37 = vsel %vm6982_vm6, %v1480_v29, %v1481_v17  ;;  %v750_v2 = vrot.slane %v748_v57, 4  ;;  %v756_v3 = vrot.slane %v754_v58, 5  ;;  %v741_v7 = vor.u32 %v740_v61, %v737_v56  ;;  %v584_v27 = vld [vmem:[%s6916_s26 + $0x54] sm:$0xf]  ;;  %v585_v34 = vld [vmem:[%s6916_s26 + $0x58] sm:$0xf] }
  0x36   : > { %6545 = vmatpush3.bf16.msra.mxu1 %v6953_v19  ;;  %6513 = vmatmul.mubr.msk.bf16.vlgmr.msra.gmra.mxu0 %vm317_vm1, %v5769_v43  ;;  %v5721_v19 = vcombine.low %v675_v6, %v685_v11  ;;  %v717_v43 = vor.u32 %v716_v33, %v713_v32  ;;  %v728_v6 = vrot.slane %v727_v60, 4  ;;  %v1486_v11 = vsel %vm6982_vm6, %v5755_v63, %v1485_v4  ;;  %v586_v38 = vld [vmem:[%s6916_s26 + $0x5c] sm:$0x1]  ;;  %v1374_v40 = vld [vmem:[%s6916_s26 + $0x48] sm:$0xe] }
  0x37   : > { %6756 = vmatprep.subr.msk.bf16.mxu1 %vm366_vm0, %v6949_v18  ;;  %6579 = vmatpush3.bf16.msra.mxu0 %v6958_v21  ;;  %v699_v18 = vsel %vm6989_vm7, %v694_v15, %v698_v62  ;;  %v1479_v21 = vsel %vm6982_vm6, %v5754_v9, %v1478_v16  ;;  %v746_v62 = vrot.slane %v744_v51, 5  ;;  %v5756_v9 = vrot.slane %v1371_v52, 9  ;;  %v582_v16 = vld [vmem:[%s6916_s26 + $0x4c] sm:$0xf]  ;;  %v1376_v56 = vld [vmem:[%s6916_s26 + $0x50] sm:$0x1] }
  0x38   : > { %6482 = vmatprep.mubr.msk.bf16.mxu1 %vm317_vm1, %v5721_v19  ;;  %v5722_v36 = vcombine.low %v699_v18, %v709_v31  ;;  %6516 = vmatprep.mubr.msk.bf16.mxu0 %vm317_vm1, %v5770_v28  ;;  %v5771_v42 = vcombine.low %v1479_v21, %v1482_v37  ;;  %v718_v53 = vrot.slane %v717_v43, 4  ;;  %v1487_v12 = vrot.slane %v1485_v4, 4  ;;  %v1375_v45 = vld [vmem:[%s6916_s26 + $0x4c] sm:$0xf]  ;;  %v1377_v61 = vld [vmem:[%s6916_s26 + $0x54] sm:$0xe] }
  0x39   : > { %v751_v10 = vor.u32 %v750_v2, %v746_v62  ;;  %v733_v14 = vsel %vm6989_vm7, %v728_v6, %v732_v49  ;;  %v742_v19 = vrot.slane %v741_v7, 4  ;;  %v1495_v15 = vrot.slane %v1373_v0, 5  ;;  %v1378_v2 = vld [vmem:[%s6916_s26 + $0x58] sm:$0xf]  ;;  %v1379_v7 = vld [vmem:[%s6916_s26 + $0x5c] sm:$0x1] }
  0x3a   : > { %v723_v1 = vsel %vm6989_vm7, %v718_v53, %v722_v44  ;;  %v759_v17 = vshrl.u32 %v581_v5, 16  ;;  %v1489_v23 = vsel %vm6982_vm6, %v1487_v12, %v1488_v8  ;;  %v1493_v25 = vsel %vm6982_vm6, %v5756_v9, %v1492_v13  ;;  %v587_v8 = vld [vmem:[%s6916_s26 + $0x60] sm:$0xf] }
  0x3b   : > { %v5723_v20 = vcombine.low %v723_v1, %v733_v14  ;;  %v752_v22 = vrot.slane %v751_v10, 4  ;;  %v747_v18 = vsel %vm6989_vm7, %v742_v19, %v746_v62  ;;  %v5772_v28 = vcombine.low %v1486_v11, %v1489_v23  ;;  %v589_v23 = vld [vmem:[%s6916_s26 + $0x68] sm:$0x1] }
  0x3c   : > { %v1494_v21 = vrot.slane %v1492_v13, 4  ;;  %v761_v29 = vrot.slane %v759_v17, 4  ;;  %v762_v31 = vshll.u32 %v581_v5, 16  ;;  %v768_v32 = vshll.u32 %v582_v16, 16 }
  0x3d   : > { %6483 = vmatmul.mubr.msk.bf16.gmra.mxu1 %vm317_vm1, %v5722_v36  ;;  %v757_v30 = vsel %vm6989_vm7, %v752_v22, %v756_v3  ;;  %v772_v33 = vshrl.u32 %v582_v16, 16  ;;  %v778_v37 = vshll.u32 %v583_v26, 16  ;;  %v783_v39 = vshrl.u32 %v584_v27, 16  ;;  %v588_v16 = vld [vmem:[%s6916_s26 + $0x64] sm:$0xf] }
  0x3e   : > { %6517 = vmatmul.mubr.msk.bf16.gmra.mxu0 %vm317_vm1, %v5771_v42  ;;  %6486 = vmatprep.mubr.msk.bf16.mxu1 %vm317_vm1, %v5723_v20  ;;  %v5724_v35 = vcombine.low %v747_v18, %v757_v30  ;;  %v1496_v36 = vsel %vm6982_vm6, %v1494_v21, %v1495_v15  ;;  %v764_v42 = vrot.slane %v762_v31, 5  ;;  %v770_v43 = vrot.slane %v768_v32, 5  ;;  %v590_v21 = vld [vmem:[%s6916_s26 + $0x6c] sm:$0xf] }
  0x3f   : > { %6520 = vmatprep.mubr.msk.bf16.mxu0 %vm317_vm1, %v5772_v28  ;;  %v5773_v41 = vcombine.low %v1493_v25, %v1496_v36  ;;  %v774_v44 = vrot.slane %v772_v33, 4  ;;  %v780_v46 = vrot.slane %v778_v37, 5  ;;  %v785_v47 = vrot.slane %v783_v39, 4  ;;  %v591_v33 = vld [vmem:[%s6916_s26 + $0x70] sm:$0xf] }
  0x40   : > { %v786_v48 = vshll.u32 %v584_v27, 16  ;;  %v792_v49 = vshll.u32 %v585_v34, 16  ;;  %v765_v50 = vor.u32 %v764_v42, %v761_v29  ;;  %v796_v52 = vshrl.u32 %v585_v34, 16  ;;  %v1380_v39 = vld [vmem:[%s6916_s26 + $0x60] sm:$0xe] }
  0x41   : > { %v775_v51 = vor.u32 %v774_v44, %v770_v43  ;;  %v802_v53 = vshll.u32 %v586_v38, 16  ;;  %v5757_v59 = vrot.slane %v1374_v40, 9  ;;  %v1499_v60 = vrot.slane %v1375_v45, 5  ;;  %v592_v38 = vld [vmem:[%s6916_s26 + $0x74] sm:$0x1] }
  0x42   : > { %v788_v57 = vrot.slane %v786_v48, 5  ;;  %v794_v58 = vrot.slane %v792_v49, 5  ;;  %v766_v62 = vrot.slane %v765_v50, 4  ;;  %v798_v0 = vrot.slane %v796_v52, 4  ;;  %v1381_v44 = vld [vmem:[%s6916_s26 + $0x64] sm:$0xf] }
  0x43   : > { %v776_v63 = vrot.slane %v775_v51, 4  ;;  %v804_v1 = vrot.slane %v802_v53, 5  ;;  %v1500_v4 = vsel %vm6982_vm6, %v5757_v59, %v1499_v60  ;;  %v1501_v5 = vrot.slane %v1499_v60, 4  ;;  %v1382_v49 = vld [vmem:[%s6916_s26 + $0x68] sm:$0x1] }
  0x44   : > { %v789_v3 = vor.u32 %v788_v57, %v785_v47  ;;  %v1502_v6 = vrot.slane %v1376_v56, 5  ;;  %v771_v9 = vsel %vm6989_vm7, %v766_v62, %v770_v43  ;;  %v799_v11 = vor.u32 %v798_v0, %v794_v58  ;;  %v1383_v56 = vld [vmem:[%s6916_s26 + $0x6c] sm:$0xe] }
  0x45   : > { %6487 = vmatmul.mubr.msk.bf16.gmra.mxu1 %vm317_vm1, %v5724_v35  ;;  %v781_v10 = vsel %vm6989_vm7, %v776_v63, %v780_v46  ;;  %v5758_v12 = vrot.slane %v1377_v61, 9  ;;  %v1506_v15 = vrot.slane %v1378_v2, 5  ;;  %v1509_v22 = vrot.slane %v1379_v7, 5  ;;  %v1384_v61 = vld [vmem:[%s6916_s26 + $0x70] sm:$0xf] }
  0x46   : > { %6521 = vmatmul.mubr.msk.bf16.gmra.mxu0 %vm317_vm1, %v5773_v41  ;;  %v5725_v13 = vcombine.low %v771_v9, %v781_v10  ;;  %v790_v14 = vrot.slane %v789_v3, 4  ;;  %v1503_v19 = vsel %vm6982_vm6, %v1501_v5, %v1502_v6  ;;  %v800_v17 = vrot.slane %v799_v11, 4  ;;  %v1385_v2 = vld [vmem:[%s6916_s26 + $0x74] sm:$0x1]  ;;  %v593_v7 = vld [vmem:[%s6916_s26 + $0x78] sm:$0xf] }
  0x47   : > { %v5774_v20 = vcombine.low %v1500_v4, %v1503_v19  ;;  %v807_v25 = vshrl.u32 %v587_v8, 16  ;;  %v1507_v27 = vsel %vm6982_vm6, %v5758_v12, %v1506_v15  ;;  %v1508_v18 = vrot.slane %v1506_v15, 4  ;;  %v594_v15 = vld [vmem:[%s6916_s26 + $0x7c] sm:$0xf] }
  0x48   : > { %6490 = vmatprep.mubr.msk.bf16.mxu1 %vm317_vm1, %v5725_v13  ;;  %v795_v26 = vsel %vm6989_vm7, %v790_v14, %v794_v58  ;;  %v810_v28 = vshll.u32 %v587_v8, 16  ;;  %v805_v29 = vsel %vm6989_vm7, %v800_v17, %v804_v1  ;;  %v816_v31 = vshll.u32 %v588_v16, 16 }
  0x49   : > { %6524 = vmatprep.mubr.msk.bf16.mxu0 %vm317_vm1, %v5774_v20  ;;  %v809_v30 = vrot.slane %v807_v25, 4  ;;  %v820_v32 = vshrl.u32 %v588_v16, 16  ;;  %v5726_v34 = vcombine.low %v795_v26, %v805_v29  ;;  %v1510_v35 = vsel %vm6982_vm6, %v1508_v18, %v1509_v22  ;;  %v595_v20 = vld [vmem:[%s6916_s26 + $0x80] sm:$0x1] }
  0x4a   : > { %v812_v36 = vrot.slane %v810_v28, 5  ;;  %v826_v37 = vshll.u32 %v589_v23, 16  ;;  %v5775_v40 = vcombine.low %v1507_v27, %v1510_v35  ;;  %v818_v41 = vrot.slane %v816_v31, 5  ;;  %v596_v28 = vld [vmem:[%s6916_s26 + $0x84] sm:$0xf] }
  0x4b   : > { %v822_v42 = vrot.slane %v820_v32, 4  ;;  %v831_v43 = vshrl.u32 %v590_v21, 16  ;;  %v834_v47 = vshll.u32 %v590_v21, 16  ;;  %v840_v48 = vshll.u32 %v591_v33, 16  ;;  %v597_v21 = vld [vmem:[%s6916_s26 + $0x88] sm:$0xf] }
  0x4c   : > { %v813_v45 = vor.u32 %v812_v36, %v809_v30  ;;  %v828_v46 = vrot.slane %v826_v37, 5  ;;  %v844_v52 = vshrl.u32 %v591_v33, 16  ;;  %v850_v53 = vshll.u32 %v592_v38, 16  ;;  %v598_v33 = vld [vmem:[%s6916_s26 + $0x8c] sm:$0x1] }
  0x4d   : > { %6491 = vmatmul.mubr.msk.bf16.gmra.mxu1 %vm317_vm1, %v5726_v34  ;;  %v823_v50 = vor.u32 %v822_v42, %v818_v41  ;;  %v833_v51 = vrot.slane %v831_v43, 4  ;;  %v836_v58 = vrot.slane %v834_v47, 5  ;;  %v842_v59 = vrot.slane %v840_v48, 5  ;;  %v1386_v38 = vld [vmem:[%s6916_s26 + $0x78] sm:$0xe] }
  0x4e   : > { %6525 = vmatmul.mubr.msk.bf16.gmra.mxu0 %vm317_vm1, %v5775_v40  ;;  %v814_v57 = vrot.slane %v813_v45, 4  ;;  %v5759_v60 = vrot.slane %v1380_v39, 9  ;;  %v846_v63 = vrot.slane %v844_v52, 4  ;;  %v852_v0 = vrot.slane %v850_v53, 5  ;;  %v1387_v39 = vld [vmem:[%s6916_s26 + $0x7c] sm:$0xf] }
  0x4f   : > { %v824_v62 = vrot.slane %v823_v50, 4  ;;  %v1513_v1 = vrot.slane %v1381_v44, 5  ;;  %v837_v4 = vor.u32 %v836_v58, %v833_v51  ;;  %v1516_v5 = vrot.slane %v1382_v49, 5  ;;  %v1388_v44 = vld [vmem:[%s6916_s26 + $0x80] sm:$0x1] }
  0x50   : > { %v819_v3 = vsel %vm6989_vm7, %v814_v57, %v818_v41  ;;  %v5760_v6 = vrot.slane %v1383_v56, 9  ;;  %v847_v9 = vor.u32 %v846_v63, %v842_v59  ;;  %v1520_v14 = vrot.slane %v1384_v61, 5  ;;  %v1389_v45 = vld [vmem:[%s6916_s26 + $0x84] sm:$0xe]  ;;  %v1390_v50 = vld [vmem:[%s6916_s26 + $0x88] sm:$0xf] }
  0x51   : > { %v829_v8 = vsel %vm6989_vm7, %v824_v62, %v828_v46  ;;  %v1514_v10 = vsel %vm6982_vm6, %v5759_v60, %v1513_v1  ;;  %v1515_v11 = vrot.slane %v1513_v1, 4  ;;  %v838_v13 = vrot.slane %v837_v4, 4  ;;  %v1391_v57 = vld [vmem:[%s6916_s26 + $0x8c] sm:$0x1]  ;;  %v599_v62 = vld [vmem:[%s6916_s26 + $0x90] sm:$0xf] }
  0x52   : > { %v5727_v12 = vcombine.low %v819_v3, %v829_v8  ;;  %v1523_v19 = vrot.slane %v1385_v2, 5  ;;  %v848_v16 = vrot.slane %v847_v9, 4  ;;  %v855_v22 = vshrl.u32 %v593_v7, 16 }
  0x53   : > { %v1517_v17 = vsel %vm6982_vm6, %v1515_v11, %v1516_v5  ;;  %v858_v23 = vshll.u32 %v593_v7, 16  ;;  %v843_v25 = vsel %vm6989_vm7, %v838_v13, %v842_v59  ;;  %v1521_v27 = vsel %vm6982_vm6, %v5760_v6, %v1520_v14 }
  0x54   : > { %6494 = vmatprep.mubr.msk.bf16.mxu1 %vm317_vm1, %v5727_v12  ;;  %v5776_v26 = vcombine.low %v1514_v10, %v1517_v17  ;;  %v1522_v18 = vrot.slane %v1520_v14, 4  ;;  %v853_v29 = vsel %vm6989_vm7, %v848_v16, %v852_v0  ;;  %v857_v30 = vrot.slane %v855_v22, 4  ;;  %v600_v14 = vld [vmem:[%s6916_s26 + $0x94] sm:$0xf]  ;;  %v601_v22 = vld [vmem:[%s6916_s26 + $0x98] sm:$0x1] }
  0x55   : > { %v860_v31 = vrot.slane %v858_v23, 5  ;;  %v864_v32 = vshll.u32 %v594_v15, 16  ;;  %v5728_v34 = vcombine.low %v843_v25, %v853_v29  ;;  %v868_v36 = vshrl.u32 %v594_v15, 16  ;;  %v602_v23 = vld [vmem:[%s6916_s26 + $0x9c] sm:$0xf] }
  0x56   : > { %6528 = vmatprep.mubr.msk.bf16.mxu0 %vm317_vm1, %v5776_v26  ;;  %v1524_v35 = vsel %vm6982_vm6, %v1522_v18, %v1523_v19  ;;  %v874_v37 = vshll.u32 %v595_v20, 16  ;;  %v879_v43 = vshrl.u32 %v596_v28, 16  ;;  %v882_v48 = vshll.u32 %v596_v28, 16  ;;  %v603_v28 = vld [vmem:[%s6916_s26 + $0xa0] sm:$0xf] }
  0x57   : > { %v5777_v40 = vcombine.low %v1521_v27, %v1524_v35  ;;  %v861_v41 = vor.u32 %v860_v31, %v857_v30  ;;  %v866_v42 = vrot.slane %v864_v32, 5  ;;  %6495 = vmatmul.mubr.msk.bf16.gmra.mxu1 %vm317_vm1, %v5728_v34  ;;  %v870_v46 = vrot.slane %v868_v36, 4  ;;  %v1393_v34 = vld [vmem:[%s6916_s26 + $0x94] sm:$0xf] }
  0x58   : > { %v876_v47 = vrot.slane %v874_v37, 5  ;;  %v888_v49 = vshll.u32 %v597_v21, 16  ;;  %v881_v52 = vrot.slane %v879_v43, 4  ;;  %v892_v53 = vshrl.u32 %v597_v21, 16  ;;  %v604_v21 = vld [vmem:[%s6916_s26 + $0xa4] sm:$0x1] }
  0x59   : > { %6529 = vmatmul.mubr.msk.bf16.gmra.mxu0 %vm317_vm1, %v5777_v40  ;;  %v862_v51 = vrot.slane %v861_v41, 4  ;;  %v898_v56 = vshll.u32 %v598_v33, 16  ;;  %v871_v58 = vor.u32 %v870_v46, %v866_v42  ;;  %v884_v59 = vrot.slane %v882_v48, 5  ;;  %v1392_v33 = vld [vmem:[%s6916_s26 + $0x90] sm:$0xe] }
  0x5a   : > { %v890_v60 = vrot.slane %v888_v49, 5  ;;  %v5761_v61 = vrot.slane %v1386_v38, 9  ;;  %v894_v0 = vrot.slane %v892_v53, 4  ;;  %v1527_v2 = vrot.slane %v1387_v39, 5  ;;  %v1394_v43 = vld [vmem:[%s6916_s26 + $0x98] sm:$0x1] }
  0x5b   : > { %v867_v63 = vsel %vm6989_vm7, %v862_v51, %v866_v42  ;;  %v900_v1 = vrot.slane %v898_v56, 5  ;;  %v872_v3 = vrot.slane %v871_v58, 4  ;;  %v885_v4 = vor.u32 %v884_v59, %v881_v52  ;;  %v1395_v52 = vld [vmem:[%s6916_s26 + $0x9c] sm:$0xe]  ;;  %v7196_v53 = vld [vmem:[%s8491_s1 + $0x18] sm:$0xf] }
  0x5c   : > { %v1530_v5 = vrot.slane %v1388_v44, 5  ;;  %v5762_v6 = vrot.slane %v1389_v45, 9  ;;  %v895_v7 = vor.u32 %v894_v0, %v890_v60  ;;  %v1528_v8 = vsel %vm6982_vm6, %v5761_v61, %v1527_v2  ;;  %6757 = vmatprep.subr.msk.bf16.mxu0 %vm366_vm0, %v7196_v53 }
  0x5d   : > { %v1529_v9 = vrot.slane %v1527_v2, 4  ;;  %v1534_v10 = vrot.slane %v1390_v50, 5  ;;  %v877_v11 = vsel %vm6989_vm7, %v872_v3, %v876_v47  ;;  %v886_v12 = vrot.slane %v885_v4, 4 }
  0x5e   : > { %v1537_v13 = vrot.slane %v1391_v57, 5  ;;  %v903_v19 = vshrl.u32 %v599_v62, 16  ;;  %v5729_v15 = vcombine.low %v867_v63, %v877_v11  ;;  %v896_v16 = vrot.slane %v895_v7, 4  ;;  %v606_v7 = vld [vmem:[%s6916_s26 + $0xac] sm:$0xf] }
  0x5f   : > { %v1531_v17 = vsel %vm6982_vm6, %v1529_v9, %v1530_v5  ;;  %v1535_v20 = vsel %vm6982_vm6, %v5762_v6, %v1534_v10  ;;  %v891_v25 = vsel %vm6989_vm7, %v886_v12, %v890_v60  ;;  %v1536_v27 = vrot.slane %v1534_v10, 4  ;;  %v1396_v60 = vld [vmem:[%s6916_s26 + $0xa0] sm:$0xf]  ;;  %v605_v6 = vld [vmem:[%s6916_s26 + $0xa8] sm:$0xf] }
  0x60   : > { %v5778_v26 = vcombine.low %v1528_v8, %v1531_v17  ;;  %v905_v18 = vrot.slane %v903_v19, 4  ;;  %6498 = vmatprep.mubr.msk.bf16.mxu1 %vm317_vm1, %v5729_v15  ;;  %v901_v29 = vsel %vm6989_vm7, %v896_v16, %v900_v1  ;;  %v906_v30 = vshll.u32 %v599_v62, 16  ;;  %v1397_v1 = vld [vmem:[%s6916_s26 + $0xa4] sm:$0x1]  ;;  %v607_v12 = vld [vmem:[%s6916_s26 + $0xb0] sm:$0x1] }
  0x61   : > { %v912_v31 = vshll.u32 %v600_v14, 16  ;;  %v916_v32 = vshrl.u32 %v600_v14, 16  ;;  %v5730_v35 = vcombine.low %v891_v25, %v901_v29  ;;  %v1538_v36 = vsel %vm6982_vm6, %v1536_v27, %v1537_v13 }
  0x62   : > { %6532 = vmatprep.mubr.msk.bf16.mxu0 %vm317_vm1, %v5778_v26  ;;  %v922_v37 = vshll.u32 %v601_v22, 16  ;;  %v927_v38 = vshrl.u32 %v602_v23, 16  ;;  %v5779_v39 = vcombine.low %v1535_v20, %v1538_v36  ;;  %v908_v40 = vrot.slane %v906_v30, 5 }
  0x63   : > { %v914_v41 = vrot.slane %v912_v31, 5  ;;  %v918_v42 = vrot.slane %v916_v32, 4  ;;  %6499 = vmatmul.mubr.msk.bf16.gmra.mxu1 %vm317_vm1, %v5730_v35  ;;  %v930_v46 = vshll.u32 %v602_v23, 16  ;;  %v936_v47 = vshll.u32 %v603_v28, 16  ;;  %v610_v32 = vld [vmem:[%s6916_s26 + $0xbc] sm:$0x1] }
  0x64   : > { %v924_v44 = vrot.slane %v922_v37, 5  ;;  %v929_v45 = vrot.slane %v927_v38, 4  ;;  %6533 = vmatmul.mubr.msk.bf16.gmra.mxu0 %vm317_vm1, %v5779_v39  ;;  %v909_v48 = vor.u32 %v908_v40, %v905_v18  ;;  %v940_v50 = vshrl.u32 %v603_v28, 16  ;;  %v608_v18 = vld [vmem:[%s6916_s26 + $0xb4] sm:$0xf] }
  0x65   : > { %v919_v49 = vor.u32 %v918_v42, %v914_v41  ;;  %v946_v51 = vshll.u32 %v604_v21, 16  ;;  %v932_v56 = vrot.slane %v930_v46, 5  ;;  %v938_v57 = vrot.slane %v936_v47, 5  ;;  %v609_v28 = vld [vmem:[%s6916_s26 + $0xb8] sm:$0xf] }
  0x66   : > { %v5763_v58 = vrot.slane %v1392_v33, 9  ;;  %v1541_v59 = vrot.slane %v1393_v34, 5  ;;  %v910_v61 = vrot.slane %v909_v48, 4  ;;  %v942_v63 = vrot.slane %v940_v50, 4  ;;  %v1398_v37 = vld [vmem:[%s6916_s26 + $0xa8] sm:$0xe] }
  0x67   : > { %v920_v62 = vrot.slane %v919_v49, 4  ;;  %v948_v0 = vrot.slane %v946_v51, 5  ;;  %v933_v2 = vor.u32 %v932_v56, %v929_v45  ;;  %v1544_v5 = vrot.slane %v1394_v43, 5  ;;  %v1399_v38 = vld [vmem:[%s6916_s26 + $0xac] sm:$0xf] }
  0x68   : > { %v1542_v3 = vsel %vm6982_vm6, %v5763_v58, %v1541_v59  ;;  %v1543_v4 = vrot.slane %v1541_v59, 4  ;;  %v915_v8 = vsel %vm6989_vm7, %v910_v61, %v914_v41  ;;  %v943_v10 = vor.u32 %v942_v63, %v938_v57  ;;  %v1400_v43 = vld [vmem:[%s6916_s26 + $0xb0] sm:$0x1]  ;;  %v1402_v56 = vld [vmem:[%s6916_s26 + $0xb8] sm:$0xf] }
  0x69   : > { %v925_v9 = vsel %vm6989_vm7, %v920_v62, %v924_v44  ;;  %v5764_v11 = vrot.slane %v1395_v52, 9  ;;  %v934_v14 = vrot.slane %v933_v2, 4  ;;  %v1548_v15 = vrot.slane %v1396_v60, 5  ;;  %v1401_v44 = vld [vmem:[%s6916_s26 + $0xb4] sm:$0xe] }
  0x6a   : > { %v5731_v13 = vcombine.low %v915_v8, %v925_v9  ;;  %v1545_v19 = vsel %vm6982_vm6, %v1543_v4, %v1544_v5  ;;  %v944_v16 = vrot.slane %v943_v10, 4  ;;  %v1551_v20 = vrot.slane %v1397_v1, 5 }
  0x6b   : > { %v5780_v17 = vcombine.low %v1542_v3, %v1545_v19  ;;  %v951_v22 = vshrl.u32 %v605_v6, 16  ;;  %v939_v23 = vsel %vm6989_vm7, %v934_v14, %v938_v57  ;;  %v1549_v25 = vsel %vm6982_vm6, %v5764_v11, %v1548_v15  ;;  %v1403_v57 = vld [vmem:[%s6916_s26 + $0xbc] sm:$0x1]  ;;  %v5866_v11 = vld [vmem:[%s6916_s26 + $0x10] sm:$0xf] }
  0x6c   : > { %6502 = vmatprep.mubr.msk.bf16.mxu1 %vm317_vm1, %v5731_v13  ;;  %v1550_v26 = vrot.slane %v1548_v15, 4  ;;  %v954_v27 = vshll.u32 %v605_v6, 16  ;;  %v949_v21 = vsel %vm6989_vm7, %v944_v16, %v948_v0  ;;  %v960_v30 = vshll.u32 %v606_v7, 16  ;;  %v5865_v6 = vld [vmem:[%s6916_s26 + $0xc] sm:$0xf] }
  0x6d   : > { %6536 = vmatprep.mubr.msk.bf16.mxu0 %vm317_vm1, %v5780_v17  ;;  %v953_v29 = vrot.slane %v951_v22, 4  ;;  %v964_v31 = vshrl.u32 %v606_v7, 16  ;;  %v5732_v33 = vcombine.low %v939_v23, %v949_v21  ;;  %v970_v36 = vshll.u32 %v607_v12, 16  ;;  %v5867_v12 = vld [vmem:[%s6916_s26 + $0x14] sm:$0x1] }
  0x6e   : > { %v1552_v34 = vsel %vm6982_vm6, %v1550_v26, %v1551_v20  ;;  %v956_v35 = vrot.slane %v954_v27, 5  ;;  %v962_v40 = vrot.slane %v960_v30, 5  ;;  %v975_v42 = vshrl.u32 %v608_v18, 16  ;;  %v5868_v16 = vld [vmem:[%s6916_s26 + $0x18] sm:$0xf] }
  0x6f   : > { %v5781_v39 = vcombine.low %v1549_v25, %v1552_v34  ;;  %v966_v41 = vrot.slane %v964_v31, 4  ;;  %6503 = vmatmul.mubr.msk.bf16.gmra.mxu1 %vm317_vm1, %v5732_v33  ;;  %v972_v46 = vrot.slane %v970_v36, 5  ;;  %v978_v47 = vshll.u32 %v608_v18, 16  ;;  %v5869_v25 = vld [vmem:[%s6916_s26 + $0x1c] sm:$0xf] }
  0x70   : > { %v957_v45 = vor.u32 %v956_v35, %v953_v29  ;;  %v984_v48 = vshll.u32 %v609_v28, 16  ;;  %v977_v50 = vrot.slane %v975_v42, 4  ;;  %v988_v51 = vshrl.u32 %v609_v28, 16  ;;  %v6801_v29 = vld [vmem:[%s6916_s26 + $0xc] sm:$0xff]  }
  0x71   : > { %6537 = vmatmul.mubr.msk.bf16.gmra.mxu0 %vm317_vm1, %v5781_v39  ;;  %v967_v49 = vor.u32 %v966_v41, %v962_v40  ;;  %v994_v52 = vshll.u32 %v610_v32, 16  ;;  %v980_v59 = vrot.slane %v978_v47, 5  ;;  %v5765_v61 = vrot.slane %v1398_v37, 9  ;;  %v5870_v37 = vld [vmem:[%s6916_s26 + $0x20] sm:$0x1] }
  0x72   : > { %v958_v58 = vrot.slane %v957_v45, 4  ;;  %v986_v60 = vrot.slane %v984_v48, 5  ;;  %v990_v63 = vrot.slane %v988_v51, 4  ;;  %v1555_v1 = vrot.slane %v1399_v38, 5  ;;  %v5872_v51 = vld [vmem:[%s6916_s26 + $0x28] sm:$0xf] }
  0x73   : > { %v968_v62 = vrot.slane %v967_v49, 4  ;;  %v996_v0 = vrot.slane %v994_v52, 5  ;;  %v981_v3 = vor.u32 %v980_v59, %v977_v50  ;;  %v1558_v4 = vrot.slane %v1400_v43, 5  ;;  %v5873_v59 = vld [vmem:[%s6916_s26 + $0x2c] sm:$0x1] }
  0x74   : > { %v963_v2 = vsel %vm6989_vm7, %v958_v58, %v962_v40  ;;  %v5766_v5 = vrot.slane %v1401_v44, 9  ;;  %v991_v8 = vor.u32 %v990_v63, %v986_v60  ;;  %v1556_v9 = vsel %vm6982_vm6, %v5765_v61, %v1555_v1 }
  0x75   : > { %v973_v7 = vsel %vm6989_vm7, %v968_v62, %v972_v46  ;;  %v1557_v10 = vrot.slane %v1555_v1, 4  ;;  %v982_v14 = vrot.slane %v981_v3, 4  ;;  %v1562_v19 = vrot.slane %v1402_v56, 5  ;;  %v5871_v46 = vld [vmem:[%s6916_s26 + $0x24] sm:$0xf]  ;;  %v6802_v1 = vld [vmem:[%s6916_s26 + $0x18] sm:$0xff]  }
  0x76   : > { %v5733_v13 = vcombine.low %v963_v2, %v973_v7  ;;  %v1565_v15 = vrot.slane %v1403_v57, 5  ;;  %v992_v17 = vrot.slane %v991_v8, 4  ;;  %v2397_v22 = vshrl.u32 %v5865_v6, 16 }
  0x77   : > { %v1559_v20 = vsel %vm6982_vm6, %v1557_v10, %v1558_v4  ;;  %v2400_v23 = vshll.u32 %v5865_v6, 16  ;;  %v987_v26 = vsel %vm6989_vm7, %v982_v14, %v986_v60  ;;  %v1563_v18 = vsel %vm6982_vm6, %v5766_v5, %v1562_v19  ;;  %v5875_v6 = vld [vmem:[%s6916_s26 + $0x34] sm:$0xf] }
  0x78   : > { %6506 = vmatprep.mubr.msk.bf16.mxu1 %vm317_vm1, %v5733_v13  ;;  %v5782_v27 = vcombine.low %v1556_v9, %v1559_v20  ;;  %v1564_v28 = vrot.slane %v1562_v19, 4  ;;  %v997_v21 = vsel %vm6989_vm7, %v992_v17, %v996_v0  ;;  %v2399_v30 = vrot.slane %v2397_v22, 4  ;;  %v5874_v0 = vld [vmem:[%s6916_s26 + $0x30] sm:$0xf] }
  0x79   : > { %v2402_v31 = vrot.slane %v2400_v23, 5  ;;  %v2406_v32 = vshll.u32 %v5866_v11, 16  ;;  %v5734_v33 = vcombine.low %v987_v26, %v997_v21  ;;  %v2410_v35 = vshrl.u32 %v5866_v11, 16  ;;  %v5876_v23 = vld [vmem:[%s6916_s26 + $0x38] sm:$0x1] }
  0x7a   : > { %6540 = vmatprep.mubr.msk.bf16.mxu0 %vm317_vm1, %v5782_v27  ;;  %v1566_v34 = vsel %vm6982_vm6, %v1564_v28, %v1565_v15  ;;  %v2416_v36 = vshll.u32 %v5867_v12, 16  ;;  %v2421_v41 = vshrl.u32 %v5868_v16, 16  ;;  %v2424_v44 = vshll.u32 %v5868_v16, 16  ;;  %v6803_v12 = vld [vmem:[%s6916_s26 + $0x24] sm:$0xff]  }
  0x7b   : > { %v5783_v38 = vcombine.low %v1563_v18, %v1566_v34  ;;  %v2403_v39 = vor.u32 %v2402_v31, %v2399_v30  ;;  %v2408_v40 = vrot.slane %v2406_v32, 5  ;;  %6507 = vmatmul.mubr.msk.bf16.gmra.mxu1 %vm317_vm1, %v5734_v33  ;;  %v2412_v42 = vrot.slane %v2410_v35, 4  ;;  %v5878_v30 = vld [vmem:[%s6916_s26 + $0x40] sm:$0xf]  ;;  %v6804_v32 = vld [vmem:[%s6916_s26 + $0x30] sm:$0xff]  }
  0x7c   : > { %v2418_v43 = vrot.slane %v2416_v36, 5  ;;  %v2430_v45 = vshll.u32 %v5869_v25, 16  ;;  %6546 = vmatprep.mubr.msk.bf16.mxu1 %vm317_vm1, %v6801_v29  ;;  %v2423_v48 = vrot.slane %v2421_v41, 4  ;;  %v2434_v49 = vshrl.u32 %v5869_v25, 16  ;;  %v5877_v29 = vld [vmem:[%s6916_s26 + $0x3c] sm:$0xf] }
  0x7d   : > { %6541 = vmatmul.mubr.msk.bf16.gmra.mxu0 %vm317_vm1, %v5783_v38  ;;  %v2404_v47 = vrot.slane %v2403_v39, 4  ;;  %v2440_v50 = vshll.u32 %v5870_v37, 16  ;;  %v2413_v52 = vor.u32 %v2412_v42, %v2408_v40  ;;  %v2426_v56 = vrot.slane %v2424_v44, 5  ;;  %v5879_v36 = vld [vmem:[%s6916_s26 + $0x44] sm:$0x1] }
  0x7e   : > { %v2432_v57 = vrot.slane %v2430_v45, 5  ;;  %v3868_v58 = vsel %vm366_vm0, %v7196_v53, 0  ;;  %v2436_v61 = vrot.slane %v2434_v49, 4  ;;  %v2445_v63 = vshrl.u32 %v5871_v46, 16  ;;  %v5880_v49 = vld [vmem:[%s6916_s26 + $0x48] sm:$0xf] }
  0x7f   : > { %v2409_v60 = vsel %vm6989_vm7, %v2404_v47, %v2408_v40  ;;  %v2442_v62 = vrot.slane %v2440_v50, 5  ;;  %v2414_v2 = vrot.slane %v2413_v52, 4  ;;  %v2427_v3 = vor.u32 %v2426_v56, %v2423_v48  ;;  %v6805_v40 = vld [vmem:[%s6916_s26 + $0x3c] sm:$0xff]  }
  0x80   : > { %v2448_v4 = vshll.u32 %v5871_v46, 16  ;;  %v2454_v5 = vshll.u32 %v5872_v51, 16  ;;  %v2437_v7 = vor.u32 %v2436_v61, %v2432_v57  ;;  %v2447_v8 = vrot.slane %v2445_v63, 4 }
  0x81   : > { %v2458_v9 = vshrl.u32 %v5872_v51, 16  ;;  %v2464_v53 = vshll.u32 %v5873_v59, 16  ;;  %v2419_v10 = vsel %vm6989_vm7, %v2414_v2, %v2418_v43  ;;  %v2428_v11 = vrot.slane %v2427_v3, 4  ;;  %v5883_v3 = vld [vmem:[%s6916_s26 + $0x54] sm:$0xf] }
  0x82   : > { %v2450_v13 = vrot.slane %v2448_v4, 5  ;;  %v2456_v14 = vrot.slane %v2454_v5, 5  ;;  %v5914_v19 = vcombine.low %v2409_v60, %v2419_v10  ;;  %v2438_v15 = vrot.slane %v2437_v7, 4 }
  0x83   : > { %v2460_v16 = vrot.slane %v2458_v9, 4  ;;  %v2466_v17 = vrot.slane %v2464_v53, 5  ;;  %6547 = vmatmul.mubr.msk.bf16.vlgmr.msra.gmra.mxu1 %vm317_vm1, %v6802_v1  ;;  %v2433_v20 = vsel %vm6989_vm7, %v2428_v11, %v2432_v57  ;;  %v2469_v25 = vshrl.u32 %v5874_v0, 16  ;;  %v5881_v57 = vld [vmem:[%s6916_s26 + $0x4c] sm:$0xf] }
  0x84   : > { %v2451_v22 = vor.u32 %v2450_v13, %v2447_v8  ;;  %v2472_v26 = vshll.u32 %v5874_v0, 16  ;;  %6613 = vmatpush3.bf16.msra.mxu1 %v6964_v24  ;;  %6580 = vmatprep.mubr.msk.bf16.mxu0 %vm317_vm1, %v5914_v19  ;;  %v2443_v27 = vsel %vm6989_vm7, %v2438_v15, %v2442_v62  ;;  %v2478_v28 = vshll.u32 %v5875_v6, 16  ;;  %v5882_v0 = vld [vmem:[%s6916_s26 + $0x50] sm:$0x1]  ;;  %v5884_v8 = vld [vmem:[%s6916_s26 + $0x58] sm:$0xf] }
  0x85   : > { %v2461_v18 = vor.u32 %v2460_v16, %v2456_v14  ;;  %v2482_v21 = vshrl.u32 %v5875_v6, 16  ;;  %v5915_v31 = vcombine.low %v2433_v20, %v2443_v27  ;;  %6550 = vmatprep.mubr.msk.bf16.mxu1 %vm317_vm1, %v6803_v12  ;;  %v2471_v34 = vrot.slane %v2469_v25, 4  ;;  %v5885_v12 = vld [vmem:[%s6916_s26 + $0x5c] sm:$0x1]  ;;  %v6806_v13 = vld [vmem:[%s6916_s26 + $0x48] sm:$0xff]  }
  0x86   : > { %v2452_v33 = vrot.slane %v2451_v22, 4  ;;  %v2474_v35 = vrot.slane %v2472_v26, 5  ;;  %v2480_v37 = vrot.slane %v2478_v28, 5  ;;  %v2488_v39 = vshll.u32 %v5876_v23, 16 }
  0x87   : > { %v2462_v24 = vrot.slane %v2461_v18, 4  ;;  %v2484_v38 = vrot.slane %v2482_v21, 4  ;;  %6581 = vmatmul.mubr.msk.bf16.vlgmr.msra.gmra.mxu0 %vm317_vm1, %v5915_v31  ;;  %v2493_v43 = vshrl.u32 %v5877_v29, 16  ;;  %v2496_v44 = vshll.u32 %v5877_v29, 16  ;;  %v6807_v18 = vld [vmem:[%s6916_s26 + $0x54] sm:$0xff]  }
  0x88   : > { %v2457_v41 = vsel %vm6989_vm7, %v2452_v33, %v2456_v14  ;;  %v2475_v42 = vor.u32 %v2474_v35, %v2471_v34  ;;  %6647 = vmatpush3.bf16.msra.mxu0 %v3868_v58  ;;  %v2490_v47 = vrot.slane %v2488_v39, 5  ;;  %v2502_v48 = vshll.u32 %v5878_v30, 16 }
  0x89   : > { %v2467_v45 = vsel %vm6989_vm7, %v2462_v24, %v2466_v17  ;;  %v2485_v46 = vor.u32 %v2484_v38, %v2480_v37  ;;  %v2495_v52 = vrot.slane %v2493_v43, 4  ;;  %v2498_v56 = vrot.slane %v2496_v44, 5  ;;  %v5887_v24 = vld [vmem:[%s6916_s26 + $0x64] sm:$0xf] }
  0x8a   : > { %v5916_v50 = vcombine.low %v2457_v41, %v2467_v45  ;;  %v2476_v51 = vrot.slane %v2475_v42, 4  ;;  %v2504_v60 = vrot.slane %v2502_v48, 5  ;;  %v2506_v61 = vshrl.u32 %v5878_v30, 16  ;;  %v5888_v41 = vld [vmem:[%s6916_s26 + $0x68] sm:$0x1] }
  0x8b   : > { %v2486_v59 = vrot.slane %v2485_v46, 4  ;;  %v2512_v62 = vshll.u32 %v5879_v36, 16  ;;  %6551 = vmatmul.mubr.msk.bf16.gmra.mxu1 %vm317_vm1, %v6804_v32  ;;  %v2499_v63 = vor.u32 %v2498_v56, %v2495_v52  ;;  %v2517_v1 = vshrl.u32 %v5880_v49, 16  ;;  %v5886_v32 = vld [vmem:[%s6916_s26 + $0x60] sm:$0xf] }
  0x8c   : > { %6584 = vmatprep.mubr.msk.bf16.mxu0 %vm317_vm1, %v5916_v50  ;;  %v2481_v58 = vsel %vm6989_vm7, %v2476_v51, %v2480_v37  ;;  %v2520_v2 = vshll.u32 %v5880_v49, 16  ;;  %6554 = vmatprep.mubr.msk.bf16.mxu1 %vm317_vm1, %v6805_v40  ;;  %v2508_v5 = vrot.slane %v2506_v61, 4  ;;  %v2526_v7 = vshll.u32 %v5881_v57, 16  ;;  %v5889_v50 = vld [vmem:[%s6916_s26 + $0x6c] sm:$0xf]  ;;  %v6808_v52 = vld [vmem:[%s6916_s26 + $0x60] sm:$0xff]  }
  0x8d   : > { %v2491_v4 = vsel %vm6989_vm7, %v2486_v59, %v2490_v47  ;;  %v2514_v6 = vrot.slane %v2512_v62, 5  ;;  %v2500_v53 = vrot.slane %v2499_v63, 4  ;;  %v2519_v10 = vrot.slane %v2517_v1, 4  ;;  %v7333_v1 = vld [vmem:[%s8491_s1 + $0x1c] sm:$0xf] }
  0x8e   : > { %v5917_v9 = vcombine.low %v2481_v58, %v2491_v4  ;;  %v2522_v11 = vrot.slane %v2520_v2, 5  ;;  %v2509_v14 = vor.u32 %v2508_v5, %v2504_v60  ;;  %v2528_v19 = vrot.slane %v2526_v7, 5  ;;  %v6809_v5 = vld [vmem:[%s6916_s26 + $0x6c] sm:$0xff]   ;;  %v5892_v7 = vld [vmem:[%s6916_s26 + $0x78] sm:$0xf]  ;;  %6758 = vmatprep.subr.msk.bf16.mxu1 %vm366_vm0, %v7333_v1 }
  0x8f   : > { %v2530_v15 = vshrl.u32 %v5881_v57, 16  ;;  %v2536_v16 = vshll.u32 %v5882_v0, 16  ;;  %v2505_v17 = vsel %vm6989_vm7, %v2500_v53, %v2504_v60  ;;  %v2541_v22 = vshrl.u32 %v5883_v3, 16  ;;  %v5890_v60 = vld [vmem:[%s6916_s26 + $0x70] sm:$0xf] }
  0x90   : > { %6585 = vmatmul.mubr.msk.bf16.gmra.mxu0 %vm317_vm1, %v5917_v9  ;;  %v2523_v20 = vor.u32 %v2522_v11, %v2519_v10  ;;  %v2544_v23 = vshll.u32 %v5883_v3, 16  ;;  %v2510_v25 = vrot.slane %v2509_v14, 4  ;;  %v2550_v28 = vshll.u32 %v5884_v8, 16  ;;  %v5891_v0 = vld [vmem:[%s6916_s26 + $0x74] sm:$0x1] }
  0x91   : > { %v2532_v26 = vrot.slane %v2530_v15, 4  ;;  %v2538_v27 = vrot.slane %v2536_v16, 5  ;;  %v2543_v29 = vrot.slane %v2541_v22, 4  ;;  %v2554_v31 = vshrl.u32 %v5884_v8, 16  ;;  %v5893_v11 = vld [vmem:[%s6916_s26 + $0x7c] sm:$0xf] }
  0x92   : > { %v2524_v21 = vrot.slane %v2523_v20, 4  ;;  %v2546_v30 = vrot.slane %v2544_v23, 5  ;;  %v2515_v33 = vsel %vm6989_vm7, %v2510_v25, %v2514_v6  ;;  %v2552_v35 = vrot.slane %v2550_v28, 5 }
  0x93   : > { %v2533_v34 = vor.u32 %v2532_v26, %v2528_v19  ;;  %v2560_v36 = vshll.u32 %v5885_v12, 16  ;;  %6555 = vmatmul.mubr.msk.bf16.gmra.mxu1 %vm317_vm1, %v6806_v13  ;;  %v5918_v37 = vcombine.low %v2505_v17, %v2515_v33  ;;  %v2556_v40 = vrot.slane %v2554_v31, 4 }
  0x94   : > { %v2529_v38 = vsel %vm6989_vm7, %v2524_v21, %v2528_v19  ;;  %v2547_v39 = vor.u32 %v2546_v30, %v2543_v29  ;;  %6558 = vmatprep.mubr.msk.bf16.mxu1 %vm317_vm1, %v6807_v18  ;;  %v2565_v44 = vshrl.u32 %v5886_v32, 16  ;;  %v2568_v45 = vshll.u32 %v5886_v32, 16  ;;  %v5894_v21 = vld [vmem:[%s6916_s26 + $0x80] sm:$0x1]  ;;  %v5895_v30 = vld [vmem:[%s6916_s26 + $0x84] sm:$0xf] }
  0x95   : > { %v2534_v42 = vrot.slane %v2533_v34, 4  ;;  %v2562_v43 = vrot.slane %v2560_v36, 5  ;;  %6588 = vmatprep.mubr.msk.bf16.mxu0 %vm317_vm1, %v5918_v37  ;;  %v2557_v47 = vor.u32 %v2556_v40, %v2552_v35  ;;  %v2574_v48 = vshll.u32 %v5887_v24, 16  ;;  %v5897_v40 = vld [vmem:[%s6916_s26 + $0x8c] sm:$0x1] }
  0x96   : > { %v2548_v46 = vrot.slane %v2547_v39, 4  ;;  %v2578_v49 = vshrl.u32 %v5887_v24, 16  ;;  %v2567_v56 = vrot.slane %v2565_v44, 4  ;;  %v2570_v57 = vrot.slane %v2568_v45, 5  ;;  %v6810_v24 = vld [vmem:[%s6916_s26 + $0x78] sm:$0xff]   ;;  %v6811_v44 = vld [vmem:[%s6916_s26 + $0x84] sm:$0xff]  }
  0x97   : > { %v2539_v51 = vsel %vm6989_vm7, %v2534_v42, %v2538_v27  ;;  %v2584_v59 = vshll.u32 %v5888_v41, 16  ;;  %v2558_v58 = vrot.slane %v2557_v47, 4  ;;  %v2576_v63 = vrot.slane %v2574_v48, 5 }
  0x98   : > { %v5919_v61 = vcombine.low %v2529_v38, %v2539_v51  ;;  %v2553_v62 = vsel %vm6989_vm7, %v2548_v46, %v2552_v35  ;;  %v2571_v2 = vor.u32 %v2570_v57, %v2567_v56  ;;  %v2580_v3 = vrot.slane %v2578_v49, 4  ;;  %v5896_v35 = vld [vmem:[%s6916_s26 + $0x88] sm:$0xf]  ;;  %v5898_v46 = vld [vmem:[%s6916_s26 + $0x90] sm:$0xf] }
  0x99   : > { %v2586_v4 = vrot.slane %v2584_v59, 5  ;;  %v2589_v6 = vshrl.u32 %v5889_v50, 16  ;;  %v2563_v8 = vsel %vm6989_vm7, %v2558_v58, %v2562_v43  ;;  %v2592_v9 = vshll.u32 %v5889_v50, 16  ;;  %v5899_v51 = vld [vmem:[%s6916_s26 + $0x94] sm:$0xf] }
  0x9a   : > { %6589 = vmatmul.mubr.msk.bf16.gmra.mxu0 %vm317_vm1, %v5919_v61  ;;  %v2598_v53 = vshll.u32 %v5890_v60, 16  ;;  %v2602_v10 = vshrl.u32 %v5890_v60, 16  ;;  %v5920_v12 = vcombine.low %v2553_v62, %v2563_v8  ;;  %v2572_v13 = vrot.slane %v2571_v2, 4 }
  0x9b   : > { %v2581_v14 = vor.u32 %v2580_v3, %v2576_v63  ;;  %v2591_v19 = vrot.slane %v2589_v6, 4  ;;  %6559 = vmatmul.mubr.msk.bf16.gmra.mxu1 %vm317_vm1, %v6808_v52  ;;  %v2594_v15 = vrot.slane %v2592_v9, 5  ;;  %v2608_v20 = vshll.u32 %v5891_v0, 16  ;;  %v7366_v52 = vld [vmem:[%s8491_s1 + $0x20] sm:$0xf] }
  0x9c   : > { %v2600_v16 = vrot.slane %v2598_v53, 5  ;;  %v2604_v17 = vrot.slane %v2602_v10, 4  ;;  %6592 = vmatprep.mubr.msk.bf16.mxu0 %vm317_vm1, %v5920_v12  ;;  %v2577_v22 = vsel %vm6989_vm7, %v2572_v13, %v2576_v63  ;;  %6562 = vmatprep.mubr.msk.bf16.mxu1 %vm317_vm1, %v6809_v5  ;;  %v2613_v25 = vshrl.u32 %v5892_v7, 16  ;;  %v5900_v0 = vld [vmem:[%s6916_s26 + $0x98] sm:$0x1] }
  0x9d   : > { %v2582_v23 = vrot.slane %v2581_v14, 4  ;;  %v2616_v26 = vshll.u32 %v5892_v7, 16  ;;  %v2595_v27 = vor.u32 %v2594_v15, %v2591_v19  ;;  %v2610_v28 = vrot.slane %v2608_v20, 5  ;;  %6759 = vmatprep.subr.msk.bf16.mxu0 %vm366_vm0, %v7366_v52  ;;  %v5901_v53 = vld [vmem:[%s6916_s26 + $0x9c] sm:$0xf] }
  0x9e   : > { %v2605_v18 = vor.u32 %v2604_v17, %v2600_v16  ;;  %v2622_v29 = vshll.u32 %v5893_v11, 16  ;;  %v2615_v32 = vrot.slane %v2613_v25, 4  ;;  %v2626_v34 = vshrl.u32 %v5893_v11, 16  ;;  %v6812_v11 = vld [vmem:[%s6916_s26 + $0x90] sm:$0xff]   ;;  %v6813_v19 = vld [vmem:[%s6916_s26 + $0x9c] sm:$0xff]  }
  0x9f   : > { %v2587_v31 = vsel %vm6989_vm7, %v2582_v23, %v2586_v4  ;;  %v2618_v33 = vrot.slane %v2616_v26, 5  ;;  %v2596_v37 = vrot.slane %v2595_v27, 4  ;;  %v2632_v43 = vshll.u32 %v5894_v21, 16  ;;  %v5903_v23 = vld [vmem:[%s6916_s26 + $0xa4] sm:$0x1] }
  0xa0   : > { %v5921_v36 = vcombine.low %v2577_v22, %v2587_v31  ;;  %v2606_v38 = vrot.slane %v2605_v18, 4  ;;  %v2624_v39 = vrot.slane %v2622_v29, 5  ;;  %v2628_v42 = vrot.slane %v2626_v34, 4  ;;  %v5902_v22 = vld [vmem:[%s6916_s26 + $0xa0] sm:$0xf] }
  0xa1   : > { %v2619_v41 = vor.u32 %v2618_v33, %v2615_v32  ;;  %v2637_v45 = vshrl.u32 %v5895_v30, 16  ;;  %v2601_v47 = vsel %vm6989_vm7, %v2596_v37, %v2600_v16  ;;  %v2640_v49 = vshll.u32 %v5895_v30, 16  ;;  %v5905_v32 = vld [vmem:[%s6916_s26 + $0xac] sm:$0xf] }
  0xa2   : > { %6593 = vmatmul.mubr.msk.bf16.gmra.mxu0 %vm317_vm1, %v5921_v36  ;;  %v2611_v48 = vsel %vm6989_vm7, %v2606_v38, %v2610_v28  ;;  %v2646_v50 = vshll.u32 %v5896_v35, 16  ;;  %v2629_v59 = vor.u32 %v2628_v42, %v2624_v39  ;;  %v2634_v60 = vrot.slane %v2632_v43, 5  ;;  %v5904_v28 = vld [vmem:[%s6916_s26 + $0xa8] sm:$0xf] }
  0xa3   : > { %v5922_v56 = vcombine.low %v2601_v47, %v2611_v48  ;;  %v2620_v57 = vrot.slane %v2619_v41, 4  ;;  %6563 = vmatmul.mubr.msk.bf16.gmra.mxu1 %vm317_vm1, %v6810_v24  ;;  %v2639_v61 = vrot.slane %v2637_v45, 4  ;;  %v2642_v62 = vrot.slane %v2640_v49, 5  ;;  %v5906_v47 = vld [vmem:[%s6916_s26 + $0xb0] sm:$0x1] }
  0xa4   : > { %v2648_v58 = vrot.slane %v2646_v50, 5  ;;  %v2650_v63 = vshrl.u32 %v5896_v35, 16  ;;  %v2630_v3 = vrot.slane %v2629_v59, 4  ;;  %6566 = vmatprep.mubr.msk.bf16.mxu1 %vm317_vm1, %v6811_v44  ;;  %v2656_v4 = vshll.u32 %v5897_v40, 16 }
  0xa5   : > { %6596 = vmatprep.mubr.msk.bf16.mxu0 %vm317_vm1, %v5922_v56  ;;  %v2625_v2 = vsel %vm6989_vm7, %v2620_v57, %v2624_v39  ;;  %v2661_v5 = vshrl.u32 %v5898_v46, 16  ;;  %v2643_v6 = vor.u32 %v2642_v62, %v2639_v61  ;;  %v2664_v8 = vshll.u32 %v5898_v46, 16  ;;  %v5907_v57 = vld [vmem:[%s6916_s26 + $0xb4] sm:$0xf] }
  0xa6   : > { %v2652_v7 = vrot.slane %v2650_v63, 4  ;;  %v2670_v9 = vshll.u32 %v5899_v51, 16  ;;  %v2635_v10 = vsel %vm6989_vm7, %v2630_v3, %v2634_v60  ;;  %v2658_v12 = vrot.slane %v2656_v4, 5  ;;  %v6814_v60 = vld [vmem:[%s6916_s26 + $0xa8] sm:$0xff]   ;;  %v6815_v63 = vld [vmem:[%s6916_s26 + $0xb4] sm:$0xff]  }
  0xa7   : > { %v2663_v13 = vrot.slane %v2661_v5, 4  ;;  %v2674_v14 = vshrl.u32 %v5899_v51, 16  ;;  %v5923_v15 = vcombine.low %v2625_v2, %v2635_v10  ;;  %v2644_v16 = vrot.slane %v2643_v6, 4  ;;  %v5909_v6 = vld [vmem:[%s6916_s26 + $0xbc] sm:$0x1] }
  0xa8   : > { %v2653_v17 = vor.u32 %v2652_v7, %v2648_v58  ;;  %v2666_v20 = vrot.slane %v2664_v8, 5  ;;  %v2672_v25 = vrot.slane %v2670_v9, 5  ;;  %v2680_v27 = vshll.u32 %v5900_v0, 16  ;;  %v5908_v0 = vld [vmem:[%s6916_s26 + $0xb8] sm:$0xf] }
  0xa9   : > { %v2676_v26 = vrot.slane %v2674_v14, 4  ;;  %v2685_v18 = vshrl.u32 %v5901_v53, 16  ;;  %v2649_v21 = vsel %vm6989_vm7, %v2644_v16, %v2648_v58  ;;  %v2688_v31 = vshll.u32 %v5901_v53, 16  ;;  %v5910_v7 = vld [vmem:[%s6916_s26 + $0xc0] sm:$0xf] }
  0xaa   : > { %6597 = vmatmul.mubr.msk.bf16.gmra.mxu0 %vm317_vm1, %v5923_v15  ;;  %v2654_v29 = vrot.slane %v2653_v17, 4  ;;  %v2667_v30 = vor.u32 %v2666_v20, %v2663_v13  ;;  %v2682_v34 = vrot.slane %v2680_v27, 5  ;;  %v2694_v36 = vshll.u32 %v5902_v22, 16  ;;  %v5912_v27 = vld [vmem:[%s6916_s26 + $0xc8] sm:$0x1] }
  0xab   : > { %v2677_v33 = vor.u32 %v2676_v26, %v2672_v25  ;;  %v2687_v35 = vrot.slane %v2685_v18, 4  ;;  %6567 = vmatmul.mubr.msk.bf16.gmra.mxu1 %vm317_vm1, %v6812_v11  ;;  %v2690_v38 = vrot.slane %v2688_v31, 5  ;;  %v2698_v39 = vshrl.u32 %v5902_v22, 16  ;;  %v5911_v11 = vld [vmem:[%s6916_s26 + $0xc4] sm:$0xf] }
  0xac   : > { %v2659_v24 = vsel %vm6989_vm7, %v2654_v29, %v2658_v12  ;;  %v2668_v37 = vrot.slane %v2667_v30, 4  ;;  %6570 = vmatprep.mubr.msk.bf16.mxu1 %vm317_vm1, %v6813_v19  ;;  %v2696_v42 = vrot.slane %v2694_v36, 5  ;;  %v2704_v43 = vshll.u32 %v5903_v23, 16  ;;  %v5946_v30 = vld [vmem:[%s6916_s26 + $0xc] sm:$0xe] }
  0xad   : > { %v5924_v40 = vcombine.low %v2649_v21, %v2659_v24  ;;  %v2678_v41 = vrot.slane %v2677_v33, 4  ;;  %v2691_v45 = vor.u32 %v2690_v38, %v2687_v35  ;;  %v2700_v46 = vrot.slane %v2698_v39, 4  ;;  %v5947_v31 = vld [vmem:[%s6916_s26 + $0x10] sm:$0xf]  ;;  %v5948_v36 = vld [vmem:[%s6916_s26 + $0x14] sm:$0x1] }
  0xae   : > { %v2673_v44 = vsel %vm6989_vm7, %v2668_v37, %v2672_v25  ;;  %v2709_v48 = vshrl.u32 %v5904_v28, 16  ;;  %v2706_v50 = vrot.slane %v2704_v43, 5  ;;  %v2712_v51 = vshll.u32 %v5904_v28, 16  ;;  %v6816_v24 = vld [vmem:[%s6916_s26 + $0xc0] sm:$0xff]  }
  0xaf   : > { %6600 = vmatprep.mubr.msk.bf16.mxu0 %vm317_vm1, %v5924_v40  ;;  %v2683_v49 = vsel %vm6989_vm7, %v2678_v41, %v2682_v34  ;;  %v2718_v56 = vshll.u32 %v5905_v32, 16  ;;  %v2692_v61 = vrot.slane %v2691_v45, 4  ;;  %v2701_v62 = vor.u32 %v2700_v46, %v2696_v42  ;;  %v5949_v41 = vld [vmem:[%s6916_s26 + $0x18] sm:$0xe]  ;;  %v5950_v46 = vld [vmem:[%s6916_s26 + $0x1c] sm:$0xf] }
  0xb0   : > { %v5925_v59 = vcombine.low %v2673_v44, %v2683_v49  ;;  %v2711_v58 = vrot.slane %v2709_v48, 4  ;;  %v2714_v2 = vrot.slane %v2712_v51, 5  ;;  %v2722_v4 = vshrl.u32 %v5905_v32, 16 }
  0xb1   : > { %v2720_v3 = vrot.slane %v2718_v56, 5  ;;  %v2728_v5 = vshll.u32 %v5906_v47, 16  ;;  %v2697_v8 = vsel %vm6989_vm7, %v2692_v61, %v2696_v42  ;;  %v2702_v9 = vrot.slane %v2701_v62, 4  ;;  %v5951_v47 = vld [vmem:[%s6916_s26 + $0x20] sm:$0x1] }
  0xb2   : > { %6601 = vmatmul.mubr.msk.bf16.gmra.mxu0 %vm317_vm1, %v5925_v59  ;;  %v2733_v53 = vshrl.u32 %v5907_v57, 16  ;;  %v2736_v10 = vshll.u32 %v5907_v57, 16  ;;  %v2715_v12 = vor.u32 %v2714_v2, %v2711_v58  ;;  %v2724_v13 = vrot.slane %v2722_v4, 4  ;;  %v5952_v56 = vld [vmem:[%s6916_s26 + $0x24] sm:$0xe] }
  0xb3   : > { %v2730_v14 = vrot.slane %v2728_v5, 5  ;;  %v2742_v19 = vshll.u32 %v5908_v0, 16  ;;  %6571 = vmatmul.mubr.msk.bf16.gmra.mxu1 %vm317_vm1, %v6814_v60  ;;  %v2707_v15 = vsel %vm6989_vm7, %v2702_v9, %v2706_v50  ;;  %v2746_v20 = vshrl.u32 %v5908_v0, 16  ;;  %v5953_v57 = vld [vmem:[%s6916_s26 + $0x28] sm:$0xf] }
  0xb4   : > { %v2735_v16 = vrot.slane %v2733_v53, 4  ;;  %v2738_v17 = vrot.slane %v2736_v10, 5  ;;  %v5926_v22 = vcombine.low %v2697_v8, %v2707_v15  ;;  %v2716_v23 = vrot.slane %v2715_v12, 4  ;;  %6574 = vmatprep.mubr.msk.bf16.mxu1 %vm317_vm1, %v6815_v63  ;;  %v5954_v58 = vld [vmem:[%s6916_s26 + $0x2c] sm:$0x1] }
  0xb5   : > { %v2725_v25 = vor.u32 %v2724_v13, %v2720_v3  ;;  %v2744_v26 = vrot.slane %v2742_v19, 5  ;;  %v2748_v28 = vrot.slane %v2746_v20, 4  ;;  %v2752_v21 = vshll.u32 %v5909_v6, 16  ;;  %v5955_v8 = vld [vmem:[%s6916_s26 + $0x30] sm:$0xe] }
  0xb6   : > { %v2739_v18 = vor.u32 %v2738_v17, %v2735_v16  ;;  %v2757_v29 = vshrl.u32 %v5910_v7, 16  ;;  %6604 = vmatprep.mubr.msk.bf16.mxu0 %vm317_vm1, %v5926_v22  ;;  %v2721_v32 = vsel %vm6989_vm7, %v2716_v23, %v2720_v3  ;;  %v2760_v34 = vshll.u32 %v5910_v7, 16  ;;  %v5956_v9 = vld [vmem:[%s6916_s26 + $0x34] sm:$0xf]  ;;  %v5957_v13 = vld [vmem:[%s6916_s26 + $0x38] sm:$0x1] }
  0xb7   : > { %v2726_v33 = vrot.slane %v2725_v25, 4  ;;  %v2766_v35 = vshll.u32 %v5911_v11, 16  ;;  %v2749_v38 = vor.u32 %v2748_v28, %v2744_v26  ;;  %v2754_v39 = vrot.slane %v2752_v21, 5  ;;  %v5958_v17 = vld [vmem:[%s6916_s26 + $0x3c] sm:$0xe] }
  0xb8   : > { %v2740_v37 = vrot.slane %v2739_v18, 4  ;;  %v2759_v40 = vrot.slane %v2757_v29, 4  ;;  %v2762_v43 = vrot.slane %v2760_v34, 5  ;;  %v2770_v45 = vshrl.u32 %v5911_v11, 16  ;;  %v5959_v25 = vld [vmem:[%s6916_s26 + $0x40] sm:$0xf] }
  0xb9   : > { %v2731_v42 = vsel %vm6989_vm7, %v2726_v33, %v2730_v14  ;;  %v2768_v44 = vrot.slane %v2766_v35, 5  ;;  %v2750_v50 = vrot.slane %v2749_v38, 4  ;;  %v2776_v51 = vshll.u32 %v5912_v27, 16  ;;  %v5961_v27 = vld [vmem:[%s6916_s26 + $0x48] sm:$0xe]  ;;  %v6817_v29 = vld [vmem:[%s6916_s26 + $0x18] sm:$0xff]  }
  0xba   : > { %v5927_v48 = vcombine.low %v2721_v32, %v2731_v42  ;;  %v2745_v49 = vsel %vm6989_vm7, %v2740_v37, %v2744_v26  ;;  %v2763_v59 = vor.u32 %v2762_v43, %v2759_v40  ;;  %v2772_v60 = vrot.slane %v2770_v45, 4  ;;  %v5960_v26 = vld [vmem:[%s6916_s26 + $0x44] sm:$0x1]  ;;  %v5962_v18 = vld [vmem:[%s6916_s26 + $0x4c] sm:$0xf] }
  0xbb   : > { %v5994_v61 = vrot.slane %v5946_v30, 9  ;;  %v3236_v62 = vrot.slane %v5947_v31, 5  ;;  %6575 = vmatmul.mubr.msk.bf16.gmra.mxu1 %vm317_vm1, %v6816_v24  ;;  %v2755_v63 = vsel %vm6989_vm7, %v2750_v50, %v2754_v39  ;;  %v2778_v0 = vrot.slane %v2776_v51, 5  ;;  %v5963_v32 = vld [vmem:[%s6916_s26 + $0x50] sm:$0x1] }
  0xbc   : > { %6605 = vmatmul.mubr.msk.bf16.gmra.mxu0 %vm317_vm1, %v5927_v48  ;;  %v3239_v2 = vrot.slane %v5948_v36, 5  ;;  %v5995_v3 = vrot.slane %v5949_v41, 9  ;;  %v5928_v4 = vcombine.low %v2745_v49, %v2755_v63  ;;  %v2764_v5 = vrot.slane %v2763_v59, 4  ;;  %v5964_v33 = vld [vmem:[%s6916_s26 + $0x54] sm:$0xe] }
  0xbd   : > { %v2773_v6 = vor.u32 %v2772_v60, %v2768_v44  ;;  %v3237_v7 = vsel %vm6982_vm6, %v5994_v61, %v3236_v62  ;;  %v3238_v53 = vrot.slane %v3236_v62, 4  ;;  %v3243_v10 = vrot.slane %v5950_v46, 5  ;;  %v5965_v34 = vld [vmem:[%s6916_s26 + $0x58] sm:$0xf]  ;;  %v5966_v42 = vld [vmem:[%s6916_s26 + $0x5c] sm:$0x1] }
  0xbe   : > { %v3246_v11 = vrot.slane %v5951_v47, 5  ;;  %v4658_v12 = vsel %vm366_vm0, %v7333_v1, 0  ;;  %6608 = vmatprep.mubr.msk.bf16.mxu0 %vm317_vm1, %v5928_v4  ;;  %v2769_v14 = vsel %vm6989_vm7, %v2764_v5, %v2768_v44  ;;  %v5996_v15 = vrot.slane %v5952_v56, 9  ;;  %v5967_v47 = vld [vmem:[%s6916_s26 + $0x60] sm:$0xe] }
  0xbf   : > { %v2774_v19 = vrot.slane %v2773_v6, 4  ;;  %v3250_v16 = vrot.slane %v5953_v57, 5  ;;  %v3240_v20 = vsel %vm6982_vm6, %v3238_v53, %v3239_v2  ;;  %v3244_v1 = vsel %vm6982_vm6, %v5995_v3, %v3243_v10  ;;  %v5968_v48 = vld [vmem:[%s6916_s26 + $0x64] sm:$0xf]  ;;  %v5969_v56 = vld [vmem:[%s6916_s26 + $0x68] sm:$0x1] }
  0xc0   : > { %v3245_v22 = vrot.slane %v3243_v10, 4  ;;  %v3253_v23 = vrot.slane %v5954_v58, 5  ;;  %v6011_v21 = vcombine.low %v3237_v7, %v3240_v20  ;;  %v5997_v24 = vrot.slane %v5955_v8, 9  ;;  %v5970_v62 = vld [vmem:[%s6916_s26 + $0x6c] sm:$0xe]  ;;  %v6818_v7 = vld [vmem:[%s6916_s26 + $0x24] sm:$0xff]  }
  0xc1   : > { %v2779_v28 = vsel %vm6989_vm7, %v2774_v19, %v2778_v0  ;;  %v3251_v30 = vsel %vm6982_vm6, %v5996_v15, %v3250_v16  ;;  %v3252_v31 = vrot.slane %v3250_v16, 4  ;;  %v3257_v37 = vrot.slane %v5956_v9, 5  ;;  %v5971_v3 = vld [vmem:[%s6916_s26 + $0x70] sm:$0xf]  ;;  %v7491_v4 = vld [vmem:[%s6916_s26 + $0x74] sm:$0x1] }
  0xc2   : > { %v5929_v35 = vcombine.low %v2769_v14, %v2779_v28  ;;  %v3247_v36 = vsel %vm6982_vm6, %v3245_v22, %v3246_v11  ;;  %6614 = vmatprep.mubr.msk.bf16.mxu1 %vm317_vm1, %v6011_v21  ;;  %v3260_v40 = vrot.slane %v5957_v13, 5  ;;  %v7468_v41 = vsel %vm366_vm0, %v7366_v52, 0  ;;  %v5973_v5 = vld [vmem:[%s6916_s26 + $0x78] sm:$0xe]  ;;  %v5974_v6 = vld [vmem:[%s6916_s26 + $0x7c] sm:$0xf] }
  0xc3   : > { %v6012_v38 = vcombine.low %v3244_v1, %v3247_v36  ;;  %v3254_v39 = vsel %vm6982_vm6, %v3252_v31, %v3253_v23  ;;  %v3258_v44 = vsel %vm6982_vm6, %v5997_v24, %v3257_v37  ;;  %v3259_v45 = vrot.slane %v3257_v37, 4  ;;  %v7501_v11 = vld [vmem:[%s6916_s26 + $0x80] sm:$0x1]  ;;  %v5977_v13 = vld [vmem:[%s6916_s26 + $0x88] sm:$0xf] }
  0xc4   : > { %6609 = vmatmul.mubr.msk.bf16.gmra.mxu0 %vm317_vm1, %v5929_v35  ;;  %v6013_v43 = vcombine.low %v3251_v30, %v3254_v39  ;;  %v5998_v46 = vrot.slane %v5958_v17, 9  ;;  %v3264_v49 = vrot.slane %v5959_v25, 5  ;;  %v3267_v52 = vrot.slane %v5960_v26, 5  ;;  %v6819_v17 = vld [vmem:[%s6916_s26 + $0x30] sm:$0xff]   ;;  %v5978_v25 = vld [vmem:[%s6916_s26 + $0x8c] sm:$0x1] }
  0xc5   : > { %6615 = vmatmul.mubr.msk.bf16.vlgmr.msra.gmra.mxu1 %vm317_vm1, %v6012_v38  ;;  %6648 = vmatprep.mubr.msk.bf16.mxu0 %vm317_vm1, %v6817_v29  ;;  %v5999_v50 = vrot.slane %v5961_v27, 9  ;;  %v3271_v51 = vrot.slane %v5962_v18, 5  ;;  %v3261_v57 = vsel %vm6982_vm6, %v3259_v45, %v3260_v40  ;;  %v3274_v59 = vrot.slane %v5963_v32, 5  ;;  %v5979_v29 = vld [vmem:[%s6916_s26 + $0x90] sm:$0xe] }
  0xc6   : > { %6681 = vmatpush3.bf16.msra.mxu1 %v4658_v12  ;;  %6618 = vmatprep.mubr.msk.bf16.mxu1 %vm317_vm1, %v6013_v43  ;;  %v6000_v60 = vrot.slane %v5964_v33, 9  ;;  %v3278_v61 = vrot.slane %v5965_v34, 5  ;;  %v6014_v58 = vcombine.low %v3258_v44, %v3261_v57  ;;  %v3265_v63 = vsel %vm6982_vm6, %v5998_v46, %v3264_v49  ;;  %v5976_v12 = vld [vmem:[%s6916_s26 + $0x84] sm:$0xe]  ;;  %v5980_v30 = vld [vmem:[%s6916_s26 + $0x94] sm:$0xf] }
  0xc7   : > { %v3266_v0 = vrot.slane %v3264_v49, 4  ;;  %v7487_v2 = vsel %vm6982_vm6, %v5999_v50, %v3271_v51  ;;  %v3273_v8 = vrot.slane %v3271_v51, 4  ;;  %v3281_v10 = vrot.slane %v5966_v42, 5  ;;  %v5981_v35 = vld [vmem:[%s6916_s26 + $0x98] sm:$0x1] }
  0xc8   : > { %v7498_v9 = vsel %vm6982_vm6, %v6000_v60, %v3278_v61  ;;  %v3280_v53 = vrot.slane %v3278_v61, 4  ;;  %v6001_v19 = vrot.slane %v5967_v47, 9  ;;  %v3285_v15 = vrot.slane %v5968_v48, 5  ;;  %v5982_v42 = vld [vmem:[%s6916_s26 + $0x9c] sm:$0xe] }
  0xc9   : > { %v3268_v14 = vsel %vm6982_vm6, %v3266_v0, %v3267_v52  ;;  %v3288_v16 = vrot.slane %v5969_v56, 5  ;;  %v7510_v1 = vsel %vm6982_vm6, %v3273_v8, %v3274_v59  ;;  %v6002_v23 = vrot.slane %v5970_v62, 9  ;;  %v5983_v46 = vld [vmem:[%s6916_s26 + $0xa0] sm:$0xf]  ;;  %v7554_v47 = vld [vmem:[%s6916_s26 + $0xa4] sm:$0x1] }
  0xca   : > { %v6015_v20 = vcombine.low %v3265_v63, %v3268_v14  ;;  %v7514_v22 = vsel %vm6982_vm6, %v3280_v53, %v3281_v10  ;;  %v6016_v26 = vcombine.low %v7487_v2, %v7510_v1  ;;  %v7523_v18 = vsel %vm6982_vm6, %v6001_v19, %v3285_v15  ;;  %v5985_v48 = vld [vmem:[%s6916_s26 + $0xa8] sm:$0xe]  ;;  %v5986_v49 = vld [vmem:[%s6916_s26 + $0xac] sm:$0xf]  ;;  %v7565_v60 = vld [vmem:[%s6916_s26 + $0xb0] sm:$0x1] }
  0xcb   : > { %v6017_v27 = vcombine.low %v7498_v9, %v7514_v22  ;;  %v3287_v28 = vrot.slane %v3285_v15, 4  ;;  %v3292_v31 = vrot.slane %v5971_v3, 5  ;;  %v3295_v32 = vrot.slane %v7491_v4, 5  ;;  %v5988_v61 = vld [vmem:[%s6916_s26 + $0xb4] sm:$0xe]  ;;  %v6820_v62 = vld [vmem:[%s6916_s26 + $0x3c] sm:$0xff]  }
  0xcc   : > { %6649 = vmatmul.mubr.msk.bf16.vlgmr.msra.gmra.mxu0 %vm317_vm1, %v6818_v7  ;;  %v6003_v33 = vrot.slane %v5973_v5, 9  ;;  %v3299_v34 = vrot.slane %v5974_v6, 5  ;;  %v3302_v24 = vrot.slane %v7501_v11, 5  ;;  %v6004_v39 = vrot.slane %v5976_v12, 9  ;;  %v6821_v4 = vld [vmem:[%s6916_s26 + $0x48] sm:$0xff]  }
  0xcd   : > { %6619 = vmatmul.mubr.msk.bf16.gmra.mxu1 %vm317_vm1, %v6014_v58  ;;  %6715 = vmatpush3.bf16.msra.mxu0 %v7468_v41  ;;  %v7534_v36 = vsel %vm6982_vm6, %v3287_v28, %v3288_v16  ;;  %v3306_v40 = vrot.slane %v5977_v13, 5  ;;  %v7546_v43 = vsel %vm6982_vm6, %v6002_v23, %v3292_v31  ;;  %v3294_v44 = vrot.slane %v3292_v31, 4  ;;  %v5989_v11 = vld [vmem:[%s6916_s26 + $0xb8] sm:$0xf]  ;;  %v5990_v15 = vld [vmem:[%s6916_s26 + $0xbc] sm:$0x1] }
  0xce   : > { %6652 = vmatprep.mubr.msk.bf16.mxu0 %vm317_vm1, %v6819_v17  ;;  %6622 = vmatprep.mubr.msk.bf16.mxu1 %vm317_vm1, %v6015_v20  ;;  %v6018_v41 = vcombine.low %v7523_v18, %v7534_v36  ;;  %v7550_v45 = vsel %vm6982_vm6, %v6003_v33, %v3299_v34  ;;  %v3301_v52 = vrot.slane %v3299_v34, 4  ;;  %v3309_v59 = vrot.slane %v5978_v25, 5  ;;  %v5991_v16 = vld [vmem:[%s6916_s26 + $0xc0] sm:$0xe]  ;;  %v5993_v34 = vld [vmem:[%s6916_s26 + $0xc8] sm:$0x1] }
  0xcf   : > { %v7562_v56 = vsel %vm6982_vm6, %v6004_v39, %v3306_v40  ;;  %v3308_v57 = vrot.slane %v3306_v40, 4  ;;  %v7571_v58 = vsel %vm6982_vm6, %v3294_v44, %v3295_v32  ;;  %v6005_v63 = vrot.slane %v5979_v29, 9  ;;  %v5992_v29 = vld [vmem:[%s6916_s26 + $0xc4] sm:$0xf]  ;;  %v6108_v1 = vld [vmem:[%s6916_s26 + $0x18] sm:$0xf] }
  0xd0   : > { %v3313_v0 = vrot.slane %v5980_v30, 5  ;;  %v3316_v3 = vrot.slane %v5981_v35, 5  ;;  %v6019_v5 = vcombine.low %v7546_v43, %v7571_v58  ;;  %v7578_v6 = vsel %vm6982_vm6, %v3301_v52, %v3302_v24  ;;  %v6109_v52 = vld [vmem:[%s6916_s26 + $0x1c] sm:$0xf]  ;;  %v6193_v58 = vld [vmem:[%s6916_s26 + $0x28] sm:$0xf] }
  0xd1   : > { %v7582_v8 = vsel %vm6982_vm6, %v3308_v57, %v3309_v59  ;;  %v6006_v10 = vrot.slane %v5982_v42, 9  ;;  %v6020_v12 = vcombine.low %v7550_v45, %v7578_v6  ;;  %v3320_v23 = vrot.slane %v5983_v46, 5 }
  0xd2   : > { %v6021_v13 = vcombine.low %v7562_v56, %v7582_v8  ;;  %v7593_v14 = vsel %vm6982_vm6, %v6005_v63, %v3313_v0  ;;  %v3315_v19 = vrot.slane %v3313_v0, 4  ;;  %v3323_v25 = vrot.slane %v7554_v47, 5  ;;  %v6111_v63 = vld [vmem:[%s6916_s26 + $0x24] sm:$0xf] }
  0xd3   : > { %v6007_v28 = vrot.slane %v5985_v48, 9  ;;  %v3330_v31 = vrot.slane %v7565_v60, 5  ;;  %v6008_v32 = vrot.slane %v5988_v61, 9  ;;  %v3334_v33 = vrot.slane %v5989_v11, 5  ;;  %v6110_v61 = vld [vmem:[%s6916_s26 + $0x20] sm:$0x1] }
  0xd4   : > { %6653 = vmatmul.mubr.msk.bf16.gmra.mxu0 %vm317_vm1, %v6820_v62  ;;  %v7604_v30 = vsel %vm6982_vm6, %v3315_v19, %v3316_v3  ;;  %v7619_v39 = vsel %vm6982_vm6, %v6006_v10, %v3320_v23  ;;  %v3322_v40 = vrot.slane %v3320_v23, 4  ;;  %v3337_v46 = vrot.slane %v5990_v15, 5  ;;  %v6823_v0 = vld [vmem:[%s6916_s26 + $0x60] sm:$0xff]   ;;  %v6112_v15 = vld [vmem:[%s6916_s26 + $0x28] sm:$0xf] }
  0xd5   : > { %v6462_v21 = vpop.f32.mrf.mxu1  ;;  %6623 = vmatmul.mubr.msk.bf16.gmra.mxu1 %vm317_vm1, %v6016_v26  ;;  %6656 = vmatprep.mubr.msk.bf16.mxu0 %vm317_vm1, %v6821_v4  ;;  %v6022_v35 = vcombine.low %v7593_v14, %v7604_v30  ;;  %v7632_v42 = vsel %vm6982_vm6, %v6008_v32, %v3334_v33  ;;  %v3336_v44 = vrot.slane %v3334_v33, 4  ;;  %v6009_v9 = vrot.slane %v5991_v16, 9 }
  0xd6   : > { %549 = vst [vmem:[#allocation2 + $0x90] sm:$0xff] %v6462_v21  ;;  %v7537_v38 = vpop.f32.mrf.mxu0  ;;  %v3327_v21 = vrot.slane %v5986_v49, 5  ;;  %6626 = vmatprep.mubr.msk.bf16.mxu1 %vm317_vm1, %v6017_v27  ;;  %v7638_v49 = vsel %vm6982_vm6, %v3322_v40, %v3323_v25  ;;  %v3341_v22 = vrot.slane %v5992_v29, 5  ;;  %v3344_v27 = vrot.slane %v5993_v34, 5 }
  0xd7   : > { %v468_v37 = vpop.f32.mrf.mxu1  ;;  %v6023_v57 = vcombine.low %v7619_v39, %v7638_v49  ;;  %v7650_v60 = vsel %vm6982_vm6, %v3336_v44, %v3337_v46  ;;  %v4176_v62 = vshrl.u32 %v6108_v1, 16  ;;  %v4185_v23 = vshll.u32 %v6109_v52, 16  ;;  %v6190_v46 = vld [vmem:[%s6916_s26 + $0x1c] sm:$0xf] }
  0xd8   : > { %547 = vst [vmem:[#allocation2 + $0x80] sm:$0xff] %v468_v37  ;;  %v7558_v51 = vpop.f32.mrf.mxu0  ;;  %v7623_v2 = vsel %vm6982_vm6, %v6007_v28, %v3327_v21  ;;  %v3329_v26 = vrot.slane %v3327_v21, 4  ;;  %v7663_v11 = vsel %vm6982_vm6, %v6009_v9, %v3341_v22  ;;  %v3343_v19 = vrot.slane %v3341_v22, 4  ;;  %v6113_v28 = vld [vmem:[%s6916_s26 + $0x2c] sm:$0x1] }
  0xd9   : > { %v6463_v50 = vpop.f32.mrf.mxu1  ;;  %v4178_v16 = vrot.slane %v4176_v62, 4  ;;  %v4189_v25 = vshrl.u32 %v6109_v52, 16  ;;  %v4195_v32 = vshll.u32 %v6110_v61, 16  ;;  %v4200_v33 = vshrl.u32 %v6111_v63, 16  ;;  %v6191_v62 = vld [vmem:[%s6916_s26 + $0x20] sm:$0x1] }
  0xda   : > { %550 = vst [vmem:[#allocation2 + $0x98] sm:$0xff] %v6463_v50  ;;  %v7584_v53 = vpop.f32.mrf.mxu0  ;;  %v6822_v50 = vld [vmem:[%s6916_s26 + $0x54] sm:$0xff]   ;;  %v7646_v59 = vsel %vm6982_vm6, %v3329_v26, %v3330_v31  ;;  %v7671_v31 = vsel %vm6982_vm6, %v3343_v19, %v3344_v27  ;;  %v4203_v34 = vshll.u32 %v6111_v63, 16  ;;  %v4187_v26 = vrot.slane %v4185_v23, 5  ;;  %v6192_v63 = vld [vmem:[%s6916_s26 + $0x24] sm:$0xe] }
  0xdb   : > { %v471_v7 = vpop.f32.mrf.mxu1  ;;  %v4191_v44 = vrot.slane %v4189_v25, 4  ;;  %v4197_v22 = vrot.slane %v4195_v32, 5  ;;  %v4202_v27 = vrot.slane %v4200_v33, 4  ;;  %v4219_v61 = vshll.u32 %v6113_v28, 16  ;;  %v6194_v28 = vld [vmem:[%s6916_s26 + $0x2c] sm:$0x1] }
  0xdc   : > { %548 = vst [vmem:[#allocation2 + $0x88] sm:$0xff] %v471_v7  ;;  %v7597_v20 = vpop.f32.mrf.mxu0  ;;  %6657 = vmatmul.mubr.msk.bf16.gmra.mxu0 %vm317_vm1, %v6822_v50  ;;  %v4205_v52 = vrot.slane %v4203_v34, 5  ;;  %v4209_v50 = vshll.u32 %v6112_v15, 16  ;;  %v5015_v43 = vrot.slane %v6190_v46, 5  ;;  %v6825_v32 = vld [vmem:[%s6916_s26 + $0x78] sm:$0xff]   ;;  %v5018_v46 = vrot.slane %v6191_v62, 5 }
  0xdd   : > { %v6466_v17 = vpop.f32.mrf.mxu1  ;;  %6627 = vmatmul.mubr.msk.bf16.gmra.mxu1 %vm317_vm1, %v6018_v41  ;;  %6660 = vmatprep.mubr.msk.bf16.mxu0 %vm317_vm1, %v6823_v0  ;;  %v4192_v36 = vor.u32 %v4191_v44, %v4187_v26  ;;  %v4213_v41 = vshrl.u32 %v6112_v15, 16  ;;  %v6824_v0 = vld [vmem:[%s6916_s26 + $0x6c] sm:$0xff]   ;;  %v4221_v15 = vrot.slane %v4219_v61, 5 }
  0xde   : > { %553 = vst [vmem:[#allocation2 + $0xb0] sm:$0xff] %v6466_v17  ;;  %v7615_v37 = vpop.f32.mrf.mxu0  ;;  %v4179_v17 = vshll.u32 %v6108_v1, 16  ;;  %6630 = vmatprep.mubr.msk.bf16.mxu1 %vm317_vm1, %v6019_v5  ;;  %v4211_v23 = vrot.slane %v4209_v50, 5 }
  0xdf   : > { %v484_v24 = vpop.f32.mrf.mxu1 }
  0xe0   : > { %551 = vst [vmem:[#allocation2 + $0xa0] sm:$0xff] %v484_v24  ;;  %v7634_v48 = vpop.f32.mrf.mxu0  ;;  %v6189_v24 = vld [vmem:[%s6916_s26 + $0x18] sm:$0xe]  ;;  %v4181_v1 = vrot.slane %v4179_v17, 5  ;;  %v4206_v17 = vor.u32 %v4205_v52, %v4202_v27 }
  0xe1   : > { %v6467_v47 = vpop.f32.mrf.mxu1  ;;  %v6237_v25 = vrot.slane %v6189_v24, 9  ;;  %v5017_v24 = vrot.slane %v5015_v43, 4 }
  0xe2   : > { %554 = vst [vmem:[#allocation2 + $0xb8] sm:$0xff] %v6467_v47  ;;  %v7655_v4 = vpop.f32.mrf.mxu0  ;;  %v4182_v18 = vor.u32 %v4181_v1, %v4178_v16  ;;  %v4193_v16 = vrot.slane %v4192_v36, 4  ;;  %v4207_v1 = vrot.slane %v4206_v17, 4  ;;  %v6115_v36 = vld [vmem:[%s6916_s26 + $0x34] sm:$0xf] }
  0xe3   : > { %v487_v3 = vpop.f32.mrf.mxu1  ;;  %v7701_v44 = vsel %vm6982_vm6, %v6237_v25, %v5015_v43  ;;  %v7717_v62 = vsel %vm6982_vm6, %v5017_v24, %v5018_v46  ;;  %v5022_v25 = vrot.slane %v6193_v58, 5  ;;  %v5025_v43 = vrot.slane %v6194_v28, 5 }
  0xe4   : > { %552 = vst [vmem:[#allocation2 + $0xa8] sm:$0xff] %v487_v3  ;;  %v7667_v29 = vpop.f32.mrf.mxu0  ;;  %v4183_v5 = vrot.slane %v4182_v18, 4  ;;  %v4198_v52 = vsel %vm6989_vm7, %v4193_v16, %v4197_v22  ;;  %v6238_v18 = vrot.slane %v6192_v63, 9  ;;  %v4212_v17 = vsel %vm6989_vm7, %v4207_v1, %v4211_v23  ;;  %6661 = vmatmul.mubr.msk.bf16.gmra.mxu0 %vm317_vm1, %v6824_v0  ;;  %v6118_v1 = vld [vmem:[%s6916_s26 + $0x40] sm:$0xf] }
  0xe5   : > { %v6470_v21 = vpop.f32.mrf.mxu1  ;;  %6631 = vmatmul.mubr.msk.bf16.gmra.mxu1 %vm317_vm1, %v6020_v12  ;;  %6664 = vmatprep.mubr.msk.bf16.mxu0 %vm317_vm1, %v6825_v32  ;;  %v5024_v16 = vrot.slane %v5022_v25, 4  ;;  %v4233_v28 = vshll.u32 %v6115_v36, 16  ;;  %v4237_v12 = vshrl.u32 %v6115_v36, 16 }
  0xe6   : > { %557 = vst [vmem:[#allocation2 + $0xd0] sm:$0xff] %v6470_v21  ;;  %v7683_v9 = vpop.f32.mrf.mxu0  ;;  %v4215_v21 = vrot.slane %v4213_v41, 4  ;;  %v4188_v27 = vsel %vm6989_vm7, %v4183_v5, %v4187_v26  ;;  %v6116_v26 = vld [vmem:[%s6916_s26 + $0x38] sm:$0x1]  ;;  %v7732_v0 = vsel %vm6982_vm6, %v6238_v18, %v5022_v25  ;;  %6634 = vmatprep.mubr.msk.bf16.mxu1 %vm317_vm1, %v6021_v13 }
  0xe7   : > { %v500_v47 = vpop.f32.mrf.mxu1  ;;  %v4243_v32 = vshll.u32 %v6116_v26, 16  ;;  %v7748_v56 = vsel %vm6982_vm6, %v5024_v16, %v5025_v43  ;;  %v4235_v13 = vrot.slane %v4233_v28, 5  ;;  %v4239_v18 = vrot.slane %v4237_v12, 4  ;;  %v6196_v16 = vld [vmem:[%s6916_s26 + $0x34] sm:$0xf] }
  0xe8   : > { %555 = vst [vmem:[#allocation2 + $0xc0] sm:$0xff] %v500_v47  ;;  %v7692_v19 = vpop.f32.mrf.mxu0  ;;  %v6114_v47 = vld [vmem:[%s6916_s26 + $0x30] sm:$0xf]  ;;  %v4216_v50 = vor.u32 %v4215_v21, %v4211_v23 }
  0xe9   : > { %v6471_v3 = vpop.f32.mrf.mxu1  ;;  %v4224_v5 = vshrl.u32 %v6114_v47, 16  ;;  %v4227_v21 = vshll.u32 %v6114_v47, 16  ;;  %v4245_v36 = vrot.slane %v4243_v32, 5 }
  0xea   : > { %558 = vst [vmem:[#allocation2 + $0xd8] sm:$0xff] %v6471_v3  ;;  %v7697_v34 = vpop.f32.mrf.mxu0  ;;  %v7711_v3 = vcombine.low %v4188_v27, %v4198_v52  ;;  %v4217_v22 = vrot.slane %v4216_v50, 4  ;;  %v6119_v27 = vld [vmem:[%s6916_s26 + $0x44] sm:$0x1]  ;;  %v6195_v52 = vld [vmem:[%s6916_s26 + $0x30] sm:$0xe] }
  0xeb   : > { %v503_v33 = vpop.f32.mrf.mxu1  ;;  %v4226_v6 = vrot.slane %v4224_v5, 4  ;;  %v4229_v8 = vrot.slane %v4227_v21, 5  ;;  %v4257_v5 = vshll.u32 %v6118_v1, 16  ;;  %v4240_v21 = vor.u32 %v4239_v18, %v4235_v13 }
  0xec   : > { %556 = vst [vmem:[#allocation2 + $0xc8] sm:$0xff] %v503_v33  ;;  %v7709_v61 = vpop.f32.mrf.mxu0  ;;  %v6117_v33 = vld [vmem:[%s6916_s26 + $0x3c] sm:$0xf]  ;;  %v4222_v45 = vsel %vm6989_vm7, %v4217_v22, %v4221_v15  ;;  %v6826_v15 = vld [vmem:[%s6916_s26 + $0x84] sm:$0xff]   ;;  %v6239_v63 = vrot.slane %v6195_v52, 9 }
  0xed   : > { %v6474_v41 = vpop.f32.mrf.mxu1  ;;  %v7744_v47 = vcombine.low %v4212_v17, %v4222_v45  ;;  %v6827_v17 = vld [vmem:[%s6916_s26 + $0x90] sm:$0xff]   ;;  %v4230_v22 = vor.u32 %v4229_v8, %v4226_v6  ;;  %v4251_v43 = vshll.u32 %v6117_v33, 16  ;;  %v4267_v45 = vshll.u32 %v6119_v27, 16  ;;  %6665 = vmatmul.mubr.msk.bf16.gmra.mxu0 %vm317_vm1, %v6826_v15  ;;  %6635 = vmatmul.mubr.msk.bf16.gmra.mxu1 %vm317_vm1, %v6022_v35 }
  0xee   : > { %561 = vst [vmem:[#allocation2 + $0xf0] sm:$0xff] %v6474_v41  ;;  %v7728_v58 = vpop.f32.mrf.mxu0  ;;  %v4248_v41 = vshrl.u32 %v6117_v33, 16  ;;  %v4259_v10 = vrot.slane %v4257_v5, 5  ;;  %v4241_v6 = vrot.slane %v4240_v21, 4  ;;  %v5029_v8 = vrot.slane %v6196_v16, 5  ;;  %6668 = vmatprep.mubr.msk.bf16.mxu0 %vm317_vm1, %v6827_v17  ;;  %6638 = vmatprep.mubr.msk.bf16.mxu1 %vm317_vm1, %v6023_v57 }
  0xef   : > { %v516_v23 = vpop.f32.mrf.mxu1  ;;  %v4231_v12 = vrot.slane %v4230_v22, 4  ;;  %v4253_v32 = vrot.slane %v4251_v43, 5  ;;  %v6120_v21 = vld [vmem:[%s6916_s26 + $0x48] sm:$0xf] }
  0xf0   : > { %559 = vst [vmem:[#allocation2 + $0xe0] sm:$0xff] %v516_v23  ;;  %v7742_v46 = vpop.f32.mrf.mxu0  ;;  %v4261_v23 = vshrl.u32 %v6118_v1, 16  ;;  %v4250_v28 = vrot.slane %v4248_v41, 4  ;;  %v4269_v1 = vrot.slane %v4267_v45, 5  ;;  %v4246_v35 = vsel %vm6989_vm7, %v4241_v6, %v4245_v36  ;;  %v6122_v6 = vld [vmem:[%s6916_s26 + $0x50] sm:$0x1] }
  0xf1   : > { %v6475_v24 = vpop.f32.mrf.mxu1  ;;  %v4236_v18 = vsel %vm6989_vm7, %v4231_v12, %v4235_v13  ;;  %v6200_v13 = vld [vmem:[%s6916_s26 + $0x44] sm:$0x1]  ;;  %v5031_v57 = vrot.slane %v5029_v8, 4 }
  0xf2   : > { %562 = vst [vmem:[#allocation2 + $0xf8] sm:$0xff] %v6475_v24  ;;  %v7756_v26 = vpop.f32.mrf.mxu0  ;;  %v6197_v24 = vld [vmem:[%s6916_s26 + $0x38] sm:$0x1]  ;;  %v4263_v7 = vrot.slane %v4261_v23, 4  ;;  %v4254_v41 = vor.u32 %v4253_v32, %v4250_v28  ;;  %v7785_v43 = vcombine.low %v4236_v18, %v4246_v35  ;;  %v6123_v35 = vld [vmem:[%s6916_s26 + $0x54] sm:$0xf] }
  0xf3   : > { %v519_v25 = vpop.f32.mrf.mxu1 }
  0xf4   : > { %560 = vst [vmem:[#allocation2 + $0xe8] sm:$0xff] %v519_v25  ;;  %v7760_v40 = vpop.f32.mrf.mxu0  ;;  %v4264_v15 = vor.u32 %v4263_v7, %v4259_v10  ;;  %v6199_v25 = vld [vmem:[%s6916_s26 + $0x40] sm:$0xf]  ;;  %v7782_v7 = vsel %vm6982_vm6, %v6239_v63, %v5029_v8  ;;  %v4255_v39 = vrot.slane %v4254_v41, 4  ;;  %v6829_v63 = vld [vmem:[%s6916_s26 + $0xa8] sm:$0xff]  }
  0xf5   : > { %v6480_v50 = vpop.f32.mrf.mxu1  ;;  %v5036_v16 = vrot.slane %v6199_v25, 5 }
  0xf6   : > { %v1294_v33 = vadd.f32 %v6480_v50, %v7537_v38  ;;  %v6514_v52 = vpop.f32.mrf.mxu0  ;;  %v5032_v38 = vrot.slane %v6197_v24, 5  ;;  %v6198_v50 = vld [vmem:[%s6916_s26 + $0x3c] sm:$0xe]  ;;  %v4265_v49 = vrot.slane %v4264_v15, 4  ;;  %v4260_v24 = vsel %vm6989_vm7, %v4255_v39, %v4259_v10 }
  0xf7   : > { %v1133_v27 = vpop.f32.mrf.mxu1  ;;  %v6240_v23 = vrot.slane %v6198_v50, 9  ;;  %v5038_v41 = vrot.slane %v5036_v16, 4  ;;  %v4272_v15 = vshrl.u32 %v6120_v21, 16 }
  0xf8   : > { %v1292_v14 = vadd.f32 %v1133_v27, %v7558_v51  ;;  %v1863_v30 = vadd.f32 %v6514_v52, %v1294_v33  ;;  %v1702_v22 = vpop.f32.mrf.mxu0  ;;  %v6828_v51 = vld [vmem:[%s6916_s26 + $0x9c] sm:$0xff]   ;;  %v4270_v12 = vsel %vm6989_vm7, %v4265_v49, %v4269_v1  ;;  %v7797_v32 = vsel %vm6982_vm6, %v5031_v57, %v5032_v38 }
  0xf9   : > { %v6481_v17 = vpop.f32.mrf.mxu1  ;;  %v5039_v33 = vrot.slane %v6200_v13, 5  ;;  %v7802_v52 = vcombine.low %v4260_v24, %v4270_v12  ;;  %v6256_v10 = vcombine.low %v7782_v7, %v7797_v32  ;;  %v7808_v1 = vsel %vm6982_vm6, %v6240_v23, %v5036_v16  ;;  %6669 = vmatmul.mubr.msk.bf16.gmra.mxu0 %vm317_vm1, %v6828_v51  ;;  %v6124_v51 = vld [vmem:[%s6916_s26 + $0x58] sm:$0xf]  ;;  %v6125_v12 = vld [vmem:[%s6916_s26 + $0x5c] sm:$0x1] }
  0xfa   : > { %v1295_v5 = vadd.f32 %v6481_v17, %v7584_v53  ;;  %1895 = vst [vmem:[#allocation2 + $0x10] sm:$0xff] %v1863_v30  ;;  %v1861_v36 = vadd.f32 %v1702_v22, %v1292_v14  ;;  %v6515_v45 = vpop.f32.mrf.mxu0  ;;  %v6121_v53 = vld [vmem:[%s6916_s26 + $0x4c] sm:$0xf]  ;;  %v4275_v38 = vshll.u32 %v6120_v21, 16  ;;  %v4291_v30 = vshll.u32 %v6122_v6, 16  ;;  %6672 = vmatprep.mubr.msk.bf16.mxu0 %vm317_vm1, %v6829_v63 }
  0xfb   : > { %v1136_v28 = vpop.f32.mrf.mxu1  ;;  %v4281_v25 = vshll.u32 %v6121_v53, 16  ;;  %v4285_v14 = vshrl.u32 %v6121_v53, 16  ;;  %v8498_v13 = vcombine.low %v7623_v2, %v7646_v59  ;;  %v7820_v39 = vsel %vm6982_vm6, %v5038_v41, %v5039_v33 }
  0xfc   : > { %v1293_v8 = vadd.f32 %v1136_v28, %v7597_v20  ;;  %1893 = vst [vmem:[#allocation2] sm:$0xff] %v1861_v36  ;;  %v1864_v27 = vadd.f32 %v6515_v45, %v1295_v5  ;;  %v1705_v18 = vpop.f32.mrf.mxu0  ;;  %v4274_v49 = vrot.slane %v4272_v15, 4  ;;  %v4277_v57 = vrot.slane %v4275_v38, 5  ;;  %v6201_v38 = vld [vmem:[%s6916_s26 + $0x48] sm:$0xe] }
  0xfd   : > { %v6484_v20 = vpop.f32.mrf.mxu1  ;;  %6639 = vmatmul.mubr.msk.bf16.gmra.mxu1 %vm317_vm1, %v8498_v13  ;;  %v8499_v5 = vcombine.low %v7632_v42, %v7650_v60  ;;  %v4283_v59 = vrot.slane %v4281_v25, 5  ;;  %v4287_v36 = vrot.slane %v4285_v14, 4  ;;  %v4293_v23 = vrot.slane %v4291_v30, 5  ;;  %v6830_v42 = vld [vmem:[%s6916_s26 + $0xb4] sm:$0xff]  }
  0xfe   : > { %1896 = vst [vmem:[#allocation2 + $0x18] sm:$0xff] %v1864_v27  ;;  %v1862_v50 = vadd.f32 %v1705_v18, %v1293_v8  ;;  %v1298_v17 = vadd.f32 %v6484_v20, %v7615_v37  ;;  %v6518_v22 = vpop.f32.mrf.mxu0  ;;  %v6257_v37 = vcombine.low %v7808_v1, %v7820_v39  ;;  %v4278_v28 = vor.u32 %v4277_v57, %v4274_v49  ;;  %v6831_v8 = vld [vmem:[%s6916_s26 + $0xc0] sm:$0xff]   ;;  %v6203_v49 = vld [vmem:[%s6916_s26 + $0x50] sm:$0x1]  ;;  %v6204_v57 = vld [vmem:[%s6916_s26 + $0x54] sm:$0xe] }
  0xff   : > { %6642 = vmatprep.mubr.msk.bf16.mxu1 %vm317_vm1, %v8499_v5  ;;  %v1149_v2 = vpop.f32.mrf.mxu1  ;;  %v4296_v45 = vshrl.u32 %v6123_v35, 16  ;;  %v4288_v24 = vor.u32 %v4287_v36, %v4283_v59  ;;  %v4299_v33 = vshll.u32 %v6123_v35, 16  ;;  %v4305_v53 = vshll.u32 %v6124_v51, 16  ;;  %v6202_v35 = vld [vmem:[%s6916_s26 + $0x4c] sm:$0xf] }
 0x100   : > { %1894 = vst [vmem:[#allocation2 + $0x8] sm:$0xff] %v1862_v50  ;;  %v1296_v16 = vadd.f32 %v1149_v2, %v7634_v48  ;;  %v1867_v21 = vadd.f32 %v6518_v22, %v1298_v17  ;;  %v1718_v63 = vpop.f32.mrf.mxu0  ;;  %v4309_v6 = vshrl.u32 %v6124_v51, 16  ;;  %v4279_v48 = vrot.slane %v4278_v28, 4 }
 0x101   : > { %v6485_v60 = vpop.f32.mrf.mxu1  ;;  %v4298_v15 = vrot.slane %v4296_v45, 4  ;;  %v4289_v50 = vrot.slane %v4288_v24, 4  ;;  %v4301_v25 = vrot.slane %v4299_v33, 5  ;;  %v4307_v14 = vrot.slane %v4305_v53, 5  ;;  %6673 = vmatmul.mubr.msk.bf16.gmra.mxu0 %vm317_vm1, %v6830_v42  ;;  %v6126_v42 = vld [vmem:[%s6916_s26 + $0x60] sm:$0xf] }
 0x102   : > { %v1299_v27 = vadd.f32 %v6485_v60, %v7655_v4  ;;  %1899 = vst [vmem:[#allocation2 + $0x30] sm:$0xff] %v1867_v21  ;;  %v1865_v18 = vadd.f32 %v1718_v63, %v1296_v16  ;;  %v6519_v41 = vpop.f32.mrf.mxu0  ;;  %v4311_v30 = vrot.slane %v4309_v6, 4  ;;  %v4284_v4 = vsel %vm6989_vm7, %v4279_v48, %v4283_v59  ;;  %v6205_v21 = vld [vmem:[%s6916_s26 + $0x58] sm:$0xf]  ;;  %6676 = vmatprep.mubr.msk.bf16.mxu0 %vm317_vm1, %v6831_v8  ;;  %v6832_v8 = vld [vmem:[%s6916_s26 + $0xcc] sm:$0xff]  }
 0x103   : > { %v1152_v20 = vpop.f32.mrf.mxu1  ;;  %v4315_v22 = vshll.u32 %v6125_v12, 16  ;;  %v4294_v51 = vsel %vm6989_vm7, %v4289_v50, %v4293_v23  ;;  %v4302_v5 = vor.u32 %v4301_v25, %v4298_v15  ;;  %v6241_v16 = vrot.slane %v6201_v38, 9  ;;  %v6127_v48 = vld [vmem:[%s6916_s26 + $0x64] sm:$0xf] }
 0x104   : > { %v1297_v13 = vadd.f32 %v1152_v20, %v7667_v29  ;;  %1897 = vst [vmem:[#allocation2 + $0x20] sm:$0xff] %v1865_v18  ;;  %v1868_v17 = vadd.f32 %v6519_v41, %v1299_v27  ;;  %v4312_v2 = vor.u32 %v4311_v30, %v4307_v14  ;;  %v1721_v36 = vpop.f32.mrf.mxu0  ;;  %v6206_v29 = vld [vmem:[%s6916_s26 + $0x5c] sm:$0x1]  ;;  %v8500_v63 = vcombine.low %v7663_v11, %v7671_v31 }
 0x105   : > { %v7851_v59 = vcombine.low %v4284_v4, %v4294_v51  ;;  %v4317_v28 = vrot.slane %v4315_v22, 5  ;;  %v5043_v23 = vrot.slane %v6202_v35, 5  ;;  %v4303_v60 = vrot.slane %v4302_v5, 4  ;;  %v6488_v27 = vpop.f32.mrf.mxu1  ;;  %v6129_v35 = vld [vmem:[%s6916_s26 + $0x6c] sm:$0xf] }
 0x106   : > { %6643 = vmatmul.mubr.msk.bf16.gmra.mxu1 %vm317_vm1, %v8500_v63  ;;  %1900 = vst [vmem:[#allocation2 + $0x38] sm:$0xff] %v1868_v17  ;;  %v1866_v45 = vadd.f32 %v1721_v36, %v1297_v13  ;;  %v4313_v24 = vrot.slane %v4312_v2, 4  ;;  %v5046_v12 = vrot.slane %v6203_v49, 5  ;;  %v6242_v11 = vrot.slane %v6204_v57, 9  ;;  %v6522_v25 = vpop.f32.mrf.mxu0  ;;  %v6130_v63 = vld [vmem:[%s6916_s26 + $0x70] sm:$0xf] }
 0x107   : > { %6682 = vmatprep.mubr.msk.bf16.mxu1 %vm317_vm1, %v7711_v3  ;;  %v7858_v31 = vsel %vm6982_vm6, %v6241_v16, %v5043_v23  ;;  %v5045_v33 = vrot.slane %v5043_v23, 4  ;;  %v5050_v53 = vrot.slane %v6205_v21, 5  ;;  %v5053_v6 = vrot.slane %v6206_v29, 5  ;;  %v1165_v13 = vpop.f32.mrf.mxu1 }
 0x108   : > { %1898 = vst [vmem:[#allocation2 + $0x28] sm:$0xff] %v1866_v45  ;;  %v4308_v18 = vsel %vm6989_vm7, %v4303_v60, %v4307_v14  ;;  %v4318_v3 = vsel %vm6989_vm7, %v4313_v24, %v4317_v28  ;;  %v4320_v41 = vshrl.u32 %v6126_v42, 16  ;;  %v4323_v15 = vshll.u32 %v6126_v42, 16  ;;  %v6128_v14 = vld [vmem:[%s6916_s26 + $0x68] sm:$0x1]  ;;  %v1734_v51 = vpop.f32.mrf.mxu0 }
 0x109   : > { %v1302_v38 = vadd.f32 %v6488_v27, %v7683_v9  ;;  %v7867_v20 = vcombine.low %v4308_v18, %v4318_v3  ;;  %v7871_v50 = vsel %vm6982_vm6, %v5045_v33, %v5046_v12  ;;  %v7875_v30 = vsel %vm6982_vm6, %v6242_v11, %v5050_v53  ;;  %6677 = vmatmul.mubr.msk.bf16.gmra.mxu0 %vm317_vm1, %v6832_v8  ;;  %v6489_v36 = vpop.f32.mrf.mxu1  ;;  %v6131_v12 = vld [vmem:[%s6916_s26 + $0x74] sm:$0x1]  ;;  %v6207_v33 = vld [vmem:[%s6916_s26 + $0x60] sm:$0xe]  ;;  %v6208_v18 = vld [vmem:[%s6916_s26 + $0x64] sm:$0xf] }
 0x10a   : > { %v6258_v4 = vcombine.low %v7858_v31, %v7871_v50  ;;  %v5052_v17 = vrot.slane %v5050_v53, 4  ;;  %v4322_v9 = vrot.slane %v4320_v41, 4  ;;  %v4325_v22 = vrot.slane %v4323_v15, 5  ;;  %v6523_v24 = vpop.f32.mrf.mxu0  ;;  %v6209_v3 = vld [vmem:[%s6916_s26 + $0x68] sm:$0x1] }
 0x10b   : > { %v1300_v49 = vadd.f32 %v1165_v13, %v7692_v19  ;;  %v1871_v57 = vadd.f32 %v6522_v25, %v1302_v38  ;;  %v4329_v5 = vshll.u32 %v6127_v48, 16  ;;  %v4333_v2 = vshrl.u32 %v6127_v48, 16  ;;  %v6210_v25 = vld [vmem:[%s6916_s26 + $0x6c] sm:$0xe]  ;;  %v6217_v50 = vld [vmem:[%s6916_s26 + $0x88] sm:$0xf] }
 0x10c   : > { %v7885_v16 = vsel %vm6982_vm6, %v5052_v17, %v5053_v6  ;;  %v4326_v21 = vor.u32 %v4325_v22, %v4322_v9  ;;  %v4339_v29 = vshll.u32 %v6128_v14, 16  ;;  %v4344_v28 = vshrl.u32 %v6129_v35, 16  ;;  %v1737_v38 = vpop.f32.mrf.mxu0  ;;  %v6211_v14 = vld [vmem:[%s6916_s26 + $0x70] sm:$0xf] }
 0x10d   : > { %v8501_v19 = vcombine.low %v7701_v44, %v7717_v62  ;;  %v1303_v45 = vadd.f32 %v6489_v36, %v7697_v34  ;;  %1903 = vst [vmem:[#allocation2 + $0x50] sm:$0xff] %v1871_v57  ;;  %v6259_v23 = vcombine.low %v7875_v30, %v7885_v16  ;;  %v1869_v42 = vadd.f32 %v1734_v51, %v1300_v49 }
 0x10e   : > { %6683 = vmatmul.mubr.msk.bf16.vlgmr.msra.gmra.mxu1 %vm317_vm1, %v7744_v47  ;;  %v4331_v60 = vrot.slane %v4329_v5, 5  ;;  %v1168_v47 = vpop.f32.mrf.mxu1  ;;  %v4327_v11 = vrot.slane %v4326_v21, 4  ;;  %v4335_v44 = vrot.slane %v4333_v2, 4  ;;  %v4341_v62 = vrot.slane %v4339_v29, 5  ;;  %v6212_v2 = vld [vmem:[%s6916_s26 + $0x74] sm:$0x1] }
 0x10f   : > { %6716 = vmatprep.mubr.msk.bf16.mxu0 %vm317_vm1, %v8501_v19  ;;  %6686 = vmatprep.mubr.msk.bf16.mxu1 %vm317_vm1, %v7785_v43  ;;  %v4346_v34 = vrot.slane %v4344_v28, 4  ;;  %v1301_v53 = vadd.f32 %v1168_v47, %v7709_v61  ;;  %1901 = vst [vmem:[#allocation2 + $0x40] sm:$0xff] %v1869_v42  ;;  %v1872_v6 = vadd.f32 %v6523_v24, %v1303_v45  ;;  %v4347_v8 = vshll.u32 %v6129_v35, 16  ;;  %v6526_v24 = vpop.f32.mrf.mxu0  ;;  %v6132_v47 = vld [vmem:[%s6916_s26 + $0x78] sm:$0xf] }
 0x110   : > { %v4353_v27 = vshll.u32 %v6130_v63, 16  ;;  %v4332_v48 = vsel %vm6989_vm7, %v4327_v11, %v4331_v60  ;;  %v4336_v43 = vor.u32 %v4335_v44, %v4331_v60  ;;  %v4357_v41 = vshrl.u32 %v6130_v63, 16  ;;  %v6492_v28 = vpop.f32.mrf.mxu1 }
 0x111   : > { %v4363_v15 = vshll.u32 %v6131_v12, 16  ;;  %1904 = vst [vmem:[#allocation2 + $0x58] sm:$0xff] %v1872_v6  ;;  %v4349_v13 = vrot.slane %v4347_v8, 5  ;;  %v7908_v61 = vadd.f32 %v1737_v38, %v1301_v53  ;;  %v6243_v9 = vrot.slane %v6207_v33, 9  ;;  %v6133_v33 = vld [vmem:[%s6916_s26 + $0x7c] sm:$0xf] }
 0x112   : > { %v4355_v17 = vrot.slane %v4353_v27, 5  ;;  %v4337_v35 = vrot.slane %v4336_v43, 4  ;;  %v4359_v22 = vrot.slane %v4357_v41, 4  ;;  %v5057_v57 = vrot.slane %v6208_v18, 5  ;;  %v1181_v11 = vpop.f32.mrf.mxu1  ;;  %v6134_v27 = vld [vmem:[%s6916_s26 + $0x80] sm:$0x1] }
 0x113   : > { %v4365_v49 = vrot.slane %v4363_v15, 5  ;;  %v4350_v51 = vor.u32 %v4349_v13, %v4346_v34  ;;  %v5060_v5 = vrot.slane %v6209_v3, 5  ;;  %v6244_v36 = vrot.slane %v6210_v25, 9 }
 0x114   : > { %v5064_v21 = vrot.slane %v6211_v14, 5  ;;  %v8502_v29 = vcombine.low %v7732_v0, %v7748_v56  ;;  %v4342_v63 = vsel %vm6989_vm7, %v4337_v35, %v4341_v62  ;;  %v4360_v19 = vor.u32 %v4359_v22, %v4355_v17  ;;  %v6493_v6 = vpop.f32.mrf.mxu1  ;;  %v6136_v35 = vld [vmem:[%s6916_s26 + $0x88] sm:$0xf] }
 0x115   : > { %v7919_v45 = vsel %vm6982_vm6, %v6243_v9, %v5057_v57  ;;  %v5059_v42 = vrot.slane %v5057_v57, 4  ;;  %v6163_v0 = vcombine.low %v4332_v48, %v4342_v63  ;;  %v1306_v56 = vadd.f32 %v6492_v28, %v7728_v58  ;;  %v6214_v63 = vld [vmem:[%s6916_s26 + $0x7c] sm:$0xf] }
 0x116   : > { %6717 = vmatmul.mubr.msk.bf16.vlgmr.msra.gmra.mxu0 %vm317_vm1, %v8502_v29  ;;  %6687 = vmatmul.mubr.msk.bf16.gmra.mxu1 %vm317_vm1, %v7802_v52  ;;  %v4351_v60 = vrot.slane %v4350_v51, 4  ;;  %v7930_v12 = vsel %vm6982_vm6, %v6244_v36, %v5064_v21  ;;  %v4361_v52 = vrot.slane %v4360_v19, 4  ;;  %v5066_v58 = vrot.slane %v5064_v21, 4  ;;  %v1184_v25 = vpop.f32.mrf.mxu1  ;;  %v6137_v51 = vld [vmem:[%s6916_s26 + $0x8c] sm:$0x1] }
 0x117   : > { %6720 = vmatprep.mubr.msk.bf16.mxu0 %vm317_vm1, %v6256_v10  ;;  %6690 = vmatprep.mubr.msk.bf16.mxu1 %vm317_vm1, %v7851_v59  ;;  %v7937_v7 = vsel %vm6982_vm6, %v5059_v42, %v5060_v5  ;;  %v5067_v32 = vrot.slane %v6212_v2, 5  ;;  %v1304_v44 = vadd.f32 %v1181_v11, %v7742_v46  ;;  %v7944_v34 = vadd.f32 %v6526_v24, %v1306_v56  ;;  %v1750_v59 = vpop.f32.mrf.mxu0  ;;  %v6135_v46 = vld [vmem:[%s6916_s26 + $0x84] sm:$0xf]  ;;  %v6213_v5 = vld [vmem:[%s6916_s26 + $0x78] sm:$0xe] }
 0x118   : > { %v4356_v10 = vsel %vm6989_vm7, %v4351_v60, %v4355_v17  ;;  %v6260_v62 = vcombine.low %v7919_v45, %v7937_v7  ;;  %v4366_v53 = vsel %vm6989_vm7, %v4361_v52, %v4365_v49  ;;  %v4368_v18 = vshrl.u32 %v6132_v47, 16  ;;  %v6215_v19 = vld [vmem:[%s6916_s26 + $0x80] sm:$0x1]  ;;  %v1277_v45 = vld [vmem:[#allocation2 + $0x88] sm:$0xff] }
 0x119   : > { %v7951_v8 = vsel %vm6982_vm6, %v5066_v58, %v5067_v32  ;;  %v4371_v3 = vshll.u32 %v6132_v47, 16  ;;  %v7955_v48 = vcombine.low %v4356_v10, %v4366_v53  ;;  %v1307_v43 = vadd.f32 %v6493_v6, %v7756_v26  ;;  %v6527_v38 = vpop.f32.mrf.mxu0  ;;  %v6216_v47 = vld [vmem:[%s6916_s26 + $0x84] sm:$0xe]  ;;  %v6496_v32 = vpop.f32.mrf.mxu1  ;;  %v1278_v10 = vld [vmem:[#allocation2 + $0x90] sm:$0xff] }
 0x11a   : > { %v6261_v41 = vcombine.low %v7930_v12, %v7951_v8  ;;  %v7960_v15 = vadd.f32 %v1750_v59, %v1304_v44  ;;  %v4370_v14 = vrot.slane %v4368_v18, 4  ;;  %v4377_v17 = vshll.u32 %v6133_v33, 16  ;;  %v6221_v12 = vld [vmem:[%s6916_s26 + $0x98] sm:$0x1] }
 0x11b   : > { %v4373_v13 = vrot.slane %v4371_v3, 5  ;;  %v4381_v9 = vshrl.u32 %v6133_v33, 16  ;;  %v1305_v22 = vadd.f32 %v1184_v25, %v7760_v40  ;;  %v4387_v49 = vshll.u32 %v6134_v27, 16 }
 0x11c   : > { %v7964_v57 = vadd.f32 %v6527_v38, %v1307_v43  ;;  %v4392_v26 = vshrl.u32 %v6135_v46, 16  ;;  %v4379_v36 = vrot.slane %v4377_v17, 5  ;;  %v4395_v29 = vshll.u32 %v6135_v46, 16  ;;  %v1197_v46 = vpop.f32.mrf.mxu1  ;;  %v1276_v43 = vld [vmem:[#allocation2 + $0x80] sm:$0xff]  ;;  %v6218_v38 = vld [vmem:[%s6916_s26 + $0x8c] sm:$0x1] }
 0x11d   : > { %v4374_v2 = vor.u32 %v4373_v13, %v4370_v14  ;;  %v4383_v21 = vrot.slane %v4381_v9, 4  ;;  %v4389_v40 = vrot.slane %v4387_v49, 5  ;;  %v4401_v1 = vshll.u32 %v6136_v35, 16  ;;  %v6138_v49 = vld [vmem:[%s6916_s26 + $0x90] sm:$0xf] }
 0x11e   : > { %6721 = vmatmul.mubr.msk.bf16.gmra.mxu0 %vm317_vm1, %v6257_v37  ;;  %6691 = vmatmul.mubr.msk.bf16.gmra.mxu1 %vm317_vm1, %v7867_v20  ;;  %v4394_v28 = vrot.slane %v4392_v26, 4  ;;  %v4405_v39 = vshrl.u32 %v6136_v35, 16  ;;  %v1753_v37 = vpop.f32.mrf.mxu0  ;;  %v4397_v60 = vrot.slane %v4395_v29, 5  ;;  %v4411_v24 = vshll.u32 %v6137_v51, 16 }
 0x11f   : > { %6724 = vmatprep.mubr.msk.bf16.mxu0 %vm317_vm1, %v6258_v4  ;;  %6694 = vmatprep.mubr.msk.bf16.mxu1 %vm317_vm1, %v6163_v0  ;;  %v4375_v42 = vrot.slane %v4374_v2, 4  ;;  %v4384_v56 = vor.u32 %v4383_v21, %v4379_v36  ;;  %v4403_v20 = vrot.slane %v4401_v1, 5  ;;  %v7982_v11 = vadd.f32 %v1753_v37, %v1305_v22  ;;  %v1279_v2 = vld [vmem:[#allocation2 + $0x98] sm:$0xff] }
 0x120   : > { %v4407_v52 = vrot.slane %v4405_v39, 4  ;;  %v6245_v31 = vrot.slane %v6213_v5, 9  ;;  %v4398_v44 = vor.u32 %v4397_v60, %v4394_v28  ;;  %v4413_v0 = vrot.slane %v4411_v24, 5  ;;  %v6530_v27 = vpop.f32.mrf.mxu0  ;;  %v6497_v5 = vpop.f32.mrf.mxu1  ;;  %v6141_v37 = vld [vmem:[%s6916_s26 + $0x9c] sm:$0xf] }
 0x121   : > { %v4380_v4 = vsel %vm6989_vm7, %v4375_v42, %v4379_v36  ;;  %v4385_v58 = vrot.slane %v4384_v56, 4  ;;  %v1310_v59 = vadd.f32 %v6496_v32, %v1278_v10  ;;  %v5071_v53 = vrot.slane %v6214_v63, 5  ;;  %v6139_v63 = vld [vmem:[%s6916_s26 + $0x94] sm:$0xf]  ;;  %v6142_v24 = vld [vmem:[%s6916_s26 + $0xa0] sm:$0xf] }
 0x122   : > { %v4408_v33 = vor.u32 %v4407_v52, %v4403_v20  ;;  %v5074_v6 = vrot.slane %v6215_v19, 5  ;;  %v4399_v3 = vrot.slane %v4398_v44, 4  ;;  %v6246_v25 = vrot.slane %v6216_v47, 9  ;;  %v1766_v22 = vpop.f32.mrf.mxu0  ;;  %v1200_v1 = vpop.f32.mrf.mxu1  ;;  %v6143_v32 = vld [vmem:[%s6916_s26 + $0xa4] sm:$0x1] }
 0x123   : > { %v4390_v18 = vsel %vm6989_vm7, %v4385_v58, %v4389_v40  ;;  %v5078_v14 = vrot.slane %v6217_v50, 5  ;;  %v1308_v9 = vadd.f32 %v1276_v43, %v1197_v46  ;;  %v5072_v35 = vsel %vm6982_vm6, %v6245_v31, %v5071_v53  ;;  %v6219_v46 = vld [vmem:[%s6916_s26 + $0x90] sm:$0xe] }
 0x124   : > { %v6165_v13 = vcombine.low %v4380_v4, %v4390_v18  ;;  %v4409_v17 = vrot.slane %v4408_v33, 4  ;;  %v4404_v51 = vsel %vm6989_vm7, %v4399_v3, %v4403_v20  ;;  %v5073_v26 = vrot.slane %v5071_v53, 4  ;;  %v6531_v40 = vpop.f32.mrf.mxu0 }
 0x125   : > { %v7999_v36 = vadd.f32 %v6530_v27, %v1310_v59  ;;  %v8003_v21 = vsel %vm6982_vm6, %v6246_v25, %v5078_v14  ;;  %v1311_v16 = vadd.f32 %v6497_v5, %v1279_v2  ;;  %v5081_v29 = vrot.slane %v6218_v38, 5  ;;  %v6500_v38 = vpop.f32.mrf.mxu1  ;;  %v1282_v25 = vld [vmem:[#allocation2 + $0xb0] sm:$0xff] }
 0x126   : > { %6725 = vmatmul.mubr.msk.bf16.gmra.mxu0 %vm317_vm1, %v6259_v23  ;;  %6695 = vmatmul.mubr.msk.bf16.gmra.mxu1 %vm317_vm1, %v7955_v48  ;;  %v4414_v30 = vsel %vm6989_vm7, %v4409_v17, %v4413_v0  ;;  %v5080_v23 = vrot.slane %v5078_v14, 4  ;;  %v5075_v48 = vsel %vm6982_vm6, %v5073_v26, %v5074_v6  ;;  %v8017_v7 = vadd.f32 %v1766_v22, %v1308_v9  ;;  %v1769_v44 = vpop.f32.mrf.mxu0  ;;  %v6220_v9 = vld [vmem:[%s6916_s26 + $0x94] sm:$0xf] }
 0x127   : > { %6728 = vmatprep.mubr.msk.bf16.mxu0 %vm317_vm1, %v6260_v62  ;;  %6698 = vmatprep.mubr.msk.bf16.mxu1 %vm317_vm1, %v6165_v13  ;;  %v6166_v28 = vcombine.low %v4404_v51, %v4414_v30  ;;  %v6140_v62 = vld [vmem:[%s6916_s26 + $0x98] sm:$0x1]  ;;  %v4416_v39 = vshrl.u32 %v6138_v49, 16  ;;  %v6262_v19 = vcombine.low %v5072_v35, %v5075_v48  ;;  %v1309_v56 = vadd.f32 %v1277_v45, %v1200_v1  ;;  %v1213_v2 = vpop.f32.mrf.mxu1  ;;  %v1280_v30 = vld [vmem:[#allocation2 + $0xa0] sm:$0xff] }
 0x128   : > { %v8023_v42 = vsel %vm6982_vm6, %v5080_v23, %v5081_v29  ;;  %v4419_v60 = vshll.u32 %v6138_v49, 16  ;;  %v4425_v52 = vshll.u32 %v6139_v63, 16  ;;  %v4429_v31 = vshrl.u32 %v6139_v63, 16  ;;  %v6534_v8 = vpop.f32.mrf.mxu0  ;;  %v6223_v48 = vld [vmem:[%s6916_s26 + $0xa0] sm:$0xf] }
 0x129   : > { %v6263_v47 = vcombine.low %v8003_v21, %v8023_v42  ;;  %v4418_v20 = vrot.slane %v4416_v39, 4  ;;  %v4435_v4 = vshll.u32 %v6140_v62, 16  ;;  %v8028_v58 = vadd.f32 %v6531_v40, %v1311_v16 }
 0x12a   : > { %v4421_v50 = vrot.slane %v4419_v60, 5  ;;  %v4440_v10 = vshrl.u32 %v6141_v37, 16  ;;  %v4427_v0 = vrot.slane %v4425_v52, 5  ;;  %v4431_v59 = vrot.slane %v4429_v31, 4  ;;  %v1782_v1 = vpop.f32.mrf.mxu0  ;;  %v1283_v31 = vld [vmem:[#allocation2 + $0xb8] sm:$0xff] }
 0x12b   : > { %v4443_v33 = vshll.u32 %v6141_v37, 16  ;;  %v4449_v53 = vshll.u32 %v6142_v24, 16  ;;  %v4437_v27 = vrot.slane %v4435_v4, 5  ;;  %v4453_v3 = vshrl.u32 %v6142_v24, 16  ;;  %v6501_v37 = vpop.f32.mrf.mxu1 }
 0x12c   : > { %v4422_v6 = vor.u32 %v4421_v50, %v4418_v20  ;;  %v4442_v18 = vrot.slane %v4440_v10, 4  ;;  %v4432_v43 = vor.u32 %v4431_v59, %v4427_v0  ;;  %v4459_v17 = vshll.u32 %v6143_v32, 16  ;;  %v1281_v50 = vld [vmem:[#allocation2 + $0xa8] sm:$0xff]  ;;  %v6535_v4 = vpop.f32.mrf.mxu0 }
 0x12d   : > { %v4445_v14 = vrot.slane %v4443_v33, 5  ;;  %v4451_v13 = vrot.slane %v4449_v53, 5  ;;  %v1314_v22 = vadd.f32 %v6500_v38, %v1282_v25  ;;  %v4455_v49 = vrot.slane %v4453_v3, 4  ;;  %v1216_v59 = vpop.f32.mrf.mxu1  ;;  %v6144_v33 = vld [vmem:[%s6916_s26 + $0xa8] sm:$0xf] }
 0x12e   : > { %6729 = vmatmul.mubr.msk.bf16.gmra.mxu0 %vm317_vm1, %v6261_v41  ;;  %6699 = vmatmul.mubr.msk.bf16.gmra.mxu1 %vm317_vm1, %v6166_v28  ;;  %v4423_v35 = vrot.slane %v4422_v6, 4  ;;  %v8039_v51 = vadd.f32 %v1769_v44, %v1309_v56  ;;  %v4433_v41 = vrot.slane %v4432_v43, 4  ;;  %v4461_v5 = vrot.slane %v4459_v17, 5  ;;  %v6222_v28 = vld [vmem:[%s6916_s26 + $0x9c] sm:$0xe] }
 0x12f   : > { %6732 = vmatprep.mubr.msk.bf16.mxu0 %vm317_vm1, %v6262_v19  ;;  %v4446_v26 = vor.u32 %v4445_v14, %v4442_v18  ;;  %v6247_v16 = vrot.slane %v6219_v46, 9  ;;  %v4456_v29 = vor.u32 %v4455_v49, %v4451_v13  ;;  %v1312_v63 = vadd.f32 %v1280_v30, %v1213_v2  ;;  %v6224_v56 = vld [vmem:[%s6916_s26 + $0xa4] sm:$0x1]  ;;  %v6145_v53 = vld [vmem:[%s6916_s26 + $0xac] sm:$0xf]  ;;  %v1785_v49 = vpop.f32.mrf.mxu0 }
 0x130   : > { %v4428_v23 = vsel %vm6989_vm7, %v4423_v35, %v4427_v0  ;;  %v5085_v40 = vrot.slane %v6220_v9, 5  ;;  %v4438_v45 = vsel %vm6989_vm7, %v4433_v41, %v4437_v27  ;;  %v5088_v39 = vrot.slane %v6221_v12, 5  ;;  %v6146_v46 = vld [vmem:[%s6916_s26 + $0xb0] sm:$0x1]  ;;  %v6149_v30 = vld [vmem:[%s6916_s26 + $0xbc] sm:$0x1] }
 0x131   : > { %v4447_v62 = vrot.slane %v4446_v26, 4  ;;  %v8048_v19 = vadd.f32 %v6534_v8, %v1314_v22  ;;  %v6167_v60 = vcombine.low %v4428_v23, %v4438_v45  ;;  %v4457_v24 = vrot.slane %v4456_v29, 4  ;;  %v6147_v22 = vld [vmem:[%s6916_s26 + $0xb4] sm:$0xf]  ;;  %v6148_v8 = vld [vmem:[%s6916_s26 + $0xb8] sm:$0xf]  ;;  %v6504_v29 = vpop.f32.mrf.mxu1 }
 0x132   : > { %v5086_v20 = vsel %vm6982_vm6, %v6247_v16, %v5085_v40  ;;  %v5087_v52 = vrot.slane %v5085_v40, 4  ;;  %v1315_v10 = vadd.f32 %v6501_v37, %v1283_v31  ;;  %v6248_v44 = vrot.slane %v6222_v28, 9  ;;  %v6538_v37 = vpop.f32.mrf.mxu0  ;;  %v1284_v31 = vld [vmem:[#allocation2 + $0xc0] sm:$0xff] }
 0x133   : > { %v4452_v32 = vsel %vm6989_vm7, %v4447_v62, %v4451_v13  ;;  %v5092_v0 = vrot.slane %v6223_v48, 5  ;;  %6702 = vmatprep.mubr.msk.bf16.mxu1 %vm317_vm1, %v6167_v60  ;;  %v4462_v6 = vsel %vm6989_vm7, %v4457_v24, %v4461_v5  ;;  %v5095_v18 = vrot.slane %v6224_v56, 5 }
 0x134   : > { %v5089_v27 = vsel %vm6982_vm6, %v5087_v52, %v5088_v39  ;;  %v1313_v3 = vadd.f32 %v1281_v50, %v1216_v59  ;;  %v6168_v43 = vcombine.low %v4452_v32, %v4462_v6  ;;  %v8069_v13 = vadd.f32 %v1782_v1, %v1312_v63  ;;  %v1286_v63 = vld [vmem:[#allocation2 + $0xd0] sm:$0xff]  ;;  %v6225_v39 = vld [vmem:[%s6916_s26 + $0xa8] sm:$0xe]  ;;  %v1229_v52 = vpop.f32.mrf.mxu1  ;;  %v6226_v50 = vld [vmem:[%s6916_s26 + $0xac] sm:$0xf]  ;;  %v1798_v59 = vpop.f32.mrf.mxu0 }
 0x135   : > { %v6264_v38 = vcombine.low %v5086_v20, %v5089_v27  ;;  %v5093_v25 = vsel %vm6982_vm6, %v6248_v44, %v5092_v0  ;;  %v5094_v14 = vrot.slane %v5092_v0, 4  ;;  %v4464_v17 = vshrl.u32 %v6144_v33, 16  ;;  %v6227_v0 = vld [vmem:[%s6916_s26 + $0xb0] sm:$0x1] }
 0x136   : > { %6733 = vmatmul.mubr.msk.bf16.gmra.mxu0 %vm317_vm1, %v6263_v47  ;;  %v4467_v9 = vshll.u32 %v6144_v33, 16  ;;  %v4473_v35 = vshll.u32 %v6145_v53, 16  ;;  %6703 = vmatmul.mubr.msk.bf16.gmra.mxu1 %vm317_vm1, %v6168_v43  ;;  %v4477_v42 = vshrl.u32 %v6145_v53, 16  ;;  %v4483_v47 = vshll.u32 %v6146_v46, 16  ;;  %v1287_v46 = vld [vmem:[#allocation2 + $0xd8] sm:$0xff] }
 0x137   : > { %6736 = vmatprep.mubr.msk.bf16.mxu0 %vm317_vm1, %v6264_v38  ;;  %v5096_v21 = vsel %vm6982_vm6, %v5094_v14, %v5095_v18  ;;  %v8076_v12 = vadd.f32 %v6535_v4, %v1315_v10  ;;  %v4466_v26 = vrot.slane %v4464_v17, 4  ;;  %v4488_v40 = vshrl.u32 %v6147_v22, 16  ;;  %v6505_v18 = vpop.f32.mrf.mxu1  ;;  %v6228_v17 = vld [vmem:[%s6916_s26 + $0xb4] sm:$0xe] }
 0x138   : > { %v6265_v41 = vcombine.low %v5093_v25, %v5096_v21  ;;  %v4469_v5 = vrot.slane %v4467_v9, 5  ;;  %v4475_v2 = vrot.slane %v4473_v35, 5  ;;  %v4479_v16 = vrot.slane %v4477_v42, 4  ;;  %v6229_v9 = vld [vmem:[%s6916_s26 + $0xb8] sm:$0xf]  ;;  %v6539_v35 = vpop.f32.mrf.mxu0 }
 0x139   : > { %v4485_v23 = vrot.slane %v4483_v47, 5  ;;  %v4491_v28 = vshll.u32 %v6147_v22, 16  ;;  %v1318_v1 = vadd.f32 %v6504_v29, %v1286_v63  ;;  %v4497_v45 = vshll.u32 %v6148_v8, 16  ;;  %v1232_v47 = vpop.f32.mrf.mxu1  ;;  %v6150_v63 = vld [vmem:[%s6916_s26 + $0xc0] sm:$0xf] }
 0x13a   : > { %v4470_v48 = vor.u32 %v4469_v5, %v4466_v26  ;;  %v4501_v62 = vshrl.u32 %v6148_v8, 16  ;;  %v4480_v56 = vor.u32 %v4479_v16, %v4475_v2  ;;  %v4490_v60 = vrot.slane %v4488_v40, 4  ;;  %v6151_v40 = vld [vmem:[%s6916_s26 + $0xc4] sm:$0xf] }
 0x13b   : > { %v4493_v24 = vrot.slane %v4491_v28, 5  ;;  %v4507_v20 = vshll.u32 %v6149_v30, 16  ;;  %v4499_v32 = vrot.slane %v4497_v45, 5  ;;  %v1316_v44 = vadd.f32 %v1284_v31, %v1229_v52 }
 0x13c   : > { %v4471_v4 = vrot.slane %v4470_v48, 4  ;;  %v4503_v10 = vrot.slane %v4501_v62, 4  ;;  %v4481_v33 = vrot.slane %v4480_v56, 4  ;;  %v8084_v27 = vadd.f32 %v1785_v49, %v1313_v3  ;;  %v6230_v49 = vld [vmem:[%s6916_s26 + $0xbc] sm:$0x1]  ;;  %v1801_v56 = vpop.f32.mrf.mxu0 }
 0x13d   : > { %v4494_v53 = vor.u32 %v4493_v24, %v4490_v60  ;;  %v4509_v6 = vrot.slane %v4507_v20, 5  ;;  %v6249_v25 = vrot.slane %v6225_v39, 9  ;;  %v5099_v14 = vrot.slane %v6226_v50, 5  ;;  %v6152_v39 = vld [vmem:[%s6916_s26 + $0xc8] sm:$0x1] }
 0x13e   : > { %6737 = vmatmul.mubr.msk.bf16.gmra.mxu0 %vm317_vm1, %v6265_v41  ;;  %v4476_v43 = vsel %vm6989_vm7, %v4471_v4, %v4475_v2  ;;  %v4504_v38 = vor.u32 %v4503_v10, %v4499_v32  ;;  %v4486_v22 = vsel %vm6989_vm7, %v4481_v33, %v4485_v23  ;;  %v5102_v42 = vrot.slane %v6227_v0, 5  ;;  %v1285_v2 = vld [vmem:[#allocation2 + $0xc8] sm:$0xff]  ;;  %v6508_v33 = vpop.f32.mrf.mxu1 }
 0x13f   : > { %v4495_v21 = vrot.slane %v4494_v53, 4  ;;  %v1319_v3 = vadd.f32 %v6505_v18, %v1287_v46  ;;  %v6169_v8 = vcombine.low %v4476_v43, %v4486_v22  ;;  %v5100_v26 = vsel %vm6982_vm6, %v6249_v25, %v5099_v14  ;;  %v6153_v4 = vld [vmem:[%s6916_s26 + $0xcc] sm:$0xf]  ;;  %v1290_v43 = vld [vmem:[#allocation2 + $0xf0] sm:$0xff]  ;;  %v6542_v25 = vpop.f32.mrf.mxu0 }
 0x140   : > { %v4505_v41 = vrot.slane %v4504_v38, 4  ;;  %v5101_v5 = vrot.slane %v5099_v14, 4  ;;  %v8097_v16 = vadd.f32 %v6538_v37, %v1318_v1  ;;  %v6250_v23 = vrot.slane %v6228_v17, 9  ;;  %v6155_v38 = vld [vmem:[%s6916_s26 + $0xd4] sm:$0x1] }
 0x141   : > { %v4500_v30 = vsel %vm6989_vm7, %v4495_v21, %v4499_v32  ;;  %v5106_v29 = vrot.slane %v6229_v9, 5  ;;  %6706 = vmatprep.mubr.msk.bf16.mxu1 %vm317_vm1, %v6169_v8  ;;  %v5109_v45 = vrot.slane %v6230_v49, 5  ;;  %v1317_v62 = vadd.f32 %v1285_v2, %v1232_v47  ;;  %v1245_v21 = vpop.f32.mrf.mxu1  ;;  %v1288_v47 = vld [vmem:[#allocation2 + $0xe0] sm:$0xff] }
 0x142   : > { %v4510_v28 = vsel %vm6989_vm7, %v4505_v41, %v4509_v6  ;;  %v5103_v48 = vsel %vm6982_vm6, %v5101_v5, %v5102_v42  ;;  %v8109_v20 = vadd.f32 %v1798_v59, %v1316_v44  ;;  %v4512_v52 = vshrl.u32 %v6150_v63, 16  ;;  %v6154_v6 = vld [vmem:[%s6916_s26 + $0xd0] sm:$0xf]  ;;  %v6231_v8 = vld [vmem:[%s6916_s26 + $0xc0] sm:$0xe]  ;;  %v1814_v41 = vpop.f32.mrf.mxu0 }
 0x143   : > { %v6170_v60 = vcombine.low %v4500_v30, %v4510_v28  ;;  %v6266_v1 = vcombine.low %v5100_v26, %v5103_v48  ;;  %v5107_v37 = vsel %vm6982_vm6, %v6250_v23, %v5106_v29  ;;  %v5108_v24 = vrot.slane %v5106_v29, 4  ;;  %v6232_v23 = vld [vmem:[%s6916_s26 + $0xc4] sm:$0xf]  ;;  %v6509_v29 = vpop.f32.mrf.mxu1 }
 0x144   : > { %v4515_v31 = vshll.u32 %v6150_v63, 16  ;;  %v4521_v50 = vshll.u32 %v6151_v40, 16  ;;  %v4525_v10 = vshrl.u32 %v6151_v40, 16  ;;  %v4531_v0 = vshll.u32 %v6152_v39, 16  ;;  %v6543_v39 = vpop.f32.mrf.mxu0 }
 0x145   : > { %6707 = vmatmul.mubr.msk.bf16.gmra.mxu1 %vm317_vm1, %v6170_v60  ;;  %6740 = vmatprep.mubr.msk.bf16.mxu0 %vm317_vm1, %v6266_v1  ;;  %v5110_v32 = vsel %vm6982_vm6, %v5108_v24, %v5109_v45  ;;  %v8116_v53 = vadd.f32 %v6539_v35, %v1319_v3  ;;  %v4514_v59 = vrot.slane %v4512_v52, 4  ;;  %v1322_v9 = vadd.f32 %v6508_v33, %v1290_v43  ;;  %v6233_v45 = vld [vmem:[%s6916_s26 + $0xc8] sm:$0x1]  ;;  %v6234_v52 = vld [vmem:[%s6916_s26 + $0xcc] sm:$0xe] }
 0x146   : > { %v6267_v44 = vcombine.low %v5107_v37, %v5110_v32  ;;  %v4517_v18 = vrot.slane %v4515_v31, 5  ;;  %v4523_v46 = vrot.slane %v4521_v50, 5  ;;  %v4527_v14 = vrot.slane %v4525_v10, 4  ;;  %v1248_v31 = vpop.f32.mrf.mxu1  ;;  %v6235_v33 = vld [vmem:[%s6916_s26 + $0xd0] sm:$0xf] }
 0x147   : > { %v4533_v17 = vrot.slane %v4531_v0, 5  ;;  %v4536_v22 = vshrl.u32 %v6153_v4, 16  ;;  %v4539_v35 = vshll.u32 %v6153_v4, 16  ;;  %v4545_v3 = vshll.u32 %v6154_v6, 16  ;;  %v1291_v0 = vld [vmem:[#allocation2 + $0xf8] sm:$0xff] }
 0x148   : > { %6741 = vmatmul.mubr.msk.bf16.gmra.mxu0 %vm317_vm1, %v6267_v44  ;;  %v4518_v42 = vor.u32 %v4517_v18, %v4514_v59  ;;  %v4549_v49 = vshrl.u32 %v6154_v6, 16  ;;  %v4528_v26 = vor.u32 %v4527_v14, %v4523_v46  ;;  %v4555_v2 = vshll.u32 %v6155_v38, 16  ;;  %v6236_v6 = vld [vmem:[%s6916_s26 + $0xd4] sm:$0x1] }
 0x149   : > { %v4538_v5 = vrot.slane %v4536_v22, 4  ;;  %v1320_v30 = vadd.f32 %v1288_v47, %v1245_v21  ;;  %v4541_v40 = vrot.slane %v4539_v35, 5  ;;  %v4547_v28 = vrot.slane %v4545_v3, 5 }
 0x14a   : > { %v4519_v63 = vrot.slane %v4518_v42, 4  ;;  %v4551_v48 = vrot.slane %v4549_v49, 4  ;;  %v4529_v60 = vrot.slane %v4528_v26, 4  ;;  %v4557_v1 = vrot.slane %v4555_v2, 5  ;;  %v1289_v49 = vld [vmem:[#allocation2 + $0xe8] sm:$0xff] }
 0x14b   : > { %v8124_v37 = vadd.f32 %v1801_v56, %v1317_v62  ;;  %v6251_v24 = vrot.slane %v6231_v8, 9  ;;  %v4542_v4 = vor.u32 %v4541_v40, %v4538_v5  ;;  %v5113_v10 = vrot.slane %v6232_v23, 5  ;;  %v6548_v62 = vpop.f32.mrf.mxu1  ;;  %v1817_v56 = vpop.f32.mrf.mxu0 }
 0x14c   : > { %v4524_v50 = vsel %vm6989_vm7, %v4519_v63, %v4523_v46  ;;  %v4552_v32 = vor.u32 %v4551_v48, %v4547_v28  ;;  %v4534_v44 = vsel %vm6989_vm7, %v4529_v60, %v4533_v17  ;;  %v5116_v59 = vrot.slane %v6233_v45, 5  ;;  %v2252_v60 = vld [vmem:[#allocation2] sm:$0xff] }
 0x14d   : > { %v1323_v18 = vadd.f32 %v6509_v29, %v1291_v0  ;;  %v8133_v43 = vadd.f32 %v6542_v25, %v1322_v9  ;;  %v6171_v38 = vcombine.low %v4524_v50, %v4534_v44  ;;  %v4543_v14 = vrot.slane %v4542_v4, 4  ;;  %v2125_v47 = vpop.f32.mrf.mxu1  ;;  %v2254_v29 = vld [vmem:[#allocation2 + $0x10] sm:$0xff]  ;;  %v6582_v40 = vpop.f32.mrf.mxu0 }
 0x14e   : > { %v4553_v22 = vrot.slane %v4552_v32, 4  ;;  %v5114_v46 = vsel %vm6982_vm6, %v6251_v24, %v5113_v10  ;;  %v5115_v21 = vrot.slane %v5113_v10, 4  ;;  %v6252_v42 = vrot.slane %v6234_v52, 9 }
 0x14f   : > { %v5120_v35 = vrot.slane %v6235_v33, 5  ;;  %v5123_v3 = vrot.slane %v6236_v6, 5  ;;  %6710 = vmatprep.mubr.msk.bf16.mxu1 %vm317_vm1, %v6171_v38  ;;  %v4548_v25 = vsel %vm6989_vm7, %v4543_v14, %v4547_v28  ;;  %v1321_v9 = vadd.f32 %v1289_v49, %v1248_v31  ;;  %v6549_v63 = vpop.f32.mrf.mxu1  ;;  %v2253_v31 = vld [vmem:[#allocation2 + $0x8] sm:$0xff]  ;;  %v2915_v50 = vpop.f32.mrf.mxu0  ;;  %v2258_v33 = vld [vmem:[#allocation2 + $0x30] sm:$0xff] }
 0x150   : > { %v4558_v17 = vsel %vm6989_vm7, %v4553_v22, %v4557_v1  ;;  %v8142_v8 = vadd.f32 %v1814_v41, %v1320_v30  ;;  %v5117_v5 = vsel %vm6982_vm6, %v5115_v21, %v5116_v59  ;;  %v8148_v45 = vadd.f32 %v6543_v39, %v1323_v18  ;;  %v2255_v41 = vld [vmem:[#allocation2 + $0x18] sm:$0xff]  ;;  %v2256_v18 = vld [vmem:[#allocation2 + $0x20] sm:$0xff] }
 0x151   : > { %v6172_v26 = vcombine.low %v4548_v25, %v4558_v17  ;;  %v5121_v2 = vsel %vm6982_vm6, %v6252_v42, %v5120_v35  ;;  %v5122_v23 = vrot.slane %v5120_v35, 4  ;;  %v6268_v48 = vcombine.low %v5114_v46, %v5117_v5  ;;  %v2128_v52 = vpop.f32.mrf.mxu1  ;;  %v6583_v6 = vpop.f32.mrf.mxu0  ;;  %v2259_v22 = vld [vmem:[#allocation2 + $0x38] sm:$0xff]  ;;  %v2262_v5 = vld [vmem:[#allocation2 + $0x50] sm:$0xff] }
 0x152   : > { %v2286_v28 = vadd.f32 %v6548_v62, %v2254_v29  ;;  %v8150_v55 = vadd.f32 %v1817_v56, %v1321_v9  ;;  %v2284_v1 = vadd.f32 %v2252_v60, %v2125_v47  ;;  %v2287_v24 = vadd.f32 %v6549_v63, %v2255_v41  ;;  %v2263_v60 = vld [vmem:[#allocation2 + $0x58] sm:$0xff] }
 0x153   : > { %6711 = vmatmul.mubr.msk.bf16.gmra.mxu1 %vm317_vm1, %v6172_v26  ;;  %v5124_v30 = vsel %vm6982_vm6, %v5122_v23, %v5123_v3  ;;  %6744 = vmatprep.mubr.msk.bf16.mxu0 %vm317_vm1, %v6268_v48  ;;  %v2285_v32 = vadd.f32 %v2253_v31, %v2128_v52  ;;  %v6552_v0 = vpop.f32.mrf.mxu1  ;;  %v2918_v62 = vpop.f32.mrf.mxu0  ;;  %v2257_v3 = vld [vmem:[#allocation2 + $0x28] sm:$0xff] }
 0x154   : > { %v6269_v4 = vcombine.low %v5121_v2, %v5124_v30  ;;  %v8156_v39 = vadd.f32 %v6582_v40, %v2286_v28  ;;  %v8158_v10 = vadd.f32 %v2915_v50, %v2284_v1  ;;  %v2290_v54 = vadd.f32 %v6552_v0, %v2258_v33  ;;  %v2260_v40 = vld [vmem:[#allocation2 + $0x40] sm:$0xff] }
 0x155   : > { %v8161_v44 = vadd.f32 %v6583_v6, %v2287_v24  ;;  %v2141_v59 = vpop.f32.mrf.mxu1  ;;  %v8163_v38 = vadd.f32 %v2918_v62, %v2285_v32  ;;  %v6586_v46 = vpop.f32.mrf.mxu0 }
 0x156   : > { %6745 = vmatmul.mubr.msk.bf16.gmra.mxu0 %vm317_vm1, %v6269_v4  ;;  %v2288_v56 = vadd.f32 %v2256_v18, %v2141_v59  ;;  %v8165_v42 = vadd.f32 %v6586_v46, %v2290_v54 }
 0x157   : > { %v6553_v14 = vpop.f32.mrf.mxu1  ;;  %v2931_v49 = vpop.f32.mrf.mxu0 }
 0x158   : > { %v2291_v21 = vadd.f32 %v6553_v14, %v2259_v22  ;;  %v8167_v25 = vadd.f32 %v2931_v49, %v2288_v56 }
 0x159   : > { %v2144_v35 = vpop.f32.mrf.mxu1  ;;  %v6587_v9 = vpop.f32.mrf.mxu0 }
 0x15a   : > { %v2289_v47 = vadd.f32 %v2257_v3, %v2144_v35  ;;  %v8169_v26 = vadd.f32 %v6587_v9, %v2291_v21 }
 0x15b   : > { %v6556_v17 = vpop.f32.mrf.mxu1  ;;  %v2934_v23 = vpop.f32.mrf.mxu0 }
 0x15c   : > { %v2294_v29 = vadd.f32 %v6556_v17, %v2262_v5  ;;  %v8171_v63 = vadd.f32 %v2934_v23, %v2289_v47 }
 0x15d   : > { %v2157_v2 = vpop.f32.mrf.mxu1  ;;  %v6590_v41 = vpop.f32.mrf.mxu0 }
 0x15e   : > { %v2292_v28 = vadd.f32 %v2260_v40, %v2157_v2  ;;  %v8173_v24 = vadd.f32 %v6590_v41, %v2294_v29 }
 0x15f   : > { %v6557_v48 = vpop.f32.mrf.mxu1  ;;  %v2947_v31 = vpop.f32.mrf.mxu0 }
 0x160   : > { %v2295_v1 = vadd.f32 %v6557_v48, %v2263_v60  ;;  %v8176_v4 = vadd.f32 %v2947_v31, %v2292_v28 }
 0x161   : > { %v2160_v30 = vpop.f32.mrf.mxu1  ;;  %v6591_v0 = vpop.f32.mrf.mxu0 }
 0x162   : > { %v2293_v52 = vadd.f32 %v2160_v30, %v7908_v61  ;;  %v8179_v6 = vadd.f32 %v6591_v0, %v2295_v1 }
 0x163   : > { %v6560_v50 = vpop.f32.mrf.mxu1  ;;  %v2950_v59 = vpop.f32.mrf.mxu0 }
 0x164   : > { %v2298_v32 = vadd.f32 %v6560_v50, %v7944_v34  ;;  %v8182_v62 = vadd.f32 %v2950_v59, %v2293_v52 }
 0x165   : > { %v2173_v33 = vpop.f32.mrf.mxu1  ;;  %v6594_v14 = vpop.f32.mrf.mxu0 }
 0x166   : > { %v2296_v54 = vadd.f32 %v2173_v33, %v7960_v15  ;;  %v8185_v22 = vadd.f32 %v6594_v14, %v2298_v32 }
 0x167   : > { %v6561_v18 = vpop.f32.mrf.mxu1  ;;  %v2963_v21 = vpop.f32.mrf.mxu0 }
 0x168   : > { %v2299_v56 = vadd.f32 %v6561_v18, %v7964_v57  ;;  %v8188_v35 = vadd.f32 %v2963_v21, %v2296_v54 }
 0x169   : > { %v2176_v61 = vpop.f32.mrf.mxu1  ;;  %v6595_v49 = vpop.f32.mrf.mxu0 }
 0x16a   : > { %v2297_v46 = vadd.f32 %v2176_v61, %v7982_v11  ;;  %v8191_v47 = vadd.f32 %v6595_v49, %v2299_v56 }
 0x16b   : > { %v6564_v34 = vpop.f32.mrf.mxu1  ;;  %v2966_v9 = vpop.f32.mrf.mxu0 }
 0x16c   : > { %v2302_v3 = vadd.f32 %v6564_v34, %v7999_v36  ;;  %v8194_v5 = vadd.f32 %v2966_v9, %v2297_v46 }
 0x16d   : > { %v2189_v15 = vpop.f32.mrf.mxu1  ;;  %v6598_v23 = vpop.f32.mrf.mxu0 }
 0x16e   : > { %v2300_v17 = vadd.f32 %v2189_v15, %v8017_v7  ;;  %v8197_v29 = vadd.f32 %v6598_v23, %v2302_v3 }
 0x16f   : > { %v6565_v57 = vpop.f32.mrf.mxu1  ;;  %v2979_v48 = vpop.f32.mrf.mxu0 }
 0x170   : > { %v2303_v2 = vadd.f32 %v6565_v57, %v8028_v58  ;;  %8503 = vst [vmem:[#allocation3_spill] sm:$0xff] %v8197_v29  ;;  %v8200_v28 = vadd.f32 %v2979_v48, %v2300_v17 }
 0x171   : > { %v2192_v11 = vpop.f32.mrf.mxu1  ;;  %v6599_v41 = vpop.f32.mrf.mxu0 }
 0x172   : > { %v2301_v40 = vadd.f32 %v2192_v11, %v8039_v51  ;;  %8504 = vst [vmem:[#allocation4_spill] sm:$0xff] %v8200_v28  ;;  %v8203_v30 = vadd.f32 %v6599_v41, %v2303_v2 }
 0x173   : > { %v6568_v36 = vpop.f32.mrf.mxu1  ;;  %v2982_v52 = vpop.f32.mrf.mxu0 }
 0x174   : > { %v2306_v60 = vadd.f32 %v6568_v36, %v8048_v19  ;;  %8505 = vst [vmem:[#allocation5_spill] sm:$0xff] %v8203_v30  ;;  %v8206_v31 = vadd.f32 %v2982_v52, %v2301_v40 }
 0x175   : > { %v2205_v7 = vpop.f32.mrf.mxu1  ;;  %v6602_v32 = vpop.f32.mrf.mxu0 }
 0x176   : > { %v2304_v1 = vadd.f32 %v2205_v7, %v8069_v13  ;;  %8506 = vst [vmem:[#allocation6_spill] sm:$0xff] %v8206_v31  ;;  %v8209_v0 = vadd.f32 %v6602_v32, %v2306_v60 }
 0x177   : > { %v6569_v58 = vpop.f32.mrf.mxu1  ;;  %v2995_v54 = vpop.f32.mrf.mxu0 }
 0x178   : > { %v2307_v50 = vadd.f32 %v6569_v58, %v8076_v12  ;;  %8507 = vst [vmem:[#allocation7_spill] sm:$0xff] %v8209_v0  ;;  %v8212_v59 = vadd.f32 %v2995_v54, %v2304_v1 }
 0x179   : > { %v2208_v51 = vpop.f32.mrf.mxu1  ;;  %v6603_v56 = vpop.f32.mrf.mxu0 }
 0x17a   : > { %v2305_v33 = vadd.f32 %v2208_v51, %v8084_v27  ;;  %8508 = vst [vmem:[#allocation8_spill] sm:$0xff] %v8212_v59  ;;  %v8215_v14 = vadd.f32 %v6603_v56, %v2307_v50 }
 0x17b   : > { %v6572_v19 = vpop.f32.mrf.mxu1  ;;  %v2998_v46 = vpop.f32.mrf.mxu0 }
 0x17c   : > { %v2310_v18 = vadd.f32 %v6572_v19, %v8097_v16  ;;  %8509 = vst [vmem:[#allocation9_spill] sm:$0xff] %v8215_v14  ;;  %v8218_v21 = vadd.f32 %v2998_v46, %v2305_v33 }
 0x17d   : > { %v2221_v13 = vpop.f32.mrf.mxu1  ;;  %v6606_v49 = vpop.f32.mrf.mxu0 }
 0x17e   : > { %v2308_v61 = vadd.f32 %v2221_v13, %v8109_v20  ;;  %8510 = vst [vmem:[#allocation10_spill] sm:$0xff] %v8218_v21  ;;  %v8222_v17 = vadd.f32 %v6606_v49, %v2310_v18 }
 0x17f   : > { %v6573_v12 = vpop.f32.mrf.mxu1  ;;  %v3011_v9 = vpop.f32.mrf.mxu0 }
 0x180   : > { %v2311_v34 = vadd.f32 %v6573_v12, %v8116_v53  ;;  %8511 = vst [vmem:[#allocation11_spill] sm:$0xff] %v8222_v17  ;;  %v8225_v2 = vadd.f32 %v3011_v9, %v2308_v61 }
 0x181   : > { %v2224_v3 = vpop.f32.mrf.mxu1  ;;  %v6607_v23 = vpop.f32.mrf.mxu0 }
 0x182   : > { %v2309_v27 = vadd.f32 %v2224_v3, %v8124_v37  ;;  %8512 = vst [vmem:[#allocation12_spill] sm:$0xff] %v8225_v2  ;;  %v8228_v40 = vadd.f32 %v6607_v23, %v2311_v34 }
 0x183   : > { %v6576_v15 = vpop.f32.mrf.mxu1  ;;  %v3014_v48 = vpop.f32.mrf.mxu0 }
 0x184   : > { %v2314_v16 = vadd.f32 %v6576_v15, %v8133_v43  ;;  %8513 = vst [vmem:[#allocation13_spill] sm:$0xff] %v8228_v40  ;;  %v8231_v36 = vadd.f32 %v3014_v48, %v2309_v27 }
 0x185   : > { %v2237_v57 = vpop.f32.mrf.mxu1  ;;  %v6610_v41 = vpop.f32.mrf.mxu0 }
 0x186   : > { %v2312_v20 = vadd.f32 %v2237_v57, %v8142_v8  ;;  %8514 = vst [vmem:[#allocation14_spill] sm:$0xff] %v8231_v36  ;;  %v3104_v43 = vadd.f32 %v6610_v41, %v2314_v16 }
 0x187   : > { %v6577_v11 = vpop.f32.mrf.mxu1  ;;  %v3027_v1 = vpop.f32.mrf.mxu0 }
 0x188   : > { %v2315_v53 = vadd.f32 %v6577_v11, %v8148_v45  ;;  %v3102_v52 = vadd.f32 %v3027_v1, %v2312_v20 }
 0x189   : > { %v2240_v37 = vpop.f32.mrf.mxu1  ;;  %v6611_v8 = vpop.f32.mrf.mxu0 }
 0x18a   : > { %v2313_v60 = vadd.f32 %v2240_v37, %v8150_v55  ;;  %v3105_v50 = vadd.f32 %v6611_v8, %v2315_v53 }
 0x18b   : > { %v8234_v7 = vpop.f32.mrf.mxu1  ;;  %v3030_v51 = vpop.f32.mrf.mxu0 }
 0x18c   : > { %v8240_v45 = vadd.f32 %v3030_v51, %v2313_v60 }
 0x18d   : > { %v8236_v58 = vpop.f32.mrf.mxu1  ;;  %v8244_v54 = vpop.f32.mrf.mxu0 }
 0x18f   : > { %v8238_v32 = vpop.f32.mrf.mxu1  ;;  %v8248_v19 = vpop.f32.mrf.mxu0 }
 0x191   : > { %v8242_v33 = vpop.f32.mrf.mxu1  ;;  %v8252_v56 = vpop.f32.mrf.mxu0 }
 0x193   : > { %v8246_v55 = vpop.f32.mrf.mxu1  ;;  %v8256_v61 = vpop.f32.mrf.mxu0 }
 0x195   : > { %v8250_v18 = vpop.f32.mrf.mxu1  ;;  %v8260_v12 = vpop.f32.mrf.mxu0 }
 0x197   : > { %v8254_v13 = vpop.f32.mrf.mxu1  ;;  %v8264_v3 = vpop.f32.mrf.mxu0 }
 0x199   : > { %v8258_v46 = vpop.f32.mrf.mxu1  ;;  %v8268_v49 = vpop.f32.mrf.mxu0 }
 0x19b   : > { %v8262_v34 = vpop.f32.mrf.mxu1  ;;  %v8272_v16 = vpop.f32.mrf.mxu0 }
 0x19d   : > { %v8266_v27 = vpop.f32.mrf.mxu1  ;;  %v8276_v57 = vpop.f32.mrf.mxu0 }
 0x19f   : > { %v8270_v15 = vpop.f32.mrf.mxu1  ;;  %v8280_v23 = vpop.f32.mrf.mxu0 }
 0x1a1   : > { %v8274_v9 = vpop.f32.mrf.mxu1  ;;  %v8284_v53 = vpop.f32.mrf.mxu0 }
 0x1a3   : > { %v8278_v20 = vpop.f32.mrf.mxu1  ;;  %v8288_v37 = vpop.f32.mrf.mxu0 }
 0x1a5   : > { %v8282_v11 = vpop.f32.mrf.mxu1  ;;  %v8292_v41 = vpop.f32.mrf.mxu0 }
 0x1a7   : > { %v8286_v48 = vpop.f32.mrf.mxu1  ;;  %v8296_v8 = vpop.f32.mrf.mxu0 }
 0x1a9   : > { %v8290_v60 = vpop.f32.mrf.mxu1  ;;  %v8300_v36 = vpop.f32.mrf.mxu0 }
 0x1aa   : > { %8517 = vst [vmem:[#allocation17_spill] sm:$0xff] %v8300_v36 }
 0x1ab   : > { %v8294_v1 = vpop.f32.mrf.mxu1  ;;  %v8304_v2 = vpop.f32.mrf.mxu0 }
 0x1ac   : > { %8515 = vst [vmem:[#allocation15_spill] sm:$0xff] %v8294_v1  ;;  %8519 = vst [vmem:[#allocation19_spill] sm:$0xff] %v8304_v2 }
 0x1ad   : > { %v8298_v51 = vpop.f32.mrf.mxu1  ;;  %v8308_v21 = vpop.f32.mrf.mxu0 }
 0x1ae   : > { %8516 = vst [vmem:[#allocation16_spill] sm:$0xff] %v8298_v51  ;;  %8521 = vst [vmem:[#allocation21_spill] sm:$0xff] %v8308_v21 }
 0x1af   : > { %v8302_v40 = vpop.f32.mrf.mxu1  ;;  %v8312_v59 = vpop.f32.mrf.mxu0 }
 0x1b0   : > { %8518 = vst [vmem:[#allocation18_spill] sm:$0xff] %v8302_v40  ;;  %8523 = vst [vmem:[#allocation23_spill] sm:$0xff] %v8312_v59 }
 0x1b1   : > { %v8306_v17 = vpop.f32.mrf.mxu1  ;;  %v8316_v31 = vpop.f32.mrf.mxu0 }
 0x1b2   : > { %8520 = vst [vmem:[#allocation20_spill] sm:$0xff] %v8306_v17  ;;  %8525 = vst [vmem:[#allocation25_spill] sm:$0xff] %v8316_v31 }
 0x1b3   : > { %v8310_v14 = vpop.f32.mrf.mxu1  ;;  %v8320_v51 = vpop.f32.mrf.mxu0 }
 0x1b4   : > { %8522 = vst [vmem:[#allocation22_spill] sm:$0xff] %v8310_v14  ;;  %8527 = vst [vmem:[#allocation27_spill] sm:$0xff] %v8320_v51 }
 0x1b5   : > { %v8314_v0 = vpop.f32.mrf.mxu1 }
 0x1b6   : > { %8524 = vst [vmem:[#allocation24_spill] sm:$0xff] %v8314_v0 }
 0x1b7   : > { %v8318_v30 = vpop.f32.mrf.mxu1 }
 0x1b8   : > { %8526 = vst [vmem:[#allocation26_spill] sm:$0xff] %v8318_v30 }
 0x1b9   : > { %v8322_v28 = vpop.f32.mrf.mxu1  ;;  %v8324_v40 = vpop.f32.mrf.mxu0 }
 0x1ba   : > { %8528 = vst [vmem:[#allocation28_spill] sm:$0xff] %v8322_v28  ;;  %8529 = vst [vmem:[#allocation29_spill] sm:$0xff] %v8324_v40 }
 0x1bb   : > { %v8328_v17 = vpop.f32.mrf.mxu0 }
 0x1bc   : > { %8531 = vst [vmem:[#allocation31_spill] sm:$0xff] %v8328_v17 }
 0x1bd   : > { %v8326_v2 = vpop.f32.mrf.mxu1  ;;  %v8332_v14 = vpop.f32.mrf.mxu0 }
 0x1be   : > { %8530 = vst [vmem:[#allocation30_spill] sm:$0xff] %v8326_v2  ;;  %8533 = vst [vmem:[#allocation33_spill] sm:$0xff] %v8332_v14 }
 0x1bf   : > { %v8330_v21 = vpop.f32.mrf.mxu1  ;;  %v8336_v0 = vpop.f32.mrf.mxu0 }
 0x1c0   : > { %8532 = vst [vmem:[#allocation32_spill] sm:$0xff] %v8330_v21  ;;  %8535 = vst [vmem:[#allocation35_spill] sm:$0xff] %v8336_v0 }
 0x1c1   : > { %v8334_v59 = vpop.f32.mrf.mxu1  ;;  %v8340_v30 = vpop.f32.mrf.mxu0 }
 0x1c2   : > { %8534 = vst [vmem:[#allocation34_spill] sm:$0xff] %v8334_v59  ;;  %8537 = vst [vmem:[#allocation37_spill] sm:$0xff] %v8340_v30  ;;  %v3642_v59 = vadd.f32 %v8234_v7, %v8156_v39  ;;  %v3640_v30 = vadd.f32 %v8236_v58, %v8158_v10  ;;  %v3641_v7 = vadd.f32 %v8242_v33, %v8163_v38 }
 0x1c3   : > { %v8338_v31 = vpop.f32.mrf.mxu1  ;;  %v8342_v28 = vpop.f32.mrf.mxu0  ;;  %v3646_v58 = vadd.f32 %v8246_v55, %v8165_v42  ;;  %v3644_v38 = vadd.f32 %v8250_v18, %v8167_v25  ;;  %v3645_v25 = vadd.f32 %v8258_v46, %v8171_v63  ;;  %v3648_v63 = vadd.f32 %v8266_v27, %v8176_v4 }
 0x1c4   : > { %8536 = vst [vmem:[#allocation36_spill] sm:$0xff] %v8338_v31  ;;  %8538 = vst [vmem:[#allocation38_spill] sm:$0xff] %v8342_v28 }
 0x1c5   : > { %v8344_v2 = vpop.f32.mrf.mxu0  ;;  %v4069_v42 = vadd.f32 %v8260_v12, %v3646_v58  ;;  %v4067_v18 = vadd.f32 %v8264_v3, %v3644_v38  ;;  %v4068_v46 = vadd.f32 %v8272_v16, %v3645_v25  ;;  %v3649_v16 = vadd.f32 %v8274_v9, %v8182_v62 }
 0x1c6   : > { %v6644_v51 = vpop.f32.mrf.mxu1 }
 0x1c7   : > { %v3670_v40 = vadd.f32 %v6644_v51, %v3104_v43  ;;  %v8346_v21 = vpop.f32.mrf.mxu0 }
 0x1c8   : > { %v3593_v36 = vpop.f32.mrf.mxu1 }
 0x1c9   : > { %v3668_v17 = vadd.f32 %v3593_v36, %v3102_v52  ;;  %v6678_v29 = vpop.f32.mrf.mxu0  ;;  %v3643_v36 = vadd.f32 %v8238_v32, %v8161_v44  ;;  %v4065_v52 = vadd.f32 %v8244_v54, %v3642_v59 }
 0x1ca   : > { %v6645_v1 = vpop.f32.mrf.mxu1  ;;  %v8353_v28 = vadd.f32 %v6678_v29, %v3670_v40 }
 0x1cb   : > { %v3671_v14 = vadd.f32 %v6645_v1, %v3105_v50  ;;  %v4016_v51 = vpop.f32.mrf.mxu0  ;;  %v4066_v44 = vadd.f32 %v8252_v56, %v3643_v36 }
 0x1cc   : > { %v3596_v0 = vpop.f32.mrf.mxu1  ;;  %v8358_v50 = vadd.f32 %v4016_v51, %v3668_v17  ;;  %v3647_v51 = vadd.f32 %v8254_v13, %v8169_v26  ;;  %v3650_v26 = vadd.f32 %v8262_v34, %v8173_v24  ;;  %v3651_v24 = vadd.f32 %v8270_v15, %v8179_v6 }
 0x1cd   : > { %v3669_v31 = vadd.f32 %v3596_v0, %v8240_v45  ;;  %v6679_v39 = vpop.f32.mrf.mxu0  ;;  %v4063_v0 = vadd.f32 %v8248_v19, %v3640_v30  ;;  %v4064_v30 = vadd.f32 %v8256_v61, %v3641_v7 }
 0x1ce   : > { %v6684_v43 = vpop.f32.mrf.mxu1  ;;  %v8363_v45 = vadd.f32 %v6679_v39, %v3671_v14  ;;  %v4070_v13 = vadd.f32 %v8268_v49, %v3647_v51  ;;  %v4073_v34 = vadd.f32 %v8276_v57, %v3650_v26 }
 0x1cf   : > { %v4855_v10 = vadd.f32 %v6684_v43, %v4065_v52  ;;  %v4019_v40 = vpop.f32.mrf.mxu0 }
 0x1d0   : > { %v4694_v1 = vpop.f32.mrf.mxu1  ;;  %v8368_v59 = vadd.f32 %v4019_v40, %v3669_v31 }
 0x1d1   : > { %v4853_v17 = vadd.f32 %v4694_v1, %v4063_v0 }
 0x1d2   : > { %v6685_v29 = vpop.f32.mrf.mxu1 }
 0x1d3   : > { %v4856_v14 = vadd.f32 %v6685_v29, %v4066_v44 }
 0x1d4   : > { %v4697_v32 = vpop.f32.mrf.mxu1 }
 0x1d5   : > { %v4854_v31 = vadd.f32 %v4697_v32, %v4064_v30  ;;  %v3654_v30 = vadd.f32 %v8278_v20, %v8185_v22 }
 0x1d6   : > { %v6718_v54 = vpop.f32.mrf.mxu0  ;;  %v6688_v19 = vpop.f32.mrf.mxu1 }
 0x1d7   : > { %v5421_v33 = vadd.f32 %v6718_v54, %v4855_v10  ;;  %v4859_v61 = vadd.f32 %v6688_v19, %v4069_v42  ;;  %v4072_v19 = vadd.f32 %v8288_v37, %v3649_v16 }
 0x1d8   : > { %v5260_v43 = vpop.f32.mrf.mxu0  ;;  %v4710_v56 = vpop.f32.mrf.mxu1 }
 0x1d9   : > { %5453 = vst [vmem:[#allocation2 + $0x10] sm:$0xff] %v5421_v33  ;;  %v5419_v55 = vadd.f32 %v5260_v43, %v4853_v17  ;;  %v4857_v12 = vadd.f32 %v4710_v56, %v4067_v18  ;;  %v4071_v17 = vadd.f32 %v8280_v23, %v3648_v63  ;;  %v3652_v23 = vadd.f32 %v8282_v11, %v8188_v35 }
 0x1da   : > { %v6719_v36 = vpop.f32.mrf.mxu0  ;;  %v6689_v1 = vpop.f32.mrf.mxu1  ;;  %v3655_v56 = vadd.f32 %v8286_v48, %v8191_v47  ;;  %v4077_v11 = vadd.f32 %v8292_v41, %v3654_v30  ;;  %v8541_v41 = vld [vmem:[#allocation15_spill] sm:$0xff] }
 0x1db   : > { %5451 = vst [vmem:[#allocation2] sm:$0xff] %v5419_v55  ;;  %v5422_v52 = vadd.f32 %v6719_v36, %v4856_v14  ;;  %v4860_v3 = vadd.f32 %v6689_v1, %v4070_v13  ;;  %v4074_v14 = vadd.f32 %v8284_v53, %v3651_v24  ;;  %v8411_v36 = vld [vmem:[%s8492_s2] ss:$0 sm:$0xff]  ;;  %v4075_v47 = vadd.f32 %v8296_v8, %v3652_v23 }
 0x1dc   : > { %v5263_v39 = vpop.f32.mrf.mxu0  ;;  %v4713_v0 = vpop.f32.mrf.mxu1 }
 0x1dd   : > { %5454 = vst [vmem:[#allocation2 + $0x18] sm:$0xff] %v5422_v52  ;;  %v5420_v7 = vadd.f32 %v5263_v39, %v4854_v31  ;;  %v4858_v49 = vadd.f32 %v4713_v0, %v4068_v46  ;;  %v3653_v52 = vadd.f32 %v8290_v60, %v8194_v5 }
 0x1de   : > { %v6722_v10 = vpop.f32.mrf.mxu0  ;;  %v6692_v40 = vpop.f32.mrf.mxu1 }
 0x1df   : > { %5452 = vst [vmem:[#allocation2 + $0x8] sm:$0xff] %v5420_v7  ;;  %v5425_v29 = vadd.f32 %v6722_v10, %v4859_v61  ;;  %v4863_v32 = vadd.f32 %v6692_v40, %v4073_v34  ;;  %v8542_v10 = vld [vmem:[#allocation17_spill] sm:$0xff]  ;;  %v8543_v40 = vld [vmem:[#allocation4_spill] sm:$0xff]  ;;  %v8545_v34 = vld [vmem:[#allocation19_spill] sm:$0xff] }
 0x1e0   : > { %v5276_v58 = vpop.f32.mrf.mxu0  ;;  %v4726_v27 = vpop.f32.mrf.mxu1  ;;  %v4078_v8 = vadd.f32 %v8542_v10, %v3655_v56 }
 0x1e1   : > { %5457 = vst [vmem:[#allocation2 + $0x30] sm:$0xff] %v5425_v29  ;;  %v5423_v4 = vadd.f32 %v5276_v58, %v4857_v12  ;;  %v4861_v62 = vadd.f32 %v4726_v27, %v4071_v17  ;;  %v8540_v12 = vld [vmem:[#allocation3_spill] sm:$0xff]  ;;  %v8544_v58 = vld [vmem:[#allocation16_spill] sm:$0xff] }
 0x1e2   : > { %v6723_v44 = vpop.f32.mrf.mxu0  ;;  %v6693_v15 = vpop.f32.mrf.mxu1  ;;  %v3658_v7 = vadd.f32 %v8541_v41, %v8540_v12  ;;  %v3656_v24 = vadd.f32 %v8544_v58, %v8543_v40  ;;  %v8555_v12 = vld [vmem:[#allocation8_spill] sm:$0xff]  ;;  %v8558_v40 = vld [vmem:[#allocation9_spill] sm:$0xff]  ;;  %v8559_v58 = vld [vmem:[#allocation26_spill] sm:$0xff] }
 0x1e3   : > { %5455 = vst [vmem:[#allocation2 + $0x20] sm:$0xff] %v5423_v4  ;;  %v5426_v6 = vadd.f32 %v6723_v44, %v4860_v3  ;;  %v4864_v20 = vadd.f32 %v6693_v15, %v4074_v14  ;;  %v8548_v14 = vld [vmem:[#allocation21_spill] sm:$0xff]  ;;  %v8556_v41 = vld [vmem:[#allocation24_spill] sm:$0xff] }
 0x1e4   : > { %v5485_v57 = vld [vmem:[#allocation2 + $0x10] ss:$2 sm:$0xff]  ;;  %v5517_v54 = vld [vmem:[#allocation2 + $0x11] ss:$2 sm:$0xff]  ;;  %v5279_v38 = vpop.f32.mrf.mxu0  ;;  %v4729_v33 = vpop.f32.mrf.mxu1 }
 0x1e5   : > { %5458 = vst [vmem:[#allocation2 + $0x38] sm:$0xff] %v5426_v6  ;;  %v5424_v9 = vadd.f32 %v5279_v38, %v4858_v49  ;;  %v5547_v31 = vmax.f32 %v5485_v57, %v5517_v54  ;;  %v4862_v25 = vadd.f32 %v4729_v33, %v4072_v19  ;;  %v4076_v49 = vadd.f32 %v8545_v34, %v3653_v52  ;;  %v8546_v57 = vld [vmem:[#allocation5_spill] sm:$0xff]  ;;  %v8547_v54 = vld [vmem:[#allocation18_spill] sm:$0xff] }
 0x1e6   : > { %v5483_v43 = vld [vmem:[#allocation2] ss:$2 sm:$0xff]  ;;  %v5515_v51 = vld [vmem:[#allocation2 + $0x1] ss:$2 sm:$0xff]  ;;  %v6726_v42 = vpop.f32.mrf.mxu0  ;;  %v6696_v55 = vpop.f32.mrf.mxu1  ;;  %v3659_v38 = vadd.f32 %v8547_v54, %v8546_v57 }
 0x1e7   : > { %v5546_v22 = vmax.f32 %v5483_v43, %v5515_v51  ;;  %5456 = vst [vmem:[#allocation2 + $0x28] sm:$0xff] %v5424_v9  ;;  %v5429_v53 = vadd.f32 %v6726_v42, %v4863_v32  ;;  %v4867_v39 = vadd.f32 %v6696_v55, %v4077_v11  ;;  %v8549_v43 = vld [vmem:[#allocation6_spill] sm:$0xff]  ;;  %v8550_v51 = vld [vmem:[#allocation20_spill] sm:$0xff]  ;;  %v8552_v11 = vld [vmem:[#allocation7_spill] sm:$0xff] }
 0x1e8   : > { %v5292_v35 = vpop.f32.mrf.mxu0  ;;  %v4742_v61 = vpop.f32.mrf.mxu1  ;;  %v3657_v42 = vadd.f32 %v8550_v51, %v8549_v43  ;;  %v8564_v51 = vld [vmem:[#allocation33_spill] sm:$0xff] }
 0x1e9   : > { %v5562_v37 = vmax.f32 %v5546_v22, %v5547_v31  ;;  %5461 = vst [vmem:[#allocation2 + $0x50] sm:$0xff] %v5429_v53  ;;  %v5427_v18 = vadd.f32 %v5292_v35, %v4861_v62  ;;  %v4865_v46 = vadd.f32 %v4742_v61, %v4075_v47  ;;  %v4081_v62 = vadd.f32 %v8548_v14, %v3658_v7  ;;  %v8551_v22 = vld [vmem:[#allocation23_spill] sm:$0xff] }
 0x1ea   : > { %v6727_v1 = vpop.f32.mrf.mxu0  ;;  %v6697_v13 = vpop.f32.mrf.mxu1  ;;  %v3660_v7 = vadd.f32 %v8556_v41, %v8555_v12 }
 0x1eb   : > { %v5577_v48 = vadd.f32 %v8411_v36, %v5562_v37  ;;  %5459 = vst [vmem:[#allocation2 + $0x40] sm:$0xff] %v5427_v18  ;;  %v5430_v26 = vadd.f32 %v6727_v1, %v4864_v20  ;;  %v4868_v32 = vadd.f32 %v6697_v13, %v4078_v8  ;;  %v4079_v20 = vadd.f32 %v8551_v22, %v3656_v24  ;;  %v8553_v37 = vld [vmem:[#allocation22_spill] sm:$0xff]  ;;  %v8554_v1 = vld [vmem:[#allocation25_spill] sm:$0xff] }
 0x1ec   : > { %v5489_v0 = vld [vmem:[#allocation2 + $0x30] ss:$2 sm:$0xff]  ;;  %v5521_v5 = vld [vmem:[#allocation2 + $0x31] ss:$2 sm:$0xff]  ;;  %v5295_v60 = vpop.f32.mrf.mxu0  ;;  %v4745_v29 = vpop.f32.mrf.mxu1  ;;  %v4082_v47 = vadd.f32 %v8554_v1, %v3659_v38  ;;  %v3663_v24 = vadd.f32 %v8559_v58, %v8558_v40  ;;  %v8563_v38 = vld [vmem:[#allocation31_spill] sm:$0xff] }
 0x1ed   : > { %v5585_v63 = vmax.f32 %v5577_v48, 0.0  ;;  %5462 = vst [vmem:[#allocation2 + $0x58] sm:$0xff] %v5430_v26  ;;  %v5428_v3 = vadd.f32 %v5295_v60, %v4862_v25  ;;  %v5549_v44 = vmax.f32 %v5489_v0, %v5521_v5  ;;  %v4866_v33 = vadd.f32 %v4745_v29, %v4076_v49  ;;  %v8557_v0 = vld [vmem:[#allocation27_spill] sm:$0xff]  ;;  %v8572_v58 = vld [vmem:[#allocation37_spill] sm:$0xff] }
 0x1ee   : > { %v5487_v4 = vld [vmem:[#allocation2 + $0x20] ss:$2 sm:$0xff]  ;;  %v5519_v27 = vld [vmem:[#allocation2 + $0x21] ss:$2 sm:$0xff]  ;;  %v6730_v16 = vpop.f32.mrf.mxu0  ;;  %v6700_v15 = vpop.f32.mrf.mxu1  ;;  %v3662_v25 = vadd.f32 %v8553_v37, %v8552_v11  ;;  %v4080_v5 = vadd.f32 %v8557_v0, %v3657_v42  ;;  %v4086_v42 = vadd.f32 %v8564_v51, %v3663_v24 }
 0x1ef   : > { %5593 = vst [vmem:[%s8424_s22] sm:$0xff] %v5585_v63  ;;  %v5548_v17 = vmax.f32 %v5487_v4, %v5519_v27  ;;  %5460 = vst [vmem:[#allocation2 + $0x48] sm:$0xff] %v5428_v3  ;;  %v5433_v6 = vadd.f32 %v6730_v16, %v4867_v39  ;;  %v4871_v55 = vadd.f32 %v6700_v15, %v4081_v62  ;;  %v8560_v4 = vld [vmem:[#allocation29_spill] sm:$0xff]  ;;  %v8569_v0 = vld [vmem:[#allocation32_spill] sm:$0xff] }
 0x1f0   : > { %v5308_v30 = vpop.f32.mrf.mxu0  ;;  %v4758_v19 = vpop.f32.mrf.mxu1  ;;  %v4085_v27 = vadd.f32 %v8560_v4, %v3662_v25  ;;  %v8573_v4 = vld [vmem:[#allocation14_spill] sm:$0xff] }
 0x1f1   : > { %v5563_v9 = vmax.f32 %v5548_v17, %v5549_v44  ;;  %5465 = vst [vmem:[#allocation2 + $0x70] sm:$0xff] %v5433_v6  ;;  %v5431_v23 = vadd.f32 %v5308_v30, %v4865_v46  ;;  %v4869_v39 = vadd.f32 %v4758_v19, %v4079_v20  ;;  %v8562_v6 = vld [vmem:[#allocation28_spill] sm:$0xff]  ;;  %v4083_v30 = vadd.f32 %v8563_v38, %v3660_v7 }
 0x1f2   : > { %v6731_v31 = vpop.f32.mrf.mxu0  ;;  %v6701_v35 = vpop.f32.mrf.mxu1  ;;  %v8568_v7 = vld [vmem:[#allocation12_spill] sm:$0xff] }
 0x1f3   : > { %v5578_v53 = vadd.f32 %v8411_v36, %v5563_v9  ;;  %5463 = vst [vmem:[#allocation2 + $0x60] sm:$0xff] %v5431_v23  ;;  %v5434_v56 = vadd.f32 %v6731_v31, %v4868_v32  ;;  %v4872_v3 = vadd.f32 %v6701_v35, %v4082_v47  ;;  %v8561_v32 = vld [vmem:[#allocation10_spill] sm:$0xff]  ;;  %v8566_v47 = vld [vmem:[#allocation11_spill] sm:$0xff] }
 0x1f4   : > { %v5493_v18 = vld [vmem:[#allocation2 + $0x50] ss:$2 sm:$0xff]  ;;  %v5525_v61 = vld [vmem:[#allocation2 + $0x51] ss:$2 sm:$0xff]  ;;  %v5311_v52 = vpop.f32.mrf.mxu0  ;;  %v4761_v13 = vpop.f32.mrf.mxu1  ;;  %v3661_v15 = vadd.f32 %v8562_v6, %v8561_v32 }
 0x1f5   : > { %v5586_v48 = vmax.f32 %v5578_v53, 0.0  ;;  %5466 = vst [vmem:[#allocation2 + $0x78] sm:$0xff] %v5434_v56  ;;  %v5432_v26 = vadd.f32 %v5311_v52, %v4866_v33  ;;  %v5551_v63 = vmax.f32 %v5493_v18, %v5525_v61  ;;  %v4870_v44 = vadd.f32 %v4761_v13, %v4080_v5  ;;  %v8565_v53 = vld [vmem:[#allocation35_spill] sm:$0xff]  ;;  %v8575_v6 = vld [vmem:[#allocation38_spill] sm:$0xff] }
 0x1f6   : > { %v5491_v60 = vld [vmem:[#allocation2 + $0x40] ss:$2 sm:$0xff]  ;;  %v5523_v10 = vld [vmem:[#allocation2 + $0x41] ss:$2 sm:$0xff]  ;;  %v6734_v8 = vpop.f32.mrf.mxu0  ;;  %v6704_v49 = vpop.f32.mrf.mxu1  ;;  %v3664_v5 = vadd.f32 %v8569_v0, %v8568_v7 }
 0x1f7   : > { %5594 = vst [vmem:[%s8424_s22 + $0x8] sm:$0xff] %v5586_v48  ;;  %v5550_v46 = vmax.f32 %v5491_v60, %v5523_v10  ;;  %5464 = vst [vmem:[#allocation2 + $0x68] sm:$0xff] %v5432_v26  ;;  %v5437_v29 = vadd.f32 %v6734_v8, %v4871_v55  ;;  %v4875_v62 = vadd.f32 %v6704_v49, %v4085_v27  ;;  %v8567_v48 = vld [vmem:[#allocation30_spill] sm:$0xff]  ;;  %v8574_v27 = vld [vmem:[#allocation36_spill] sm:$0xff] }
 0x1f8   : > { %v5324_v34 = vpop.f32.mrf.mxu0  ;;  %v4774_v54 = vpop.f32.mrf.mxu1  ;;  %v4084_v55 = vadd.f32 %v8565_v53, %v3661_v15  ;;  %v4087_v15 = vadd.f32 %v8575_v6, %v3664_v5 }
 0x1f9   : > { %v5564_v16 = vmax.f32 %v5550_v46, %v5551_v63  ;;  %5469 = vst [vmem:[#allocation2 + $0x90] sm:$0xff] %v5437_v29  ;;  %v5435_v17 = vadd.f32 %v5324_v34, %v4869_v39  ;;  %v4873_v22 = vadd.f32 %v4774_v54, %v4083_v30  ;;  %v3666_v39 = vadd.f32 %v8567_v48, %v8566_v47  ;;  %v8571_v29 = vld [vmem:[#allocation34_spill] sm:$0xff] }
 0x1fa   : > { %v6735_v57 = vpop.f32.mrf.mxu0  ;;  %v6705_v43 = vpop.f32.mrf.mxu1 }
 0x1fb   : > { %v5579_v14 = vadd.f32 %v8411_v36, %v5564_v16  ;;  %5467 = vst [vmem:[#allocation2 + $0x80] sm:$0xff] %v5435_v17  ;;  %v5438_v9 = vadd.f32 %v6735_v57, %v4872_v3  ;;  %v4876_v61 = vadd.f32 %v6705_v43, %v4086_v42  ;;  %v8570_v3 = vld [vmem:[#allocation13_spill] sm:$0xff]  ;;  %v4089_v24 = vadd.f32 %v8572_v58, %v3666_v39 }
 0x1fc   : > { %v5497_v33 = vld [vmem:[#allocation2 + $0x70] ss:$2 sm:$0xff]  ;;  %v5529_v23 = vld [vmem:[#allocation2 + $0x71] ss:$2 sm:$0xff]  ;;  %v5327_v19 = vpop.f32.mrf.mxu0  ;;  %v4777_v37 = vpop.f32.mrf.mxu1  ;;  %v3667_v40 = vadd.f32 %v8571_v29, %v8570_v3  ;;  %v3665_v16 = vadd.f32 %v8574_v27, %v8573_v4 }
 0x1fd   : > { %v5587_v31 = vmax.f32 %v5579_v14, 0.0  ;;  %5470 = vst [vmem:[#allocation2 + $0x98] sm:$0xff] %v5438_v9  ;;  %v5436_v20 = vadd.f32 %v5327_v19, %v4870_v44  ;;  %v5553_v25 = vmax.f32 %v5497_v33, %v5529_v23  ;;  %v4874_v13 = vadd.f32 %v4777_v37, %v4084_v55 }
 0x1fe   : > { %v5495_v56 = vld [vmem:[#allocation2 + $0x60] ss:$2 sm:$0xff]  ;;  %v5527_v35 = vld [vmem:[#allocation2 + $0x61] ss:$2 sm:$0xff]  ;;  %v6738_v11 = vpop.f32.mrf.mxu0  ;;  %v4090_v14 = vadd.f32 %v8344_v2, %v3667_v40  ;;  %v4088_v43 = vadd.f32 %v8346_v21, %v3665_v16 }
 0x1ff   : > { %5595 = vst [vmem:[%s8424_s22 + $0x10] sm:$0xff] %v5587_v31  ;;  %v5552_v18 = vmax.f32 %v5495_v56, %v5527_v35  ;;  %5468 = vst [vmem:[#allocation2 + $0x88] sm:$0xff] %v5436_v20  ;;  %v5441_v52 = vadd.f32 %v6738_v11, %v4875_v62 }
 0x200   : > { %v5340_v1 = vpop.f32.mrf.mxu0 }
 0x201   : > { %v5565_v26 = vmax.f32 %v5552_v18, %v5553_v25  ;;  %5473 = vst [vmem:[#allocation2 + $0xb0] sm:$0xff] %v5441_v52  ;;  %v5439_v12 = vadd.f32 %v5340_v1, %v4873_v22 }
 0x202   : > { %v6739_v41 = vpop.f32.mrf.mxu0 }
 0x203   : > { %v5580_v60 = vadd.f32 %v8411_v36, %v5565_v26  ;;  %5471 = vst [vmem:[#allocation2 + $0xa0] sm:$0xff] %v5439_v12  ;;  %v5442_v10 = vadd.f32 %v6739_v41, %v4876_v61 }
 0x204   : > { %v5501_v8 = vld [vmem:[#allocation2 + $0x90] ss:$2 sm:$0xff]  ;;  %v5533_v63 = vld [vmem:[#allocation2 + $0x91] ss:$2 sm:$0xff]  ;;  %v5343_v46 = vpop.f32.mrf.mxu0 }
 0x205   : > { %v5588_v34 = vmax.f32 %v5580_v60, 0.0  ;;  %5474 = vst [vmem:[#allocation2 + $0xb8] sm:$0xff] %v5442_v10  ;;  %v5440_v49 = vadd.f32 %v5343_v46, %v4874_v13  ;;  %v6708_v32 = vpop.f32.mrf.mxu1  ;;  %v5555_v57 = vmax.f32 %v5501_v8, %v5533_v63 }
 0x206   : > { %v5499_v44 = vld [vmem:[#allocation2 + $0x80] ss:$2 sm:$0xff]  ;;  %v5531_v17 = vld [vmem:[#allocation2 + $0x81] ss:$2 sm:$0xff]  ;;  %v4879_v38 = vadd.f32 %v6708_v32, %v4089_v24 }
 0x207   : > { %5596 = vst [vmem:[%s8424_s22 + $0x18] sm:$0xff] %v5588_v34  ;;  %v5554_v54 = vmax.f32 %v5499_v44, %v5531_v17  ;;  %5472 = vst [vmem:[#allocation2 + $0xa8] sm:$0xff] %v5440_v49  ;;  %v4790_v30 = vpop.f32.mrf.mxu1 }
 0x208   : > { %v4877_v9 = vadd.f32 %v4790_v30, %v4087_v15  ;;  %v6742_v33 = vpop.f32.mrf.mxu0 }
 0x209   : > { %v5566_v62 = vmax.f32 %v5554_v54, %v5555_v57  ;;  %v6709_v23 = vpop.f32.mrf.mxu1  ;;  %v5445_v19 = vadd.f32 %v6742_v33, %v4879_v38 }
 0x20a   : > { %v4880_v42 = vadd.f32 %v6709_v23, %v4090_v14  ;;  %v5356_v31 = vpop.f32.mrf.mxu0 }
 0x20b   : > { %v5581_v51 = vadd.f32 %v8411_v36, %v5566_v62  ;;  %5477 = vst [vmem:[#allocation2 + $0xd0] sm:$0xff] %v5445_v19  ;;  %v4793_v53 = vpop.f32.mrf.mxu1  ;;  %v5443_v55 = vadd.f32 %v5356_v31, %v4877_v9 }
 0x20c   : > { %v5505_v22 = vld [vmem:[#allocation2 + $0xb0] ss:$2 sm:$0xff]  ;;  %v5537_v20 = vld [vmem:[#allocation2 + $0xb1] ss:$2 sm:$0xff]  ;;  %v4878_v35 = vadd.f32 %v4793_v53, %v4088_v43  ;;  %v6743_v2 = vpop.f32.mrf.mxu0 }
 0x20d   : > { %v5589_v56 = vmax.f32 %v5581_v51, 0.0  ;;  %5475 = vst [vmem:[#allocation2 + $0xc0] sm:$0xff] %v5443_v55  ;;  %v5446_v25 = vadd.f32 %v6743_v2, %v4880_v42  ;;  %v5557_v21 = vmax.f32 %v5505_v22, %v5537_v20 }
 0x20e   : > { %v5503_v11 = vld [vmem:[#allocation2 + $0xa0] ss:$2 sm:$0xff]  ;;  %v5535_v37 = vld [vmem:[#allocation2 + $0xa1] ss:$2 sm:$0xff]  ;;  %v5359_v61 = vpop.f32.mrf.mxu0 }
 0x20f   : > { %5597 = vst [vmem:[%s8424_s22 + $0x20] sm:$0xff] %v5589_v56  ;;  %v5556_v18 = vmax.f32 %v5503_v11, %v5535_v37  ;;  %5478 = vst [vmem:[#allocation2 + $0xd8] sm:$0xff] %v5446_v25  ;;  %v5444_v52 = vadd.f32 %v5359_v61, %v4878_v35 }
 0x211   : > { %v5567_v1 = vmax.f32 %v5556_v18, %v5557_v21  ;;  %5476 = vst [vmem:[#allocation2 + $0xc8] sm:$0xff] %v5444_v52 }
 0x213   : > { %v5582_v47 = vadd.f32 %v8411_v36, %v5567_v1  ;;  %v6712_v48 = vpop.f32.mrf.mxu1 }
 0x214   : > { %v4883_v26 = vadd.f32 %v6712_v48, %v8353_v28 }
 0x215   : > { %v5590_v39 = vmax.f32 %v5582_v47, 0.0  ;;  %v4806_v13 = vpop.f32.mrf.mxu1 }
 0x216   : > { %v5509_v12 = vld [vmem:[#allocation2 + $0xd0] ss:$2 sm:$0xff]  ;;  %v5541_v41 = vld [vmem:[#allocation2 + $0xd1] ss:$2 sm:$0xff]  ;;  %v4881_v7 = vadd.f32 %v4806_v13, %v8358_v50  ;;  %v6746_v0 = vpop.f32.mrf.mxu0 }
 0x217   : > { %5598 = vst [vmem:[%s8424_s22 + $0x28] sm:$0xff] %v5590_v39  ;;  %v6713_v5 = vpop.f32.mrf.mxu1  ;;  %v5449_v60 = vadd.f32 %v6746_v0, %v4883_v26  ;;  %v5559_v3 = vmax.f32 %v5509_v12, %v5541_v41 }
 0x218   : > { %v5507_v10 = vld [vmem:[#allocation2 + $0xc0] ss:$2 sm:$0xff]  ;;  %v5539_v8 = vld [vmem:[#allocation2 + $0xc1] ss:$2 sm:$0xff]  ;;  %v4884_v63 = vadd.f32 %v6713_v5, %v8363_v45  ;;  %v5372_v46 = vpop.f32.mrf.mxu0 }
 0x219   : > { %v5558_v29 = vmax.f32 %v5507_v10, %v5539_v8  ;;  %5481 = vst [vmem:[#allocation2 + $0xf0] sm:$0xff] %v5449_v60  ;;  %v4809_v40 = vpop.f32.mrf.mxu1  ;;  %v5447_v28 = vadd.f32 %v5372_v46, %v4881_v7 }
 0x21a   : > { %v4882_v58 = vadd.f32 %v4809_v40, %v8368_v59  ;;  %v6747_v24 = vpop.f32.mrf.mxu0 }
 0x21b   : > { %v5568_v34 = vmax.f32 %v5558_v29, %v5559_v3  ;;  %5479 = vst [vmem:[#allocation2 + $0xe0] sm:$0xff] %v5447_v28  ;;  %v5450_v50 = vadd.f32 %v6747_v24, %v4884_v63 }
 0x21c   : > { %v5375_v49 = vpop.f32.mrf.mxu0 }
 0x21d   : > { %v5583_v4 = vadd.f32 %v8411_v36, %v5568_v34  ;;  %5482 = vst [vmem:[#allocation2 + $0xf8] sm:$0xff] %v5450_v50  ;;  %v5448_v27 = vadd.f32 %v5375_v49, %v4882_v58 }
 0x21f   : > { %v5591_v45 = vmax.f32 %v5583_v4, 0.0  ;;  %5480 = vst [vmem:[#allocation2 + $0xe8] sm:$0xff] %v5448_v27 }
 0x221   : > { %5599 = vst [vmem:[%s8424_s22 + $0x30] sm:$0xff] %v5591_v45 }
 0x224   : > { %v5513_v16 = vld [vmem:[#allocation2 + $0xf0] ss:$2 sm:$0xff]  ;;  %v5545_v44 = vld [vmem:[#allocation2 + $0xf1] ss:$2 sm:$0xff] }
 0x225   : > { %v5561_v6 = vmax.f32 %v5513_v16, %v5545_v44 }
 0x226   : > { %v5511_v17 = vld [vmem:[#allocation2 + $0xe0] ss:$2 sm:$0xff]  ;;  %v5543_v32 = vld [vmem:[#allocation2 + $0xe1] ss:$2 sm:$0xff] }
 0x227   : > { %v5560_v15 = vmax.f32 %v5511_v17, %v5543_v32 }
 0x229   : > { %v5569_v59 = vmax.f32 %v5560_v15, %v5561_v6 }
 0x22b   : > { %v5584_v57 = vadd.f32 %v8411_v36, %v5569_v59 }
 0x22d   : > { %v5592_v54 = vmax.f32 %v5584_v57, 0.0 }
 0x22f   : > { %5600 = vst [vmem:[%s8424_s22 + $0x38] sm:$0xff] %v5592_v54 }
 0x230 PF: > { %s13_s14 = sadd.s32 1, %s6855_s14   ;;  %s8576_s12 = smov %s6851_s13 }
 0x231   : > { %p10_p6 = scmp.ge.s32.totalorder %s13_s14, 4   ;;  %s8577_s13 = smov %s8579_s15 }
 0x233   :  { %12 = sbr.rel (!%p10_p6) target bundleno = 2 (0x2), region = 103 }

</bundles_post_ra>
